<compile_context>
chip_gen: v6e
topology: v6e:2x2x1
jax: 0.10.0
libtpu: 0.0.40
codegen_flags: <defaults>
</compile_context>

<pallas_src>
import functools

import jax
import jax.numpy as jnp
from jax import lax
from jax.experimental import pallas as pl
from jax.experimental.pallas import tpu as pltpu

LANES = 128                       # TPU lane width: pad Cout up to a multiple of this
COMPUTE_DTYPE = jnp.bfloat16      # MXU-native activations/weights (f32 accumulate)
VMEM_LIMIT_BYTES = 32 * 1024 * 1024


def _round_up(x, m):
    return (x + m - 1) // m * m


def _pick_tile_m(m):
    """Largest multiple-of-8 divisor of m (<= 2048 rows), preferring >= 2 grid steps."""
    limit = min(2048, m if m < 16 else m // 2)
    best = None
    for tm in range(8, limit + 1, 8):
        if m % tm == 0:
            best = tm
    return best if best is not None else m


def _pick_tile_h(h, w):
    """Largest even divisor of h keeping roughly <= 4096 output pixels per tile."""
    best = 2
    for th in range(2, h + 1, 2):
        if h % th == 0 and th * w <= 4096:
            best = th
    return best


# ----------------------------------------------------------------------------
# Pallas kernels
# ----------------------------------------------------------------------------
def _im2col_matmul_bn_relu_kernel(xt_ref, w_ref, scale_ref, shift_ref, o_ref):
    """Stem conv: rows = output pixels, K = 9*Cin merged by the wrapper.

    xt_ref    : (TM, 9*Cin)   im2col rows for TM output pixels
    w_ref     : (9*Cin, Cp)   conv weights, taps flattened into K
    scale_ref : (1, Cp)       folded BN scale  = gamma / sqrt(var + eps)
    shift_ref : (1, Cp)       folded BN shift  = beta + (bias - mean) * scale
    o_ref     : (TM, Cp)      lane-dense output tile
    """
    acc = jnp.dot(xt_ref[...], w_ref[...], preferred_element_type=jnp.float32)
    y = jnp.maximum(acc * scale_ref[...] + shift_ref[...], 0.0)
    o_ref[...] = y.astype(o_ref.dtype)


def _conv3x3_bn_relu_pool_kernel(x_ref, w_ref, scale_ref, shift_ref,
                                 o_ref, p_ref, rowmax_ref):
    """Fused 3x3 'same' conv + folded BN + ReLU + 2x2 max-pool for one
    (batch element, TH-row) tile.

    x_ref      : (1, H+2, W+2, Cin)   zero-padded image, Cin % 128 == 0,
                                      resident in VMEM across the H-tile axis
    w_ref      : (9*Cin, Cp)          3x3 taps flattened into the contraction dim
    scale_ref  : (1, Cp)              folded BN scale (f32)
    shift_ref  : (1, Cp)              folded BN shift (f32)
    o_ref      : (1, TH, W, Cp)       conv+BN+ReLU output tile
    p_ref      : (1, TH//2, W//2, Cp) pooled output tile
    rowmax_ref : (TH//2, W, Cp) f32   scratch for the row-paired max
    """
    _, th, w_out, cout_p = o_ref.shape
    cin = x_ref.shape[-1]
    i = pl.program_id(1)
    row0 = i * th

    # In-VMEM im2col: 9 shifted reads of the resident padded image, merged into the
    # contraction dim (lane-aligned, Cin % 128 == 0) -> ONE MXU matmul with K = 9*Cin
    # instead of 9 short-K matmuls, and no 9x im2col traffic to/from HBM.
    taps = []
    for dy in range(3):
        for dx in range(3):
            t = x_ref[0, pl.ds(row0 + dy, th), pl.ds(dx, w_out), :]   # (TH, W, Cin)
            taps.append(t.reshape(th * w_out, cin))
    patches = jnp.concatenate(taps, axis=-1)                          # (TH*W, 9*Cin)
    acc = jnp.dot(patches, w_ref[...], preferred_element_type=jnp.float32)

    y = jnp.maximum(acc * scale_ref[...] + shift_ref[...], 0.0)       # f32 (TH*W, Cp)
    o_ref[0] = y.reshape(th, w_out, cout_p).astype(o_ref.dtype)

    # Fused 2x2 max-pool epilogue (no extra HBM round trip of y):
    #   1) pair adjacent rows (major-dim split reshape, layout free)
    #   2) pair adjacent columns via a sublane-strided read of a VMEM scratch
    yr = y.reshape(th // 2, 2, w_out, cout_p)
    rowmax_ref[...] = jnp.maximum(yr[:, 0], yr[:, 1])                 # (TH//2, W, Cp)
    p_ref[0] = jnp.maximum(
        rowmax_ref[:, pl.ds(0, w_out // 2, stride=2), :],
        rowmax_ref[:, pl.ds(1, w_out // 2, stride=2), :],
    ).astype(p_ref.dtype)


# ----------------------------------------------------------------------------
# Wrappers
# ----------------------------------------------------------------------------
def _prep_conv_params(w_hwio, scale, shift, cin_x, cout_p):
    """Weights -> (9*Cin_x, Cp) bf16 (zero-padded channels); BN scale/shift -> (1, Cp) f32."""
    kh, kw, cin_w, cout = w_hwio.shape
    assert (kh, kw) == (3, 3)
    assert cin_w <= cin_x
    wt = w_hwio.astype(COMPUTE_DTYPE)
    if cin_w < cin_x:                       # match the zero-padded input channels
        wt = jnp.pad(wt, ((0, 0), (0, 0), (0, cin_x - cin_w), (0, 0)))
    wt = wt.reshape(9 * cin_x, cout)
    wt = jnp.pad(wt, ((0, 0), (0, cout_p - cout)))
    sc = jnp.pad(scale.astype(jnp.float32), (0, cout_p - cout)).reshape(1, cout_p)
    sh = jnp.pad(shift.astype(jnp.float32), (0, cout_p - cout)).reshape(1, cout_p)
    return wt, sc, sh


def conv3x3_bn_relu(x_nhwc, w_hwio, scale, shift):
    """Stem 3x3 'same' conv + folded BN + ReLU (single-matmul Pallas kernel).

    Intended for a small / non-lane-aligned Cin (the UNet stem): the wrapper builds the
    (M, 9*Cin) im2col (cheap when Cin is tiny) so the kernel is one lane-dense MXU
    matmul over large M tiles.  Returns (N, H, W, Cp) in COMPUTE_DTYPE, Cp = round_up(Cout, 128).
    """
    n, h, w, cin = x_nhwc.shape
    cout = w_hwio.shape[-1]
    cout_p = _round_up(cout, LANES)
    wt, sc, sh = _prep_conv_params(w_hwio, scale, shift, cin, cout_p)

    xp = jnp.pad(x_nhwc.astype(COMPUTE_DTYPE), ((0, 0), (1, 1), (1, 1), (0, 0)))
    taps = [xp[:, dy:dy + h, dx:dx + w, :] for dy in range(3) for dx in range(3)]
    xt = jnp.concatenate(taps, axis=-1).reshape(n * h * w, 9 * cin)

    m = n * h * w
    tm = _pick_tile_m(m)
    out = pl.pallas_call(
        _im2col_matmul_bn_relu_kernel,
        out_shape=jax.ShapeDtypeStruct((m, cout_p), COMPUTE_DTYPE),
        grid_spec=pltpu.PrefetchScalarGridSpec(
            num_scalar_prefetch=0,
            grid=(m // tm,),
            in_specs=[
                pl.BlockSpec((tm, 9 * cin), lambda i: (i, 0)),
                pl.BlockSpec((9 * cin, cout_p), lambda i: (0, 0)),
                pl.BlockSpec((1, cout_p), lambda i: (0, 0)),
                pl.BlockSpec((1, cout_p), lambda i: (0, 0)),
            ],
            out_specs=pl.BlockSpec((tm, cout_p), lambda i: (i, 0)),
        ),
        compiler_params=pltpu.CompilerParams(
            dimension_semantics=("parallel",),
            vmem_limit_bytes=VMEM_LIMIT_BYTES,
        ),
    )(xt, wt, sc, sh)
    return out.reshape(n, h, w, cout_p)


def conv3x3_bn_relu_maxpool2x2(x_nhwc, w_hwio, scale, shift):
    """Fused 3x3 'same' conv + folded BN + ReLU + 2x2/stride-2 max-pool.

    Requires Cin % 128 == 0 (true for the second conv, whose input is the lane-padded
    output of the first).  The padded image stays resident in VMEM across the H-tile
    axis and the 9 taps are read & K-merged in-kernel, so there is no im2col
    materialization in HBM and no separate pooling pass.
    Returns (y, p) with lane-padded channels, both in COMPUTE_DTYPE.
    """
    n, h, w, cin = x_nhwc.shape
    cout = w_hwio.shape[-1]
    cout_p = _round_up(cout, LANES)
    assert cin % LANES == 0, "fused conv+pool kernel expects lane-aligned Cin"
    assert h % 2 == 0 and w % 2 == 0, "2x2 max-pool needs even H and W"
    # TODO(synk): odd H/W (PyTorch MaxPool2d floors the output size) is not handled.

    wt, sc, sh = _prep_conv_params(w_hwio, scale, shift, cin, cout_p)
    xp = jnp.pad(x_nhwc.astype(COMPUTE_DTYPE), ((0, 0), (1, 1), (1, 1), (0, 0)))

    th = _pick_tile_h(h, w)
    grid = (n, h // th)

    y_shape = jax.ShapeDtypeStruct((n, h, w, cout_p), COMPUTE_DTYPE)
    p_shape = jax.ShapeDtypeStruct((n, h // 2, w // 2, cout_p), COMPUTE_DTYPE)
    y, p = pl.pallas_call(
        _conv3x3_bn_relu_pool_kernel,
        out_shape=(y_shape, p_shape),
        grid_spec=pltpu.PrefetchScalarGridSpec(
            num_scalar_prefetch=0,
            grid=grid,
            in_specs=[
                # full padded image per batch element, resident across the H-tile axis
                pl.BlockSpec((1, h + 2, w + 2, cin), lambda b, i: (b, 0, 0, 0)),
                pl.BlockSpec((9 * cin, cout_p), lambda b, i: (0, 0)),
                pl.BlockSpec((1, cout_p), lambda b, i: (0, 0)),
                pl.BlockSpec((1, cout_p), lambda b, i: (0, 0)),
            ],
            out_specs=(
                pl.BlockSpec((1, th, w, cout_p), lambda b, i: (b, i, 0, 0)),
                pl.BlockSpec((1, th // 2, w // 2, cout_p), lambda b, i: (b, i, 0, 0)),
            ),
            scratch_shapes=[pltpu.VMEM((th // 2, w, cout_p), jnp.float32)],
        ),
        compiler_params=pltpu.CompilerParams(
            dimension_semantics=("parallel", "parallel"),
            vmem_limit_bytes=VMEM_LIMIT_BYTES,
        ),
    )(xp, wt, sc, sh)
    return y, p


# ----------------------------------------------------------------------------
# Parameters (deterministic, synthetic; BatchNorm folded for inference)
# ----------------------------------------------------------------------------
def _fold_bn(gamma, beta, mean, var, conv_bias, eps=1e-5):
    scale = gamma / jnp.sqrt(var + eps)
    shift = beta + (conv_bias - mean) * scale
    return scale, shift


def init_params(key, in_c, out_c):
    ks = jax.random.split(key, 12)

    def conv_w(k, cin, cout):
        fan_in = cin * 9
        return jax.random.normal(k, (3, 3, cin, cout), jnp.float32) / jnp.sqrt(
            jnp.float32(fan_in))

    w1 = conv_w(ks[0], in_c, out_c)
    b1 = 0.1 * jax.random.normal(ks[1], (out_c,), jnp.float32)
    g1 = 1.0 + 0.1 * jax.random.normal(ks[2], (out_c,), jnp.float32)
    be1 = 0.1 * jax.random.normal(ks[3], (out_c,), jnp.float32)
    m1 = 0.1 * jax.random.normal(ks[4], (out_c,), jnp.float32)
    v1 = 1.0 + 0.5 * jnp.abs(jax.random.normal(ks[5], (out_c,), jnp.float32))

    w2 = conv_w(ks[6], out_c, out_c)
    b2 = 0.1 * jax.random.normal(ks[7], (out_c,), jnp.float32)
    g2 = 1.0 + 0.1 * jax.random.normal(ks[8], (out_c,), jnp.float32)
    be2 = 0.1 * jax.random.normal(ks[9], (out_c,), jnp.float32)
    m2 = 0.1 * jax.random.normal(ks[10], (out_c,), jnp.float32)
    v2 = 1.0 + 0.5 * jnp.abs(jax.random.normal(ks[11], (out_c,), jnp.float32))

    s1, sh1 = _fold_bn(g1, be1, m1, v1, b1)
    s2, sh2 = _fold_bn(g2, be2, m2, v2, b2)
    return dict(w1=w1, scale1=s1, shift1=sh1, w2=w2, scale2=s2, shift2=sh2)


# ----------------------------------------------------------------------------
# encoder_block forward
# ----------------------------------------------------------------------------
@jax.jit
def encoder_block_forward(x_nchw, params):
    cout = params["w1"].shape[-1]
    # NCHW (PyTorch) -> NHWC (channels on TPU lanes); cast first so the transpose moves bf16.
    # TODO(synk): accept/produce NHWC directly to drop these transposes from the hot path.
    x = jnp.transpose(x_nchw.astype(COMPUTE_DTYPE), (0, 2, 3, 1))
    y = conv3x3_bn_relu(x, params["w1"], params["scale1"], params["shift1"])
    y, p = conv3x3_bn_relu_maxpool2x2(y, params["w2"], params["scale2"], params["shift2"])
    # drop the lane padding, back to NCHW / f32 to match the PyTorch module
    y = y[..., :cout]
    p = p[..., :cout]
    return (jnp.transpose(y, (0, 3, 1, 2)).astype(jnp.float32),
            jnp.transpose(p, (0, 3, 1, 2)).astype(jnp.float32))


# ----------------------------------------------------------------------------
# Pure-JAX reference (numerical sanity check, same bf16 rounding of inputs)
# ----------------------------------------------------------------------------
def _ref_conv_bn_relu(x_nhwc, w_hwio, scale, shift):
    y = lax.conv_general_dilated(
        x_nhwc.astype(COMPUTE_DTYPE), w_hwio.astype(COMPUTE_DTYPE),
        window_strides=(1, 1), padding="SAME",
        dimension_numbers=("NHWC", "HWIO", "NHWC"),
        preferred_element_type=jnp.float32,
    )
    y = y * scale.reshape(1, 1, 1, -1) + shift.reshape(1, 1, 1, -1)
    return jnp.maximum(y, 0.0).astype(COMPUTE_DTYPE)


def _ref_forward(x_nchw, params):
    x = jnp.transpose(x_nchw.astype(COMPUTE_DTYPE), (0, 2, 3, 1))
    y = _ref_conv_bn_relu(x, params["w1"], params["scale1"], params["shift1"])
    y = _ref_conv_bn_relu(y, params["w2"], params["scale2"], params["shift2"])
    yf = y.astype(jnp.float32)
    p = jnp.maximum(
        jnp.maximum(yf[:, 0::2, 0::2, :], yf[:, 0::2, 1::2, :]),
        jnp.maximum(yf[:, 1::2, 0::2, :], yf[:, 1::2, 1::2, :]))
    return jnp.transpose(yf, (0, 3, 1, 2)), jnp.transpose(p, (0, 3, 1, 2))


# ----------------------------------------------------------------------------
if __name__ == "__main__":
    key = jax.random.PRNGKey(0)
    k_x, k_p = jax.random.split(key)

    N, Cin, Cout, H, W = 2, 4, 8, 16, 16
    x = jax.random.normal(k_x, (N, Cin, H, W), jnp.float32)   # NCHW like PyTorch
    params = init_params(k_p, Cin, Cout)

    x_out, p_out = encoder_block_forward(x, params)
    jax.block_until_ready((x_out, p_out))

    assert x_out.shape == (N, Cout, H, W), x_out.shape
    assert p_out.shape == (N, Cout, H // 2, W // 2), p_out.shape

    x_ref, p_ref = _ref_forward(x, params)
    assert bool(jnp.allclose(x_out, x_ref, atol=3e-2, rtol=3e-2)), \
        float(jnp.max(jnp.abs(x_out - x_ref)))
    assert bool(jnp.allclose(p_out, p_ref, atol=3e-2, rtol=3e-2)), \
        float(jnp.max(jnp.abs(p_out - p_ref)))

    print("KERNEL_OK")
</pallas_src>

<mosaic_0001>
module attributes {stable_mosaic.version = 11 : i64} {
  func.func @_im2col_matmul_bn_relu_kernel(%arg0: i32, %arg1: memref<256x36xbf16, #tpu.memory_space<vmem>>, %arg2: memref<36x128xbf16, #tpu.memory_space<vmem>>, %arg3: memref<1x128xf32, #tpu.memory_space<vmem>>, %arg4: memref<1x128xf32, #tpu.memory_space<vmem>>, %arg5: memref<256x128xbf16, #tpu.memory_space<vmem>>) attributes {dimension_semantics = [#tpu.dimension_semantics<parallel>], iteration_bounds = array<i64: 2>, scalar_prefetch = 0 : i64, scratch_operands = 0 : i64, tpu.core_type = #tpu.core_type<tc>, window_params = [{transform_indices = @transform_0, window_bounds = array<i64: 256, 36>}, {pipeline_mode = #tpu.pipeline_mode<synchronous>, transform_indices = @transform_1, window_bounds = array<i64: 36, 128>}, {pipeline_mode = #tpu.pipeline_mode<synchronous>, transform_indices = @transform_2, window_bounds = array<i64: 1, 128>}, {pipeline_mode = #tpu.pipeline_mode<synchronous>, transform_indices = @transform_3, window_bounds = array<i64: 1, 128>}, {transform_indices = @transform_4, window_bounds = array<i64: 256, 128>}]} {
    %c0 = arith.constant 0 : index
    %c0_0 = arith.constant 0 : index
    %0 = vector.load %arg1[%c0, %c0_0] : memref<256x36xbf16, #tpu.memory_space<vmem>>, vector<256x36xbf16>
    %c0_1 = arith.constant 0 : index
    %c0_2 = arith.constant 0 : index
    %1 = vector.load %arg2[%c0_1, %c0_2] : memref<36x128xbf16, #tpu.memory_space<vmem>>, vector<36x128xbf16>
    %cst = arith.constant dense<0.000000e+00> : vector<256x128xf32>
    %2 = tpu.matmul %0, %1, %cst {dimension_numbers = #tpu.dot_dimension_numbers<[1], [0], [0], [1], [0, 0, 1, 1], [], []>} : vector<256x36xbf16>, vector<36x128xbf16>, vector<256x128xf32> -> vector<256x128xf32>
    %c0_3 = arith.constant 0 : index
    %c0_4 = arith.constant 0 : index
    %3 = vector.load %arg3[%c0_3, %c0_4] : memref<1x128xf32, #tpu.memory_space<vmem>>, vector<1x128xf32>
    %4 = vector.broadcast %3 : vector<1x128xf32> to vector<256x128xf32>
    %5 = arith.mulf %2, %4 : vector<256x128xf32>
    %c0_5 = arith.constant 0 : index
    %c0_6 = arith.constant 0 : index
    %6 = vector.load %arg4[%c0_5, %c0_6] : memref<1x128xf32, #tpu.memory_space<vmem>>, vector<1x128xf32>
    %7 = vector.broadcast %6 : vector<1x128xf32> to vector<256x128xf32>
    %8 = arith.addf %5, %7 : vector<256x128xf32>
    %cst_7 = arith.constant 0.000000e+00 : f32
    %9 = vector.broadcast %cst_7 : f32 to vector<256x128xf32>
    %10 = arith.maximumf %8, %9 : vector<256x128xf32>
    %11 = arith.truncf %10 : vector<256x128xf32> to vector<256x128xbf16>
    %c0_8 = arith.constant 0 : index
    %c0_9 = arith.constant 0 : index
    %12 = vector.load %arg5[%c0_8, %c0_9] : memref<256x128xbf16, #tpu.memory_space<vmem>>, vector<256x128xbf16>
    tpu.vector_store %arg5[%c0_8, %c0_9], %11 {strides = array<i32>} : memref<256x128xbf16, #tpu.memory_space<vmem>>, vector<256x128xbf16>,
    return
  }
  func.func @transform_0(%arg0: i32) -> (i32, i32) {
    %c0_i32 = arith.constant 0 : i32
    %c0_i32_0 = arith.constant 0 : i32
    return %arg0, %c0_i32 : i32, i32
  }
  func.func @transform_1(%arg0: i32) -> (i32, i32) {
    %c0_i32 = arith.constant 0 : i32
    %c0_i32_0 = arith.constant 0 : i32
    %c0_i32_1 = arith.constant 0 : i32
    return %c0_i32, %c0_i32_0 : i32, i32
  }
  func.func @transform_2(%arg0: i32) -> (i32, i32) {
    %c0_i32 = arith.constant 0 : i32
    %c0_i32_0 = arith.constant 0 : i32
    %c0_i32_1 = arith.constant 0 : i32
    return %c0_i32, %c0_i32_0 : i32, i32
  }
  func.func @transform_3(%arg0: i32) -> (i32, i32) {
    %c0_i32 = arith.constant 0 : i32
    %c0_i32_0 = arith.constant 0 : i32
    %c0_i32_1 = arith.constant 0 : i32
    return %c0_i32, %c0_i32_0 : i32, i32
  }
  func.func @transform_4(%arg0: i32) -> (i32, i32) {
    %c0_i32 = arith.constant 0 : i32
    %c0_i32_0 = arith.constant 0 : i32
    return %arg0, %c0_i32 : i32, i32
  }
}

module attributes {stable_mosaic.version = 11 : i64} {
  func.func @_conv3x3_bn_relu_pool_kernel(%arg0: i32, %arg1: i32, %arg2: memref<1x18x18x128xbf16, #tpu.memory_space<vmem>>, %arg3: memref<1152x128xbf16, #tpu.memory_space<vmem>>, %arg4: memref<1x128xf32, #tpu.memory_space<vmem>>, %arg5: memref<1x128xf32, #tpu.memory_space<vmem>>, %arg6: memref<1x16x16x128xbf16, #tpu.memory_space<vmem>>, %arg7: memref<1x8x8x128xbf16, #tpu.memory_space<vmem>>, %arg8: memref<8x16x128xf32, #tpu.memory_space<vmem>>) attributes {dimension_semantics = [#tpu.dimension_semantics<parallel>, #tpu.dimension_semantics<parallel>], iteration_bounds = array<i64: 2, 1>, scalar_prefetch = 0 : i64, scratch_operands = 1 : i64, tpu.core_type = #tpu.core_type<tc>, window_params = [{transform_indices = @transform_0, window_bounds = array<i64: 1, 18, 18, 128>}, {pipeline_mode = #tpu.pipeline_mode<synchronous>, transform_indices = @transform_1, window_bounds = array<i64: 1152, 128>}, {pipeline_mode = #tpu.pipeline_mode<synchronous>, transform_indices = @transform_2, window_bounds = array<i64: 1, 128>}, {pipeline_mode = #tpu.pipeline_mode<synchronous>, transform_indices = @transform_3, window_bounds = array<i64: 1, 128>}, {transform_indices = @transform_4, window_bounds = array<i64: 1, 16, 16, 128>}, {transform_indices = @transform_5, window_bounds = array<i64: 1, 8, 8, 128>}]} {
    %c16_i32 = arith.constant 16 : i32
    %0 = arith.muli %arg1, %c16_i32 : i32
    %c0_i32 = arith.constant 0 : i32
    %1 = arith.addi %0, %c0_i32 : i32
    %c0 = arith.constant 0 : index
    %2 = arith.index_cast %1 : i32 to index
    %c0_0 = arith.constant 0 : index
    %c0_1 = arith.constant 0 : index
    %3 = vector.load %arg2[%c0, %2, %c0_0, %c0_1] : memref<1x18x18x128xbf16, #tpu.memory_space<vmem>>, vector<1x16x16x128xbf16>
    %4 = vector.shape_cast %3 : vector<1x16x16x128xbf16> to vector<16x16x128xbf16>
    %5 = vector.shape_cast %4 : vector<16x16x128xbf16> to vector<256x128xbf16>
    %c0_i32_2 = arith.constant 0 : i32
    %6 = arith.addi %0, %c0_i32_2 : i32
    %c0_3 = arith.constant 0 : index
    %7 = arith.index_cast %6 : i32 to index
    %c1 = arith.constant 1 : index
    %c0_4 = arith.constant 0 : index
    %8 = vector.load %arg2[%c0_3, %7, %c1, %c0_4] : memref<1x18x18x128xbf16, #tpu.memory_space<vmem>>, vector<1x16x16x128xbf16>
    %9 = vector.shape_cast %8 : vector<1x16x16x128xbf16> to vector<16x16x128xbf16>
    %10 = vector.shape_cast %9 : vector<16x16x128xbf16> to vector<256x128xbf16>
    %c0_i32_5 = arith.constant 0 : i32
    %11 = arith.addi %0, %c0_i32_5 : i32
    %c0_6 = arith.constant 0 : index
    %12 = arith.index_cast %11 : i32 to index
    %c2 = arith.constant 2 : index
    %c0_7 = arith.constant 0 : index
    %13 = vector.load %arg2[%c0_6, %12, %c2, %c0_7] : memref<1x18x18x128xbf16, #tpu.memory_space<vmem>>, vector<1x16x16x128xbf16>
    %14 = vector.shape_cast %13 : vector<1x16x16x128xbf16> to vector<16x16x128xbf16>
    %15 = vector.shape_cast %14 : vector<16x16x128xbf16> to vector<256x128xbf16>
    %c1_i32 = arith.constant 1 : i32
    %16 = arith.addi %0, %c1_i32 : i32
    %c0_8 = arith.constant 0 : index
    %17 = arith.index_cast %16 : i32 to index
    %c0_9 = arith.constant 0 : index
    %c0_10 = arith.constant 0 : index
    %18 = vector.load %arg2[%c0_8, %17, %c0_9, %c0_10] : memref<1x18x18x128xbf16, #tpu.memory_space<vmem>>, vector<1x16x16x128xbf16>
    %19 = vector.shape_cast %18 : vector<1x16x16x128xbf16> to vector<16x16x128xbf16>
    %20 = vector.shape_cast %19 : vector<16x16x128xbf16> to vector<256x128xbf16>
    %c1_i32_11 = arith.constant 1 : i32
    %21 = arith.addi %0, %c1_i32_11 : i32
    %c0_12 = arith.constant 0 : index
    %22 = arith.index_cast %21 : i32 to index
    %c1_13 = arith.constant 1 : index
    %c0_14 = arith.constant 0 : index
    %23 = vector.load %arg2[%c0_12, %22, %c1_13, %c0_14] : memref<1x18x18x128xbf16, #tpu.memory_space<vmem>>, vector<1x16x16x128xbf16>
    %24 = vector.shape_cast %23 : vector<1x16x16x128xbf16> to vector<16x16x128xbf16>
    %25 = vector.shape_cast %24 : vector<16x16x128xbf16> to vector<256x128xbf16>
    %c1_i32_15 = arith.constant 1 : i32
    %26 = arith.addi %0, %c1_i32_15 : i32
    %c0_16 = arith.constant 0 : index
    %27 = arith.index_cast %26 : i32 to index
    %c2_17 = arith.constant 2 : index
    %c0_18 = arith.constant 0 : index
    %28 = vector.load %arg2[%c0_16, %27, %c2_17, %c0_18] : memref<1x18x18x128xbf16, #tpu.memory_space<vmem>>, vector<1x16x16x128xbf16>
    %29 = vector.shape_cast %28 : vector<1x16x16x128xbf16> to vector<16x16x128xbf16>
    %30 = vector.shape_cast %29 : vector<16x16x128xbf16> to vector<256x128xbf16>
    %c2_i32 = arith.constant 2 : i32
    %31 = arith.addi %0, %c2_i32 : i32
    %c0_19 = arith.constant 0 : index
    %32 = arith.index_cast %31 : i32 to index
    %c0_20 = arith.constant 0 : index
    %c0_21 = arith.constant 0 : index
    %33 = vector.load %arg2[%c0_19, %32, %c0_20, %c0_21] : memref<1x18x18x128xbf16, #tpu.memory_space<vmem>>, vector<1x16x16x128xbf16>
    %34 = vector.shape_cast %33 : vector<1x16x16x128xbf16> to vector<16x16x128xbf16>
    %35 = vector.shape_cast %34 : vector<16x16x128xbf16> to vector<256x128xbf16>
    %c2_i32_22 = arith.constant 2 : i32
    %36 = arith.addi %0, %c2_i32_22 : i32
    %c0_23 = arith.constant 0 : index
    %37 = arith.index_cast %36 : i32 to index
    %c1_24 = arith.constant 1 : index
    %c0_25 = arith.constant 0 : index
    %38 = vector.load %arg2[%c0_23, %37, %c1_24, %c0_25] : memref<1x18x18x128xbf16, #tpu.memory_space<vmem>>, vector<1x16x16x128xbf16>
    %39 = vector.shape_cast %38 : vector<1x16x16x128xbf16> to vector<16x16x128xbf16>
    %40 = vector.shape_cast %39 : vector<16x16x128xbf16> to vector<256x128xbf16>
    %c2_i32_26 = arith.constant 2 : i32
    %41 = arith.addi %0, %c2_i32_26 : i32
    %c0_27 = arith.constant 0 : index
    %42 = arith.index_cast %41 : i32 to index
    %c2_28 = arith.constant 2 : index
    %c0_29 = arith.constant 0 : index
    %43 = vector.load %arg2[%c0_27, %42, %c2_28, %c0_29] : memref<1x18x18x128xbf16, #tpu.memory_space<vmem>>, vector<1x16x16x128xbf16>
    %44 = vector.shape_cast %43 : vector<1x16x16x128xbf16> to vector<16x16x128xbf16>
    %45 = vector.shape_cast %44 : vector<16x16x128xbf16> to vector<256x128xbf16>
    %46 = tpu.concatenate %5, %10, %15, %20, %25, %30, %35, %40, %45 in 1 : vector<256x128xbf16>, vector<256x128xbf16>, vector<256x128xbf16>, vector<256x128xbf16>, vector<256x128xbf16>, vector<256x128xbf16>, vector<256x128xbf16>, vector<256x128xbf16>, vector<256x128xbf16> -> vector<256x1152xbf16>
    %c0_30 = arith.constant 0 : index
    %c0_31 = arith.constant 0 : index
    %47 = vector.load %arg3[%c0_30, %c0_31] : memref<1152x128xbf16, #tpu.memory_space<vmem>>, vector<1152x128xbf16>
    %cst = arith.constant dense<0.000000e+00> : vector<256x128xf32>
    %48 = tpu.matmul %46, %47, %cst {dimension_numbers = #tpu.dot_dimension_numbers<[1], [0], [0], [1], [0, 0, 1, 1], [], []>} : vector<256x1152xbf16>, vector<1152x128xbf16>, vector<256x128xf32> -> vector<256x128xf32>
    %c0_32 = arith.constant 0 : index
    %c0_33 = arith.constant 0 : index
    %49 = vector.load %arg4[%c0_32, %c0_33] : memref<1x128xf32, #tpu.memory_space<vmem>>, vector<1x128xf32>
    %50 = vector.broadcast %49 : vector<1x128xf32> to vector<256x128xf32>
    %51 = arith.mulf %48, %50 : vector<256x128xf32>
    %c0_34 = arith.constant 0 : index
    %c0_35 = arith.constant 0 : index
    %52 = vector.load %arg5[%c0_34, %c0_35] : memref<1x128xf32, #tpu.memory_space<vmem>>, vector<1x128xf32>
    %53 = vector.broadcast %52 : vector<1x128xf32> to vector<256x128xf32>
    %54 = arith.addf %51, %53 : vector<256x128xf32>
    %cst_36 = arith.constant 0.000000e+00 : f32
    %55 = vector.broadcast %cst_36 : f32 to vector<256x128xf32>
    %56 = arith.maximumf %54, %55 : vector<256x128xf32>
    %57 = vector.shape_cast %56 : vector<256x128xf32> to vector<16x16x128xf32>
    %58 = arith.truncf %57 : vector<16x16x128xf32> to vector<16x16x128xbf16>
    %c0_37 = arith.constant 0 : index
    %c0_38 = arith.constant 0 : index
    %c0_39 = arith.constant 0 : index
    %c0_40 = arith.constant 0 : index
    %59 = vector.load %arg6[%c0_37, %c0_38, %c0_39, %c0_40] : memref<1x16x16x128xbf16, #tpu.memory_space<vmem>>, vector<1x16x16x128xbf16>
    %60 = vector.shape_cast %59 : vector<1x16x16x128xbf16> to vector<16x16x128xbf16>
    %61 = vector.shape_cast %58 : vector<16x16x128xbf16> to vector<1x16x16x128xbf16>
    tpu.vector_store %arg6[%c0_37, %c0_38, %c0_39, %c0_40], %61 {strides = array<i32>} : memref<1x16x16x128xbf16, #tpu.memory_space<vmem>>, vector<1x16x16x128xbf16>,
    %62 = vector.shape_cast %56 : vector<256x128xf32> to vector<8x2x16x128xf32>
    %63 = vector.extract_strided_slice %62 {offsets = [0, 0, 0, 0], sizes = [8, 1, 16, 128], strides = [1, 1, 1, 1]} : vector<8x2x16x128xf32> to vector<8x1x16x128xf32>
    %64 = vector.shape_cast %63 : vector<8x1x16x128xf32> to vector<8x16x128xf32>
    %65 = vector.extract_strided_slice %62 {offsets = [0, 1, 0, 0], sizes = [8, 1, 16, 128], strides = [1, 1, 1, 1]} : vector<8x2x16x128xf32> to vector<8x1x16x128xf32>
    %66 = vector.shape_cast %65 : vector<8x1x16x128xf32> to vector<8x16x128xf32>
    %67 = arith.maximumf %64, %66 : vector<8x16x128xf32>
    %c0_41 = arith.constant 0 : index
    %c0_42 = arith.constant 0 : index
    %c0_43 = arith.constant 0 : index
    %68 = vector.load %arg8[%c0_41, %c0_42, %c0_43] : memref<8x16x128xf32, #tpu.memory_space<vmem>>, vector<8x16x128xf32>
    tpu.vector_store %arg8[%c0_41, %c0_42, %c0_43], %67 {strides = array<i32>} : memref<8x16x128xf32, #tpu.memory_space<vmem>>, vector<8x16x128xf32>,
    %c0_44 = arith.constant 0 : index
    %c0_45 = arith.constant 0 : index
    %c0_46 = arith.constant 0 : index
    %69 = tpu.strided_load %arg8[%c0_44, %c0_45, %c0_46] {strides = array<i32: 1, 2, 1>} : memref<8x16x128xf32, #tpu.memory_space<vmem>>, vector<8x8x128xf32>
    %c0_47 = arith.constant 0 : index
    %c1_48 = arith.constant 1 : index
    %c0_49 = arith.constant 0 : index
    %70 = tpu.strided_load %arg8[%c0_47, %c1_48, %c0_49] {strides = array<i32: 1, 2, 1>} : memref<8x16x128xf32, #tpu.memory_space<vmem>>, vector<8x8x128xf32>
    %71 = arith.maximumf %69, %70 : vector<8x8x128xf32>
    %72 = arith.truncf %71 : vector<8x8x128xf32> to vector<8x8x128xbf16>
    %c0_50 = arith.constant 0 : index
    %c0_51 = arith.constant 0 : index
    %c0_52 = arith.constant 0 : index
    %c0_53 = arith.constant 0 : index
    %73 = vector.load %arg7[%c0_50, %c0_51, %c0_52, %c0_53] : memref<1x8x8x128xbf16, #tpu.memory_space<vmem>>, vector<1x8x8x128xbf16>
    %74 = vector.shape_cast %73 : vector<1x8x8x128xbf16> to vector<8x8x128xbf16>
    %75 = vector.shape_cast %72 : vector<8x8x128xbf16> to vector<1x8x8x128xbf16>
    tpu.vector_store %arg7[%c0_50, %c0_51, %c0_52, %c0_53], %75 {strides = array<i32>} : memref<1x8x8x128xbf16, #tpu.memory_space<vmem>>, vector<1x8x8x128xbf16>,
    return
  }
  func.func @transform_0(%arg0: i32, %arg1: i32) -> (i32, i32, i32, i32) {
    %c0_i32 = arith.constant 0 : i32
    %c0_i32_0 = arith.constant 0 : i32
    %c0_i32_1 = arith.constant 0 : i32
    %c0_i32_2 = arith.constant 0 : i32
    return %arg0, %c0_i32, %c0_i32_0, %c0_i32_1 : i32, i32, i32, i32
  }
  func.func @transform_1(%arg0: i32, %arg1: i32) -> (i32, i32) {
    %c0_i32 = arith.constant 0 : i32
    %c0_i32_0 = arith.constant 0 : i32
    %c0_i32_1 = arith.constant 0 : i32
    return %c0_i32, %c0_i32_0 : i32, i32
  }
  func.func @transform_2(%arg0: i32, %arg1: i32) -> (i32, i32) {
    %c0_i32 = arith.constant 0 : i32
    %c0_i32_0 = arith.constant 0 : i32
    %c0_i32_1 = arith.constant 0 : i32
    return %c0_i32, %c0_i32_0 : i32, i32
  }
  func.func @transform_3(%arg0: i32, %arg1: i32) -> (i32, i32) {
    %c0_i32 = arith.constant 0 : i32
    %c0_i32_0 = arith.constant 0 : i32
    %c0_i32_1 = arith.constant 0 : i32
    return %c0_i32, %c0_i32_0 : i32, i32
  }
  func.func @transform_4(%arg0: i32, %arg1: i32) -> (i32, i32, i32, i32) {
    %c0_i32 = arith.constant 0 : i32
    %c0_i32_0 = arith.constant 0 : i32
    %c0_i32_1 = arith.constant 0 : i32
    return %arg0, %arg1, %c0_i32, %c0_i32_0 : i32, i32, i32, i32
  }
  func.func @transform_5(%arg0: i32, %arg1: i32) -> (i32, i32, i32, i32) {
    %c0_i32 = arith.constant 0 : i32
    %c0_i32_0 = arith.constant 0 : i32
    %c0_i32_1 = arith.constant 0 : i32
    return %arg0, %arg1, %c0_i32, %c0_i32_0 : i32, i32, i32, i32
  }
}

</mosaic_0001>

<bundles_post_ra>
// kernel: encoder_block_forward.2
= control target key start
LH: loop header
LB: loop body
LE: loop exit
PB: predicated region body
PF: predicated region fallthrough
CT: control target
= control target key end

     0   :  { %s1206_s15 = smov 0   ;;  %s1365_s0 = inlined_call_operand.vmem [shape: bf16[512,36], index: 0, kind: input, shape index: {}]   ;;  %s1366_s1 = inlined_call_operand.vmem [shape: bf16[36,128], index: 1, kind: input, shape index: {}]   ;;  %s1367_s2 = inlined_call_operand.vmem [shape: f32[1,128], index: 2, kind: input, shape index: {}]   ;;  %s1368_s3 = inlined_call_operand.vmem [shape: f32[1,128], index: 3, kind: input, shape index: {}]   ;;  %s1369_s4 = inlined_call_operand.vmem [shape: bf16[512,128], index: 4, kind: output, shape index: {}]  }
   0x1 LB: > { %s874_s16 = sadd.s32 4294967295, %s1179_s15   ;;  %p878_p0 = scmp.ge.s32.totalorder %s1179_s15, 1  ;;  %s1179_s15 = sphi %s1206_s15, %s14_s15  }
   0x2   : > { %p163_p1 = scmp.lt.s32.totalorder %s1179_s15, 3 }
   0x4   : > { %p164_p2 = pnand %p878_p0, %p163_p1 }
   0x5   : > { %s879_s21 = sshll.u32 (!%p164_p2), %s874_s16, 5 }
   0x6   : > { %167 = sbr.rel (%p164_p2) target bundleno = 256 (0x100), region = 36  ;;  %p190_p3 = scmp.lt.s32.totalorder (!%p164_p2), %s879_s21, 63 }
   0xb   : > { %v1154_v0 = vld [vmem:[%s1366_s1 + $0x10] ss:$0 sps:$4 sm:$0x33]   ;;  %vm383_vm0 = vcmask 1041408   ;;  %v1155_v1 = vld [vmem:[%s1366_s1 + $0x8] sm:$0xff]   ;;  %v1156_v3 = vld [vmem:[%s1366_s1] sm:$0xff]  }
   0xc   : > { %1144 = vmatprep.subr.msk.bf16.mxu0 %vm383_vm0, %v1154_v0  ;;  %1145 = vmatprep.subr.msk.bf16.mxu1 %vm383_vm0, %v1154_v0  ;;  %v385_v2 = vsel %vm383_vm0, %v1154_v0, 0  ;;  %s1371_s21 = smov (!%p190_p3, %s879_s21), 63  ;;  %vm334_vm1 = vcmask 293888   ;;  %v1268_v20 = vld [vmem:[%s1367_s2] ss:$0 sm:$0xff] }
   0xd   : > { %1101 = vmatpush3.bf16.msra.mxu0 %v385_v2  ;;  %1141 = vmatpush3.bf16.msra.mxu1 %v385_v2  ;;  %s880_s24 = sshll.u32 %s1371_s21, 2  ;;  %v1275_v25 = vld [vmem:[%s1368_s3] ss:$0 sm:$0xff] }
   0xe   : > { %1102 = vmatprep.subr.bf16.mxu0 %v1155_v1  ;;  %1139 = vmatprep.subr.bf16.mxu1 %v1155_v1  ;;  %s1231_s27 = scalar_lea.vmem %s1365_s0, %s880_s24  ;;  %s1298_s8 = scalar_lea.vmem %s1369_s4, %s880_s24 }
   0xf   : > { %v1157_v4 = vld [vmem:[%s1231_s27] sm:$0xff]   ;;  %v1159_v6 = vld [vmem:[%s1231_s27 + $0x8] sm:$0xff]   ;;  %v1161_v8 = vld [vmem:[%s1231_s27 + $0x10] sm:$0xff]  }
  0x10   : > { %v1158_v5 = vld [vmem:[%s1231_s27 + $0x40] sm:$0xff]   ;;  %1106 = vmatprep.mubr.msk.bf16.mxu0 %vm334_vm1, %v1157_v4  ;;  %v1160_v7 = vld [vmem:[%s1231_s27 + $0x48] sm:$0xff]   ;;  %v1162_v9 = vld [vmem:[%s1231_s27 + $0x50] sm:$0xff]  }
  0x11   : > { %1103 = vmatpush3.bf16.msra.mxu0 %v1155_v1  ;;  %1142 = vmatpush3.bf16.msra.mxu1 %v1155_v1  ;;  %v1163_v10 = vld [vmem:[%s1231_s27 + $0x18] sm:$0xff]   ;;  %v1165_v12 = vld [vmem:[%s1231_s27 + $0x20] sm:$0xff]   ;;  %v1167_v14 = vld [vmem:[%s1231_s27 + $0x28] sm:$0xff]  }
  0x12   : > { %1104 = vmatprep.subr.bf16.mxu0 %v1156_v3  ;;  %1140 = vmatprep.subr.bf16.mxu1 %v1156_v3  ;;  %v1164_v11 = vld [vmem:[%s1231_s27 + $0x58] sm:$0xff]   ;;  %v1166_v13 = vld [vmem:[%s1231_s27 + $0x60] sm:$0xff]   ;;  %v1168_v15 = vld [vmem:[%s1231_s27 + $0x68] sm:$0xff]  }
  0x13   : > { %1122 = vmatprep.mubr.msk.bf16.mxu1 %vm334_vm1, %v1158_v5  ;;  %v1169_v16 = vld [vmem:[%s1231_s27 + $0x30] sm:$0xff]   ;;  %v1171_v18 = vld [vmem:[%s1231_s27 + $0x38] sm:$0xff]  }
  0x14   : > { %v1170_v17 = vld [vmem:[%s1231_s27 + $0x70] sm:$0xff]   ;;  %v1172_v19 = vld [vmem:[%s1231_s27 + $0x78] sm:$0xff]  }
  0x15   : > { %1105 = vmatpush3.bf16.msra.mxu0 %v1156_v3  ;;  %1143 = vmatpush3.bf16.msra.mxu1 %v1156_v3 }
  0x18   : > { %1107 = vmatmul.mubr.msk.bf16.vlgmr.msra.gmra.mxu0 %vm334_vm1, %v1159_v6  ;;  %1123 = vmatmul.mubr.msk.bf16.vlgmr.msra.gmra.mxu1 %vm334_vm1, %v1160_v7 }
  0x19   : > { %1110 = vmatprep.mubr.msk.bf16.mxu0 %vm334_vm1, %v1161_v8  ;;  %1126 = vmatprep.mubr.msk.bf16.mxu1 %vm334_vm1, %v1162_v9 }
  0x20   : > { %1111 = vmatmul.mubr.msk.bf16.gmra.mxu0 %vm334_vm1, %v1163_v10  ;;  %1127 = vmatmul.mubr.msk.bf16.gmra.mxu1 %vm334_vm1, %v1164_v11 }
  0x21   : > { %1114 = vmatprep.mubr.msk.bf16.mxu0 %vm334_vm1, %v1165_v12  ;;  %1130 = vmatprep.mubr.msk.bf16.mxu1 %vm334_vm1, %v1166_v13 }
  0x28   : > { %1115 = vmatmul.mubr.msk.bf16.gmra.mxu0 %vm334_vm1, %v1167_v14  ;;  %1131 = vmatmul.mubr.msk.bf16.gmra.mxu1 %vm334_vm1, %v1168_v15 }
  0x29   : > { %1118 = vmatprep.mubr.msk.bf16.mxu0 %vm334_vm1, %v1169_v16  ;;  %1134 = vmatprep.mubr.msk.bf16.mxu1 %vm334_vm1, %v1170_v17 }
  0x30   : > { %1119 = vmatmul.mubr.msk.bf16.gmra.mxu0 %vm334_vm1, %v1171_v18  ;;  %1135 = vmatmul.mubr.msk.bf16.gmra.mxu1 %vm334_vm1, %v1172_v19 }
  0xd8   : > { %v1108_v21 = vpop.f32.mrf.mxu0  ;;  %v1124_v22 = vpop.f32.mrf.mxu1 }
  0xd9   : > { %v557_v23 = vmul.f32 %v1108_v21, %v1268_v20  ;;  %v573_v24 = vmul.f32 %v1124_v22, %v1268_v20 }
  0xda   : > { %v421_v26 = vpop.f32.mrf.mxu0  ;;  %v485_v27 = vpop.f32.mrf.mxu1 }
  0xdb   : > { %v555_v28 = vmul.f32 %v1268_v20, %v421_v26  ;;  %v571_v29 = vmul.f32 %v1268_v20, %v485_v27  ;;  %v596_v32 = vadd.f32 %v1275_v25, %v557_v23  ;;  %v612_v33 = vadd.f32 %v1275_v25, %v573_v24 }
  0xdc   : > { %v1109_v30 = vpop.f32.mrf.mxu0  ;;  %v1125_v31 = vpop.f32.mrf.mxu1 }
  0xdd   : > { %v558_v34 = vmul.f32 %v1109_v30, %v1268_v20  ;;  %v574_v35 = vmul.f32 %v1125_v31, %v1268_v20  ;;  %v594_v38 = vadd.f32 %v1275_v25, %v555_v28  ;;  %v610_v39 = vadd.f32 %v1275_v25, %v571_v29 }
  0xde   : > { %v424_v36 = vpop.f32.mrf.mxu0  ;;  %v488_v37 = vpop.f32.mrf.mxu1  ;;  %v628_v46 = vmax.f32 %v596_v32, 0.0  ;;  %v644_v47 = vmax.f32 %v612_v33, 0.0 }
  0xdf   : > { %v556_v40 = vmul.f32 %v1268_v20, %v424_v36  ;;  %v572_v41 = vmul.f32 %v1268_v20, %v488_v37  ;;  %v597_v42 = vadd.f32 %v1275_v25, %v558_v34  ;;  %v613_v43 = vadd.f32 %v1275_v25, %v574_v35 }
  0xe0   : > { %v1112_v44 = vpop.f32.mrf.mxu0  ;;  %v1128_v45 = vpop.f32.mrf.mxu1  ;;  %v626_v56 = vmax.f32 %v594_v38, 0.0  ;;  %v642_v57 = vmax.f32 %v610_v39, 0.0 }
  0xe1   : > { %v595_v48 = vadd.f32 %v1275_v25, %v556_v40  ;;  %v611_v49 = vadd.f32 %v1275_v25, %v572_v41  ;;  %v629_v50 = vmax.f32 %v597_v42, 0.0  ;;  %v645_v51 = vmax.f32 %v613_v43, 0.0 }
  0xe2   : > { %v561_v52 = vmul.f32 %v1112_v44, %v1268_v20  ;;  %v577_v53 = vmul.f32 %v1128_v45, %v1268_v20  ;;  %v437_v54 = vpop.f32.mrf.mxu0  ;;  %v501_v55 = vpop.f32.mrf.mxu1 }
  0xe3   : > { %v627_v58 = vmax.f32 %v595_v48, 0.0  ;;  %v643_v59 = vmax.f32 %v611_v49, 0.0  ;;  %v994_v60 = vpack.c.bf16 %v629_v50, %v628_v46  ;;  %v1034_v61 = vpack.c.bf16 %v645_v51, %v644_v47 }
  0xe4   : > { %v559_v62 = vmul.f32 %v1268_v20, %v437_v54  ;;  %v575_v63 = vmul.f32 %v1268_v20, %v501_v55  ;;  %v1113_v0 = vpop.f32.mrf.mxu0  ;;  %v1129_v1 = vpop.f32.mrf.mxu1  ;;  %v600_v4 = vadd.f32 %v1275_v25, %v561_v52  ;;  %v616_v5 = vadd.f32 %v1275_v25, %v577_v53 }
  0xe5   : > { %v989_v2 = vpack.c.bf16 %v627_v58, %v626_v56  ;;  %v1029_v3 = vpack.c.bf16 %v643_v59, %v642_v57  ;;  %1066 = vst [vmem:[%s1298_s8 + $0x8] sm:$0xff] %v994_v60   ;;  %1074 = vst [vmem:[%s1298_s8 + $0x48] sm:$0xff] %v1034_v61   ;;  %v562_v6 = vmul.f32 %v1113_v0, %v1268_v20 }
  0xe6   : > { %v578_v7 = vmul.f32 %v1129_v1, %v1268_v20  ;;  %v440_v8 = vpop.f32.mrf.mxu0  ;;  %v504_v9 = vpop.f32.mrf.mxu1  ;;  %v598_v10 = vadd.f32 %v1275_v25, %v559_v62  ;;  %v614_v11 = vadd.f32 %v1275_v25, %v575_v63  ;;  %v632_v23 = vmax.f32 %v600_v4, 0.0 }
  0xe7   : > { %990 = vst [vmem:[%s1298_s8] sm:$0xff] %v989_v2   ;;  %1073 = vst [vmem:[%s1298_s8 + $0x40] sm:$0xff] %v1029_v3   ;;  %v560_v12 = vmul.f32 %v1268_v20, %v440_v8  ;;  %v576_v13 = vmul.f32 %v1268_v20, %v504_v9  ;;  %v601_v14 = vadd.f32 %v1275_v25, %v562_v6  ;;  %v648_v24 = vmax.f32 %v616_v5, 0.0 }
  0xe8   : > { %v617_v15 = vadd.f32 %v1275_v25, %v578_v7  ;;  %v1116_v16 = vpop.f32.mrf.mxu0  ;;  %v1132_v17 = vpop.f32.mrf.mxu1  ;;  %v630_v30 = vmax.f32 %v598_v10, 0.0  ;;  %v646_v31 = vmax.f32 %v614_v11, 0.0 }
  0xe9   : > { %v599_v18 = vadd.f32 %v1275_v25, %v560_v12  ;;  %v615_v19 = vadd.f32 %v1275_v25, %v576_v13  ;;  %v565_v21 = vmul.f32 %v1116_v16, %v1268_v20  ;;  %v581_v22 = vmul.f32 %v1132_v17, %v1268_v20 }
  0xea   : > { %v633_v26 = vmax.f32 %v601_v14, 0.0  ;;  %v649_v27 = vmax.f32 %v617_v15, 0.0  ;;  %v453_v28 = vpop.f32.mrf.mxu0  ;;  %v517_v29 = vpop.f32.mrf.mxu1 }
  0xeb   : > { %v631_v32 = vmax.f32 %v599_v18, 0.0  ;;  %v647_v33 = vmax.f32 %v615_v19, 0.0  ;;  %v563_v36 = vmul.f32 %v1268_v20, %v453_v28  ;;  %v579_v37 = vmul.f32 %v1268_v20, %v517_v29 }
  0xec   : > { %v1004_v34 = vpack.c.bf16 %v633_v26, %v632_v23  ;;  %v1044_v35 = vpack.c.bf16 %v649_v27, %v648_v24  ;;  %v1117_v38 = vpop.f32.mrf.mxu0  ;;  %v1133_v39 = vpop.f32.mrf.mxu1  ;;  %v604_v42 = vadd.f32 %v1275_v25, %v565_v21  ;;  %v620_v43 = vadd.f32 %v1275_v25, %v581_v22 }
  0xed   : > { %v999_v40 = vpack.c.bf16 %v631_v32, %v630_v30  ;;  %v1039_v41 = vpack.c.bf16 %v647_v33, %v646_v31  ;;  %v566_v44 = vmul.f32 %v1117_v38, %v1268_v20  ;;  %v582_v45 = vmul.f32 %v1133_v39, %v1268_v20 }
  0xee   : > { %1068 = vst [vmem:[%s1298_s8 + $0x18] sm:$0xff] %v1004_v34   ;;  %1076 = vst [vmem:[%s1298_s8 + $0x58] sm:$0xff] %v1044_v35   ;;  %v456_v46 = vpop.f32.mrf.mxu0  ;;  %v520_v47 = vpop.f32.mrf.mxu1  ;;  %v602_v48 = vadd.f32 %v1275_v25, %v563_v36  ;;  %v618_v49 = vadd.f32 %v1275_v25, %v579_v37  ;;  %v636_v56 = vmax.f32 %v604_v42, 0.0  ;;  %v652_v57 = vmax.f32 %v620_v43, 0.0 }
  0xef   : > { %1067 = vst [vmem:[%s1298_s8 + $0x10] sm:$0xff] %v999_v40   ;;  %1075 = vst [vmem:[%s1298_s8 + $0x50] sm:$0xff] %v1039_v41   ;;  %v564_v50 = vmul.f32 %v1268_v20, %v456_v46  ;;  %v580_v51 = vmul.f32 %v1268_v20, %v520_v47  ;;  %v605_v52 = vadd.f32 %v1275_v25, %v566_v44 }
  0xf0   : > { %v621_v53 = vadd.f32 %v1275_v25, %v582_v45  ;;  %v1120_v54 = vpop.f32.mrf.mxu0  ;;  %v1136_v55 = vpop.f32.mrf.mxu1  ;;  %v634_v2 = vmax.f32 %v602_v48, 0.0  ;;  %v650_v3 = vmax.f32 %v618_v49, 0.0 }
  0xf1   : > { %v603_v58 = vadd.f32 %v1275_v25, %v564_v50  ;;  %v619_v59 = vadd.f32 %v1275_v25, %v580_v51  ;;  %v637_v60 = vmax.f32 %v605_v52, 0.0  ;;  %v569_v62 = vmul.f32 %v1120_v54, %v1268_v20 }
  0xf2   : > { %v653_v61 = vmax.f32 %v621_v53, 0.0  ;;  %v585_v63 = vmul.f32 %v1136_v55, %v1268_v20  ;;  %v469_v0 = vpop.f32.mrf.mxu0  ;;  %v533_v1 = vpop.f32.mrf.mxu1 }
  0xf3   : > { %v635_v4 = vmax.f32 %v603_v58, 0.0  ;;  %v651_v5 = vmax.f32 %v619_v59, 0.0  ;;  %v1014_v6 = vpack.c.bf16 %v637_v60, %v636_v56  ;;  %v567_v8 = vmul.f32 %v1268_v20, %v469_v0 }
  0xf4   : > { %v1054_v7 = vpack.c.bf16 %v653_v61, %v652_v57  ;;  %v583_v9 = vmul.f32 %v1268_v20, %v533_v1  ;;  %v1121_v10 = vpop.f32.mrf.mxu0  ;;  %v1137_v11 = vpop.f32.mrf.mxu1  ;;  %v608_v14 = vadd.f32 %v1275_v25, %v569_v62  ;;  %v624_v15 = vadd.f32 %v1275_v25, %v585_v63 }
  0xf5   : > { %v1009_v12 = vpack.c.bf16 %v635_v4, %v634_v2  ;;  %v1049_v13 = vpack.c.bf16 %v651_v5, %v650_v3  ;;  %1070 = vst [vmem:[%s1298_s8 + $0x28] sm:$0xff] %v1014_v6   ;;  %v570_v16 = vmul.f32 %v1121_v10, %v1268_v20  ;;  %v586_v17 = vmul.f32 %v1137_v11, %v1268_v20 }
  0xf6   : > { %1078 = vst [vmem:[%s1298_s8 + $0x68] sm:$0xff] %v1054_v7   ;;  %v472_v18 = vpop.f32.mrf.mxu0  ;;  %v536_v19 = vpop.f32.mrf.mxu1  ;;  %v606_v21 = vadd.f32 %v1275_v25, %v567_v8  ;;  %v622_v22 = vadd.f32 %v1275_v25, %v583_v9  ;;  %v640_v30 = vmax.f32 %v608_v14, 0.0  ;;  %v656_v31 = vmax.f32 %v624_v15, 0.0 }
  0xf7   : > { %1069 = vst [vmem:[%s1298_s8 + $0x20] sm:$0xff] %v1009_v12   ;;  %1077 = vst [vmem:[%s1298_s8 + $0x60] sm:$0xff] %v1049_v13   ;;  %v568_v23 = vmul.f32 %v1268_v20, %v472_v18  ;;  %v584_v24 = vmul.f32 %v1268_v20, %v536_v19  ;;  %v609_v26 = vadd.f32 %v1275_v25, %v570_v16 }
  0xf8   : > { %v625_v27 = vadd.f32 %v1275_v25, %v586_v17  ;;  %v638_v34 = vmax.f32 %v606_v21, 0.0  ;;  %v654_v35 = vmax.f32 %v622_v22, 0.0 }
  0xf9   : > { %v607_v28 = vadd.f32 %v1275_v25, %v568_v23  ;;  %v623_v29 = vadd.f32 %v1275_v25, %v584_v24  ;;  %v641_v32 = vmax.f32 %v609_v26, 0.0 }
  0xfa   : > { %v657_v33 = vmax.f32 %v625_v27, 0.0 }
  0xfb   : > { %v639_v36 = vmax.f32 %v607_v28, 0.0  ;;  %v655_v20 = vmax.f32 %v623_v29, 0.0  ;;  %v1024_v37 = vpack.c.bf16 %v641_v32, %v640_v30 }
  0xfc   : > { %v1064_v38 = vpack.c.bf16 %v657_v33, %v656_v31 }
  0xfd   : > { %v1019_v39 = vpack.c.bf16 %v639_v36, %v638_v34  ;;  %v1059_v40 = vpack.c.bf16 %v655_v20, %v654_v35  ;;  %1072 = vst [vmem:[%s1298_s8 + $0x38] sm:$0xff] %v1024_v37  }
  0xfe   : > { %1080 = vst [vmem:[%s1298_s8 + $0x78] sm:$0xff] %v1064_v38  }
  0xff   : > { %1071 = vst [vmem:[%s1298_s8 + $0x30] sm:$0xff] %v1019_v39   ;;  %1079 = vst [vmem:[%s1298_s8 + $0x70] sm:$0xff] %v1059_v40  }
 0x100 PF: > { %s14_s15 = sadd.s32 1, %s1179_s15  }
 0x101   : > { %p11_p4 = scmp.ge.s32.totalorder %s14_s15, 4  }
 0x103   :  { %13 = sbr.rel (!%p11_p4) target bundleno = 1 (0x1), region = 66 }

// kernel: encoder_block_forward.3
= control target key start
LH: loop header
LB: loop body
LE: loop exit
PB: predicated region body
PF: predicated region fallthrough
CT: control target
= control target key end

     0   :  { %s5958_s18 = smov 0   ;;  %s5960_s19 = smov 0   ;;  %s8158_s0 = inlined_call_operand.vmem [shape: bf16[2,18,18,128], index: 0, kind: input, shape index: {}]   ;;  %s8159_s1 = inlined_call_operand.vmem [shape: bf16[1152,128], index: 1, kind: input, shape index: {}]   ;;  %s8160_s2 = inlined_call_operand.vmem [shape: f32[1,128], index: 2, kind: input, shape index: {}]   ;;  %s8161_s3 = inlined_call_operand.vmem [shape: f32[1,128], index: 3, kind: input, shape index: {}]   ;;  %s8162_s4 = inlined_call_operand.vmem [shape: bf16[2,16,16,128], index: 4, kind: output, shape index: {0}]   ;;  %s8163_s5 = inlined_call_operand.vmem [shape: bf16[2,8,8,128], index: 5, kind: output, shape index: {1}]  }
   0x1   :  { %s5962_s20 = smov 0  }
   0x2 LB: > { %s28_s21 = sadd.s32 1, %s5922_s19  ;;  %p4630_p0 = scmp.ge.s32.totalorder %s5926_s20, 1  ;;  %s5926_s20 = sphi %s5962_s20, %s16_s20   ;;  %s5922_s19 = sphi %s5960_s19, %s8221_s19   ;;  %s5918_s18 = sphi %s5958_s18, %s8220_s18  }
   0x3   : > { %p30_p1 = scmp.ge.s32.totalorder %s28_s21, 2  ;;  %p206_p2 = scmp.lt.s32.totalorder %s5926_s20, 3 }
   0x5   : > { %s8223_s21 = smov (%p30_p1, %s28_s21), 0  ;;  %p207_p3 = pnand %p4630_p0, %p206_p2 }
   0x7   : > { %210 = sbr.rel (%p207_p3) target bundleno = 573 (0x23d), region = 36 }
   0xc   : > { %v5777_v0 = vld [vmem:[%s8159_s1 + $0x78] sm:$0xff]   ;;  %p248_p4 = scmp.lt.s32.totalorder %s5918_s18, 1  ;;  %v5779_v2 = vld [vmem:[%s8159_s1 + $0x70] sm:$0xff]   ;;  %v5781_v4 = vld [vmem:[%s8159_s1 + $0x68] sm:$0xff]   ;;  %vm327_vm0 = vsmask.f32 3328 }
   0xd   : > { %v5778_v1 = vld [vmem:[%s8159_s1 + $0x38] sm:$0xff]   ;;  %5216 = vmatprep.subr.bf16.mxu0 %v5777_v0  ;;  %5736 = vmatprep.subr.bf16.mxu1 %v5777_v0  ;;  %v5780_v3 = vld [vmem:[%s8159_s1 + $0x30] sm:$0xff]   ;;  %v5782_v5 = vld [vmem:[%s8159_s1 + $0x28] sm:$0xff]   ;;  %vm328_vm1 = vsmask.f32 7440  ;;  %vm778_vm3 = vcmask 1042432  }
   0xe   : > { %5217 = vmatpush3.bf16.msra.mxu0 %v5778_v1  ;;  %5744 = vmatpush3.bf16.msra.mxu1 %v5778_v1  ;;  %s8225_s18 = smov (!%p248_p4, %s5918_s18), 1  ;;  %v5783_v6 = vld [vmem:[%s8159_s1 + $0x60] sm:$0xff]   ;;  %v5785_v8 = vld [vmem:[%s8159_s1 + $0x58] sm:$0xff]   ;;  %v5787_v10 = vld [vmem:[%s8159_s1 + $0x50] sm:$0xff]   ;;  %vm779_vm4 = vcmask 1046532  }
   0xf   : > { %5218 = vmatprep.subr.bf16.mxu0 %v5779_v2  ;;  %5737 = vmatprep.subr.bf16.mxu1 %v5779_v2  ;;  %s5752_s11 = smul.u32 216, %s8225_s18  ;;  %v5784_v7 = vld [vmem:[%s8159_s1 + $0x20] sm:$0xff]   ;;  %v5786_v9 = vld [vmem:[%s8159_s1 + $0x18] sm:$0xff]   ;;  %v5788_v20 = vld [vmem:[%s8159_s1 + $0x10] sm:$0xff]   ;;  %s5064_s7 = sshll.u32 %s8225_s18, 7 }
  0x10   : > { %v5789_v25 = vld [vmem:[%s8159_s1 + $0x48] sm:$0xff]   ;;  %vm6051_vm2 = vmor %vm327_vm0, %vm328_vm1  ;;  %v5791_v42 = vld [vmem:[%s8159_s1 + $0x40] sm:$0xff]   ;;  %s7997_s10 = scalar_lea.vmem %s8162_s4, %s5064_s7 }
  0x11   : > { %s6009_s22 = scalar_lea.vmem %s8158_s0, %s5752_s11  ;;  %v5790_v38 = vld [vmem:[%s8159_s1 + $0x8] sm:$0xff]   ;;  %v5792_v45 = vld [vmem:[%s8159_s1] sm:$0xff]   ;;  %v5795_v55 = vld [vmem:[%s8159_s1 + $0xf8] sm:$0xff]   ;;  %s5065_s11 = sshll.u32 %s8225_s18, 5 }
  0x12   : > { %5219 = vmatpush3.bf16.msra.mxu0 %v5780_v3  ;;  %5745 = vmatpush3.bf16.msra.mxu1 %v5780_v3  ;;  %v6018_v11 = vld [vmem:[%s6009_s22] sm:$0xf]  ;;  %v6021_v12 = vld [vmem:[%s6009_s22 + $0x4] sm:$0xf]  ;;  %v6024_v13 = vld [vmem:[%s6009_s22 + $0x8] sm:$0x1]  ;;  %s8074_s13 = scalar_lea.vmem %s8163_s5, %s5065_s11 }
  0x13   : > { %5220 = vmatprep.subr.bf16.mxu0 %v5781_v4  ;;  %5738 = vmatprep.subr.bf16.mxu1 %v5781_v4  ;;  %v331_v14 = vshrl.u32 %v6018_v11, 16  ;;  %v334_v15 = vshll.u32 %v6018_v11, 16  ;;  %v340_v16 = vshll.u32 %v6021_v12, 16  ;;  %v344_v17 = vshrl.u32 %v6021_v12, 16  ;;  %v6032_v19 = vld [vmem:[%s6009_s22 + $0x90] sm:$0xf]  ;;  %vm6245_vm5 = vmor %vm778_vm3, %vm779_vm4 }
  0x14   : > { %v350_v18 = vshll.u32 %v6024_v13, 16  ;;  %v6038_v23 = vld [vmem:[%s6009_s22 + $0x94] sm:$0xf]  ;;  %v619_v24 = vshrl.u32 %v6032_v19, 16  ;;  %v6045_v29 = vld [vmem:[%s6009_s22 + $0x98] sm:$0x1]  ;;  %v4812_v57 = vcombine.low %v6018_v11, %v6021_v12 }
  0x15   : > { %v333_v21 = vrot.slane %v331_v14, 4  ;;  %v336_v22 = vrot.slane %v334_v15, 5  ;;  %v342_v26 = vrot.slane %v340_v16, 5  ;;  %v346_v27 = vrot.slane %v344_v17, 4  ;;  %v5798_v58 = vld [vmem:[%s8159_s1 + $0x178] sm:$0xff]   ;;  %v5797_v4 = vld [vmem:[%s8159_s1 + $0xf0] sm:$0xff]  }
  0x16   : > { %5221 = vmatpush3.bf16.msra.mxu0 %v5782_v5  ;;  %5746 = vmatpush3.bf16.msra.mxu1 %v5782_v5  ;;  %v352_v28 = vrot.slane %v350_v18, 5  ;;  %v621_v31 = vrot.slane %v619_v24, 4  ;;  %v622_v32 = vshll.u32 %v6032_v19, 16  ;;  %v628_v33 = vshll.u32 %v6038_v23, 16  ;;  %v6081_v59 = vld [vmem:[%s6009_s22 + $0xc] sm:$0xf] }
  0x17   : > { %5222 = vmatprep.subr.bf16.mxu0 %v5783_v6  ;;  %5739 = vmatprep.subr.bf16.mxu1 %v5783_v6  ;;  %v337_v30 = vor.u32 %v336_v22, %v333_v21  ;;  %v347_v35 = vor.u32 %v346_v27, %v342_v26  ;;  %v632_v36 = vshrl.u32 %v6038_v23, 16  ;;  %v638_v37 = vshll.u32 %v6045_v29, 16  ;;  %v5796_v62 = vld [vmem:[%s8159_s1 + $0xb8] sm:$0xff]   ;;  %v6091_v63 = vld [vmem:[%s6009_s22 + $0x10] sm:$0xf] }
  0x18   : > { %v624_v40 = vrot.slane %v622_v32, 5  ;;  %v630_v41 = vrot.slane %v628_v33, 5  ;;  %v783_v47 = vrot.slane %v6021_v12, 5  ;;  %v786_v50 = vrot.slane %v6024_v13, 5  ;;  %v6094_v0 = vld [vmem:[%s6009_s22 + $0x14] sm:$0x1] }
  0x19   : > { %v338_v39 = vrot.slane %v337_v30, 4  ;;  %v348_v43 = vrot.slane %v347_v35, 4  ;;  %v634_v44 = vrot.slane %v632_v36, 4  ;;  %v640_v52 = vrot.slane %v638_v37, 5  ;;  %v5800_v5 = vld [vmem:[%s8159_s1 + $0x138] sm:$0xff]   ;;  %v5799_v21 = vld [vmem:[%s8159_s1 + $0xb0] sm:$0xff]  }
  0x1a   : > { %5223 = vmatpush3.bf16.msra.mxu0 %v5784_v7  ;;  %5747 = vmatpush3.bf16.msra.mxu1 %v5784_v7  ;;  %v625_v48 = vor.u32 %v624_v40, %v621_v31  ;;  %v4824_v61 = vcombine.low %v6032_v19, %v6038_v23  ;;  %v355_v1 = vshrl.u32 %v6081_v59, 16  ;;  %v358_v2 = vshll.u32 %v6081_v59, 16  ;;  %v6113_v15 = vld [vmem:[%s6009_s22 + $0xa0] sm:$0xf]  ;;  %v324_v16 = vld [vmem:[%s6009_s22 + $0xa4] sm:$0x1] }
  0x1b   : > { %5224 = vmatprep.subr.bf16.mxu0 %v5785_v8  ;;  %5740 = vmatprep.subr.bf16.mxu1 %v5785_v8  ;;  %v343_v46 = vsel %vm6051_vm2, %v338_v39, %v342_v26  ;;  %v353_v49 = vsel %vm6051_vm2, %v348_v43, %v352_v28  ;;  %v635_v51 = vor.u32 %v634_v44, %v630_v41  ;;  %v364_v6 = vshll.u32 %v6091_v63, 16  ;;  %v5804_v43 = vld [vmem:[%s8159_s1 + $0xa8] sm:$0xff]   ;;  %v6138_v44 = vld [vmem:[%s6009_s22 + $0x18] sm:$0xf]  ;;  %v6277_v13 = vld [vmem:[%s6009_s22 + $0x34] sm:$0xf] }
  0x1c   : > { %v4828_v53 = vcombine.low %v343_v46, %v353_v49  ;;  %v626_v54 = vrot.slane %v625_v48, 4  ;;  %v368_v7 = vshrl.u32 %v6091_v63, 16  ;;  %v374_v8 = vshll.u32 %v6094_v0, 16  ;;  %v6145_v48 = vld [vmem:[%s6009_s22 + $0x1c] sm:$0xf] }
  0x1d   : > { %v636_v56 = vrot.slane %v635_v51, 4  ;;  %v357_v11 = vrot.slane %v355_v1, 4  ;;  %v360_v14 = vrot.slane %v358_v2, 5  ;;  %v366_v17 = vrot.slane %v364_v6, 5  ;;  %v6148_v49 = vld [vmem:[%s6009_s22 + $0x20] sm:$0x1] }
  0x1e   : > { %5225 = vmatpush3.bf16.msra.mxu0 %v5786_v9  ;;  %5748 = vmatpush3.bf16.msra.mxu1 %v5786_v9  ;;  %v631_v60 = vsel %vm6051_vm2, %v626_v54, %v630_v41  ;;  %v6110_v9 = vld [vmem:[%s6009_s22 + $0x9c] sm:$0xf]  ;;  %v370_v18 = vrot.slane %v368_v7, 4  ;;  %v376_v19 = vrot.slane %v374_v8, 5  ;;  %v652_v24 = vshll.u32 %v6113_v15, 16 }
  0x1f   : > { %5226 = vmatprep.subr.bf16.mxu0 %v5787_v10  ;;  %5741 = vmatprep.subr.bf16.mxu1 %v5787_v10  ;;  %v641_v3 = vsel %vm6051_vm2, %v636_v56, %v640_v52  ;;  %v361_v22 = vor.u32 %v360_v14, %v357_v11  ;;  %v646_v23 = vshll.u32 %v6110_v9, 16  ;;  %v662_v28 = vshll.u32 %v324_v16, 16  ;;  %v5805_v56 = vld [vmem:[%s8159_s1 + $0xe0] sm:$0xff]   ;;  %v6162_v1 = vld [vmem:[%s6009_s22 + $0xac] sm:$0xf]  ;;  %v5809_v11 = vld [vmem:[%s8159_s1 + $0xd8] sm:$0xff]  }
  0x20   : > { %3349 = vmatprep.mubr.bf16.mxu0 %v4828_v53  ;;  %v4840_v10 = vcombine.low %v631_v60, %v641_v3  ;;  %v371_v26 = vor.u32 %v370_v18, %v366_v17  ;;  %v654_v32 = vrot.slane %v652_v24, 5  ;;  %v6125_v35 = vrot.slane %v783_v47, 4  ;;  %v325_v6 = vld [vmem:[%s6009_s22 + $0xb0] sm:$0x1] }
  0x21   : > { %v362_v30 = vrot.slane %v361_v22, 4  ;;  %v648_v31 = vrot.slane %v646_v23, 5  ;;  %v664_v37 = vrot.slane %v662_v28, 5  ;;  %v4825_v46 = vcombine.low %v6110_v9, %v6113_v15  ;;  %v5810_v22 = vld [vmem:[%s8159_s1 + $0x170] sm:$0xff]  }
  0x22   : > { %5227 = vmatpush3.bf16.msra.mxu0 %v5788_v20  ;;  %5749 = vmatpush3.bf16.msra.mxu1 %v5788_v20  ;;  %v643_v20 = vshrl.u32 %v6110_v9, 16  ;;  %v372_v36 = vrot.slane %v371_v26, 4  ;;  %v379_v51 = vshrl.u32 %v6138_v44, 16  ;;  %v382_v52 = vshll.u32 %v6138_v44, 16  ;;  %v5812_v26 = vld [vmem:[%s8159_s1 + $0x130] sm:$0xff]  }
  0x23   : > { %5228 = vmatprep.subr.bf16.mxu0 %v5789_v25  ;;  %5742 = vmatprep.subr.bf16.mxu1 %v5789_v25  ;;  %v656_v25 = vshrl.u32 %v6113_v15, 16  ;;  %v367_v39 = vsel %vm6051_vm2, %v362_v30, %v366_v17  ;;  %v676_v16 = vshll.u32 %v6162_v1, 16  ;;  %v680_v17 = vshrl.u32 %v6162_v1, 16 }
  0x24   : > { %3445 = vmatprep.mubr.bf16.mxu1 %v4840_v10  ;;  %v645_v27 = vrot.slane %v643_v20, 4  ;;  %v384_v60 = vrot.slane %v382_v52, 5  ;;  %v6211_v52 = vld [vmem:[%s6009_s22 + $0x2c] sm:$0x1] }
  0x25   : > { %v658_v33 = vrot.slane %v656_v25, 4  ;;  %v678_v24 = vrot.slane %v676_v16, 5  ;;  %v682_v25 = vrot.slane %v680_v17, 4  ;;  %v5818_v17 = vld [vmem:[%s8159_s1 + $0x88] sm:$0xff]  }
  0x26   : > { %5229 = vmatpush3.bf16.msra.mxu0 %v5790_v38  ;;  %5750 = vmatpush3.bf16.msra.mxu1 %v5790_v38  ;;  %v5803_v38 = vld [vmem:[%s8159_s1 + $0xe8] sm:$0xff]   ;;  %v649_v40 = vor.u32 %v648_v31, %v645_v27 }
  0x27   : > { %5230 = vmatprep.subr.bf16.mxu0 %v5791_v42  ;;  %5743 = vmatprep.subr.bf16.mxu1 %v5791_v42  ;;  %v659_v41 = vor.u32 %v658_v33, %v654_v32  ;;  %v4813_v42 = vcombine.low %v6081_v59, %v6091_v63  ;;  %v381_v59 = vrot.slane %v379_v51, 4  ;;  %v6205_v51 = vld [vmem:[%s6009_s22 + $0x28] sm:$0xf] }
  0x28   : > { %v650_v54 = vrot.slane %v649_v40, 4  ;;  %v790_v40 = vrot.slane %v6091_v63, 5  ;;  %v720_v27 = vld [vmem:[%s6009_s22 + $0x48] sm:$0xe] }
  0x29   : > { %v385_v9 = vor.u32 %v384_v60, %v381_v59  ;;  %v422_v59 = vshll.u32 %v6211_v52, 16  ;;  %v6223_v60 = vld [vmem:[%s6009_s22 + $0xb4] sm:$0xf] }
  0x2a   : > { %5231 = vmatpush3.bf16.msra.mxu0 %v5792_v45  ;;  %5751 = vmatpush3.bf16.msra.mxu1 %v5792_v45  ;;  %v377_v45 = vsel %vm6051_vm2, %v372_v36, %v376_v19  ;;  %v655_v2 = vsel %vm6051_vm2, %v650_v54, %v654_v32  ;;  %v683_v32 = vor.u32 %v682_v25, %v678_v24  ;;  %v5811_v36 = vld [vmem:[%s8159_s1 + $0x98] sm:$0xff]  }
  0x2b   : > { %5328 = vmatprep.subr.bf16.mxu1 %v5795_v55  ;;  %5440 = vmatprep.subr.bf16.mxu0 %v5798_v58  ;;  %v4829_v53 = vcombine.low %v367_v39, %v377_v45  ;;  %v660_v55 = vrot.slane %v659_v41, 4  ;;  %v6157_v58 = vld [vmem:[%s6009_s22 + $0xa8] sm:$0xf]  ;;  %v386_v18 = vrot.slane %v385_v9, 4  ;;  %v5813_v39 = vld [vmem:[%s8159_s1 + $0xd0] sm:$0xff]   ;;  %v691_v9 = vshrl.u32 %v6223_v60, 16 }
  0x2c   : > { %v667_v7 = vshrl.u32 %v6157_v58, 16  ;;  %v670_v15 = vshll.u32 %v6157_v58, 16  ;;  %v4826_v45 = vcombine.low %v6157_v58, %v6162_v1 }
  0x2d   : > { %3350 = vmatmul.mubr.bf16.vlgmr.msra.gmra.mxu0 %v4812_v57  ;;  %3446 = vmatmul.mubr.bf16.vlgmr.msra.gmra.mxu1 %v4824_v61  ;;  %v388_v57 = vshll.u32 %v6145_v48, 16  ;;  %v392_v61 = vshrl.u32 %v6145_v48, 16  ;;  %v665_v3 = vsel %vm6051_vm2, %v660_v55, %v664_v37  ;;  %v412_v55 = vshll.u32 %v6205_v51, 16 }
  0x2e   : > { %5329 = vmatpush3.bf16.msra.mxu1 %v5796_v62  ;;  %5441 = vmatpush3.bf16.msra.mxu0 %v5800_v5  ;;  %v398_v62 = vshll.u32 %v6148_v49, 16  ;;  %v4841_v8 = vcombine.low %v655_v2, %v665_v3  ;;  %v669_v14 = vrot.slane %v667_v7, 4  ;;  %v672_v23 = vrot.slane %v670_v15, 5 }
  0x2f   : > { %5330 = vmatprep.subr.bf16.mxu1 %v5797_v4  ;;  %3357 = vmatprep.mubr.bf16.mxu0 %v4829_v53  ;;  %v5806_v4 = vld [vmem:[%s8159_s1 + $0xa0] sm:$0xff]   ;;  %v390_v5 = vrot.slane %v388_v57, 5  ;;  %v394_v10 = vrot.slane %v392_v61, 4  ;;  %v6226_v61 = vld [vmem:[%s6009_s22 + $0xb8] sm:$0xf] }
  0x30   : > { %3453 = vmatprep.mubr.bf16.mxu1 %v4841_v8  ;;  %v400_v20 = vrot.slane %v398_v62, 5  ;;  %5442 = vmatprep.subr.bf16.mxu0 %v5810_v22  ;;  %v673_v31 = vor.u32 %v672_v23, %v669_v14  ;;  %v793_v62 = vrot.slane %v6094_v0, 5  ;;  %v424_v8 = vrot.slane %v422_v59, 5 }
  0x31   : > { %v395_v19 = vor.u32 %v394_v10, %v390_v5  ;;  %v391_v28 = vsel %vm6051_vm2, %v386_v18, %v390_v5  ;;  %v326_v5 = vld [vmem:[%s6009_s22 + $0xbc] sm:$0x1]  ;;  %v694_v10 = vshll.u32 %v6223_v60, 16  ;;  %v700_v14 = vshll.u32 %v6226_v61, 16 }
  0x32   : > { %5331 = vmatpush3.bf16.msra.mxu1 %v5799_v21  ;;  %v686_v21 = vshll.u32 %v325_v6, 16  ;;  %5443 = vmatpush3.bf16.msra.mxu0 %v5812_v26  ;;  %v5817_v6 = vld [vmem:[%s8159_s1 + $0xc8] sm:$0xff]   ;;  %v704_v15 = vshrl.u32 %v6226_v61, 16  ;;  %v710_v16 = vshll.u32 %v326_v5, 16 }
  0x33   : > { %5332 = vmatprep.subr.bf16.mxu1 %v5803_v38  ;;  %v396_v30 = vrot.slane %v395_v19, 4  ;;  %v4814_v38 = vcombine.low %v6138_v44, %v6145_v48  ;;  %v5814_v44 = vld [vmem:[%s8159_s1 + $0x90] sm:$0xff]   ;;  %v693_v19 = vrot.slane %v691_v9, 4 }
  0x34   : > { %v688_v33 = vrot.slane %v686_v21, 5  ;;  %v5819_v21 = vld [vmem:[%s8159_s1 + $0xc0] sm:$0xff]   ;;  %v706_v25 = vrot.slane %v704_v15, 4  ;;  %v712_v26 = vrot.slane %v710_v16, 5 }
  0x35   : > { %3358 = vmatmul.mubr.bf16.gmra.mxu0 %v4813_v42  ;;  %3454 = vmatmul.mubr.bf16.gmra.mxu1 %v4825_v46  ;;  %v401_v37 = vsel %vm6051_vm2, %v396_v30, %v400_v20  ;;  %v674_v42 = vrot.slane %v673_v31, 4  ;;  %v6202_v46 = vld [vmem:[%s6009_s22 + $0x24] sm:$0xf]  ;;  %v696_v20 = vrot.slane %v694_v10, 5  ;;  %v5820_v31 = vld [vmem:[%s8159_s1 + $0x168] sm:$0xff]  }
  0x36   : > { %5333 = vmatpush3.bf16.msra.mxu1 %v5804_v43  ;;  %v4830_v41 = vcombine.low %v391_v28, %v401_v37  ;;  %v684_v43 = vrot.slane %v683_v32, 4  ;;  %v403_v53 = vshrl.u32 %v6202_v46, 16  ;;  %v406_v54 = vshll.u32 %v6202_v46, 16  ;;  %5444 = vmatprep.subr.bf16.mxu0 %v5820_v31 }
  0x37   : > { %5334 = vmatprep.subr.bf16.mxu1 %v5805_v56  ;;  %v416_v56 = vshrl.u32 %v6205_v51, 16  ;;  %v679_v57 = vsel %vm6051_vm2, %v674_v42, %v678_v24  ;;  %v702_v24 = vrot.slane %v700_v14, 5  ;;  %v697_v30 = vor.u32 %v696_v20, %v693_v19 }
  0x38   : > { %3365 = vmatprep.mubr.bf16.mxu0 %v4830_v41  ;;  %v689_v58 = vsel %vm6051_vm2, %v684_v43, %v688_v33  ;;  %v405_v2 = vrot.slane %v403_v53, 4  ;;  %v408_v3 = vrot.slane %v406_v54, 5  ;;  %v6266_v41 = vsel %vm6245_vm5, %v6125_v35, %v786_v50  ;;  %v6282_v35 = vld [vmem:[%s6009_s22 + $0x38] sm:$0x1] }
  0x39   : > { %v4842_v1 = vcombine.low %v679_v57, %v689_v58  ;;  %v418_v7 = vrot.slane %v416_v56, 4  ;;  %v707_v33 = vor.u32 %v706_v25, %v702_v24  ;;  %v698_v37 = vrot.slane %v697_v30, 4  ;;  %v5825_v56 = vld [vmem:[%s8159_s1 + $0x1f8] sm:$0xff]  }
  0x3a   : > { %5335 = vmatpush3.bf16.msra.mxu1 %v5806_v4  ;;  %v414_v4 = vrot.slane %v412_v55, 5  ;;  %v436_v55 = vshll.u32 %v6277_v13, 16  ;;  %v440_v58 = vshrl.u32 %v6277_v13, 16  ;;  %v446_v59 = vshll.u32 %v6282_v35, 16 }
  0x3b   : > { %5336 = vmatprep.subr.bf16.mxu1 %v5809_v11  ;;  %3461 = vmatprep.mubr.bf16.mxu1 %v4842_v1  ;;  %v409_v11 = vor.u32 %v408_v3, %v405_v2  ;;  %v708_v43 = vrot.slane %v707_v33, 4  ;;  %v703_v50 = vsel %vm6051_vm2, %v698_v37, %v702_v24  ;;  %v6319_v33 = vld [vmem:[%s6009_s22 + $0x40] sm:$0xf] }
  0x3c   : > { %v419_v18 = vor.u32 %v418_v7, %v414_v4  ;;  %v438_v5 = vrot.slane %v436_v55, 5  ;;  %v442_v7 = vrot.slane %v440_v58, 4  ;;  %v715_v55 = vld [vmem:[%s6009_s22 + $0xc] sm:$0xe] }
  0x3d   : > { %3366 = vmatmul.mubr.bf16.gmra.mxu0 %v4814_v38  ;;  %3462 = vmatmul.mubr.bf16.gmra.mxu1 %v4826_v45  ;;  %v410_v23 = vrot.slane %v409_v11, 4  ;;  %v4815_v38 = vcombine.low %v6202_v46, %v6205_v51  ;;  %v4827_v45 = vcombine.low %v6223_v60, %v6226_v61  ;;  %v5822_v46 = vld [vmem:[%s8159_s1 + $0x128] sm:$0xff]   ;;  %v713_v57 = vsel %vm6051_vm2, %v708_v43, %v712_v26  ;;  %v6296_v61 = vld [vmem:[%s6009_s22 + $0x10] sm:$0xf]  ;;  %v6310_v26 = vld [vmem:[%s6009_s22 + $0x3c] sm:$0xf] }
  0x3e   : > { %5337 = vmatpush3.bf16.msra.mxu1 %v5811_v36  ;;  %v420_v28 = vrot.slane %v419_v18, 4  ;;  %5445 = vmatpush3.bf16.msra.mxu0 %v5822_v46  ;;  %v4652_v60 = vld [vmem:[%s6009_s22 + $0xc] sm:$0xf]  ;;  %v4843_v2 = vcombine.low %v703_v50, %v713_v57  ;;  %v955_v14 = vshll.u32 %v6296_v61, 16  ;;  %v959_v15 = vshrl.u32 %v6296_v61, 16 }
  0x3f   : > { %5338 = vmatprep.subr.bf16.mxu1 %v5813_v39  ;;  %v415_v32 = vsel %vm6051_vm2, %v410_v23, %v414_v4  ;;  %v5821_v39 = vld [vmem:[%s8159_s1 + $0x80] sm:$0xff]   ;;  %v946_v9 = vshrl.u32 %v4652_v60, 16  ;;  %v949_v10 = vshll.u32 %v4652_v60, 16  ;;  %v4860_v16 = vcombine.low %v4652_v60, %v6296_v61  ;;  %v4654_v43 = vld [vmem:[%s6009_s22 + $0x18] sm:$0xf]  ;;  %v5833_v60 = vld [vmem:[%s8159_s1 + $0x1f0] sm:$0xff]  }
  0x40   : > { %v425_v36 = vsel %vm6051_vm2, %v420_v28, %v424_v8  ;;  %v448_v8 = vrot.slane %v446_v59, 5  ;;  %3469 = vmatprep.mubr.bf16.mxu1 %v4843_v2  ;;  %v6307_v24 = vrot.slane %v955_v14, 5  ;;  %v961_v25 = vrot.slane %v959_v15, 4 }
  0x41   : > { %v4831_v42 = vcombine.low %v415_v32, %v425_v36  ;;  %v948_v18 = vrot.slane %v946_v9, 4  ;;  %v951_v19 = vrot.slane %v949_v10, 5  ;;  %v792_v28 = vrot.slane %v790_v40, 4  ;;  %v6322_v36 = vld [vmem:[%s6009_s22 + $0x44] sm:$0x1]  ;;  %v5834_v10 = vld [vmem:[%s8159_s1 + $0x1b0] sm:$0xff]  }
  0x42   : > { %5339 = vmatpush3.bf16.msra.mxu1 %v5814_v44  ;;  %v6274_v44 = vld [vmem:[%s6009_s22 + $0x30] sm:$0xf]  ;;  %v451_v37 = vshrl.u32 %v6310_v26, 16  ;;  %v454_v12 = vshll.u32 %v6310_v26, 16  ;;  %v464_v59 = vshrl.u32 %v6319_v33, 16 }
  0x43   : > { %5340 = vmatprep.subr.bf16.mxu1 %v5817_v6  ;;  %v427_v53 = vshrl.u32 %v6274_v44, 16  ;;  %v430_v54 = vshll.u32 %v6274_v44, 16  ;;  %3373 = vmatprep.mubr.bf16.mxu0 %v4831_v42  ;;  %v4816_v1 = vcombine.low %v6274_v44, %v6277_v13  ;;  %v714_v6 = vld [vmem:[%s6009_s22] sm:$0xe]  ;;  %v952_v31 = vor.u32 %v951_v19, %v948_v18  ;;  %v5835_v18 = vld [vmem:[%s8159_s1 + $0x158] sm:$0xff]  }
  0x44   : > { %v4636_v20 = vrot.slane %v714_v6, 9  ;;  %v456_v58 = vrot.slane %v454_v12, 5 }
  0x45   : > { %3374 = vmatmul.mubr.bf16.gmra.mxu0 %v4815_v38  ;;  %v429_v3 = vrot.slane %v427_v53, 4  ;;  %v432_v4 = vrot.slane %v430_v54, 5  ;;  %3470 = vmatmul.mubr.bf16.gmra.mxu1 %v4827_v45  ;;  %v6332_v45 = vld [vmem:[%s6009_s22 + $0x1c] sm:$0xf]  ;;  %v6339_v50 = vrot.slane %v952_v31, 4  ;;  %v453_v54 = vrot.slane %v451_v37, 4 }
  0x46   : > { %5341 = vmatpush3.bf16.msra.mxu1 %v5818_v17  ;;  %v443_v17 = vor.u32 %v442_v7, %v438_v5  ;;  %3510 = vmatprep.mubr.bf16.mxu1 %v4860_v16  ;;  %v784_v32 = vsel %vm6245_vm5, %v4636_v20, %v783_v47  ;;  %v5830_v47 = vld [vmem:[%s8159_s1 + $0x120] sm:$0xff]   ;;  %v5826_v53 = vld [vmem:[%s8159_s1 + $0x1b8] sm:$0xff]   ;;  %v466_v7 = vrot.slane %v464_v59, 4  ;;  %v4861_v9 = vcombine.low %v4654_v43, %v6332_v45 }
  0x47   : > { %5342 = vmatprep.subr.bf16.mxu1 %v5819_v21  ;;  %v433_v11 = vor.u32 %v432_v4, %v429_v3  ;;  %v5829_v21 = vld [vmem:[%s8159_s1 + $0x160] sm:$0xff]   ;;  %v4844_v42 = vcombine.low %v784_v32, %v6266_v41  ;;  %v460_v41 = vshll.u32 %v6319_v33, 16  ;;  %v470_v3 = vshll.u32 %v6322_v36, 16 }
  0x48   : > { %v444_v30 = vrot.slane %v443_v17, 4  ;;  %5446 = vmatprep.subr.bf16.mxu0 %v5829_v21  ;;  %v970_v4 = vshrl.u32 %v4654_v43, 16  ;;  %v457_v6 = vor.u32 %v456_v58, %v453_v54  ;;  %v4817_v16 = vcombine.low %v6310_v26, %v6319_v33  ;;  %v6368_v17 = vld [vmem:[%s6009_s22 + $0x48] sm:$0xf]  ;;  %v6378_v21 = vld [vmem:[%s6009_s22 + $0x4c] sm:$0xf] }
  0x49   : > { %v434_v23 = vrot.slane %v433_v11, 4  ;;  %5447 = vmatpush3.bf16.msra.mxu0 %v5830_v47  ;;  %v462_v2 = vrot.slane %v460_v41, 5  ;;  %v472_v11 = vrot.slane %v470_v3, 5  ;;  %v794_v20 = vsel %vm6245_vm5, %v792_v28, %v793_v62  ;;  %v4656_v32 = vld [vmem:[%s6009_s22 + $0x24] sm:$0xf] }
  0x4a   : > { %5343 = vmatpush3.bf16.msra.mxu1 %v5821_v39  ;;  %v962_v39 = vor.u32 %v961_v25, %v6307_v24  ;;  %v449_v46 = vsel %vm6051_vm2, %v444_v30, %v448_v8  ;;  %v6361_v14 = vrot.slane %v970_v4, 4  ;;  %v458_v44 = vrot.slane %v457_v6, 4  ;;  %5448 = vmatprep.subr.bf16.mxu0 %v5835_v18  ;;  %v6421_v18 = vld [vmem:[%s6009_s22 + $0x54] sm:$0xf] }
  0x4b   : > { %5552 = vmatprep.subr.bf16.mxu1 %v5825_v56  ;;  %v439_v38 = vsel %vm6051_vm2, %v434_v23, %v438_v5  ;;  %v973_v5 = vshll.u32 %v4654_v43, 16  ;;  %v467_v19 = vor.u32 %v466_v7, %v462_v2  ;;  %v6381_v23 = vld [vmem:[%s6009_s22 + $0x50] sm:$0x1]  ;;  %v475_v25 = vshrl.u32 %v6368_v17, 16 }
  0x4c   : > { %v4832_v56 = vcombine.low %v439_v38, %v449_v46  ;;  %v6346_v57 = vrot.slane %v962_v39, 4  ;;  %v478_v26 = vshll.u32 %v6368_v17, 16  ;;  %v484_v30 = vshll.u32 %v6378_v21, 16  ;;  %v6396_v38 = vld [vmem:[%s6009_s22 + $0x28] sm:$0xf]  ;;  %v5836_v46 = vld [vmem:[%s8159_s1 + $0x118] sm:$0xff]  }
  0x4d   : > { %3511 = vmatmul.mubr.bf16.vlgmr.msra.gmra.mxu1 %v4844_v42  ;;  %v6363_v15 = vrot.slane %v973_v5, 5  ;;  %v488_v31 = vshrl.u32 %v6378_v21, 16  ;;  %v463_v0 = vsel %vm6051_vm2, %v458_v44, %v462_v2  ;;  %v468_v37 = vrot.slane %v467_v19, 4  ;;  %v716_v39 = vld [vmem:[%s6009_s22 + $0x18] sm:$0xe]  ;;  %5449 = vmatpush3.bf16.msra.mxu0 %v5836_v46  ;;  %v5842_v5 = vld [vmem:[%s8159_s1 + $0x1e8] sm:$0xff]  }
  0x4e   : > { %3381 = vmatprep.mubr.bf16.mxu0 %v4832_v56  ;;  %5553 = vmatpush3.bf16.msra.mxu1 %v5826_v53  ;;  %v494_v28 = vshll.u32 %v6381_v23, 16  ;;  %v477_v12 = vrot.slane %v475_v25, 4  ;;  %v480_v43 = vrot.slane %v478_v26, 5  ;;  %v486_v47 = vrot.slane %v484_v30, 5  ;;  %v4684_v19 = vld [vmem:[%s6009_s22 + $0x14] sm:$0x1] }
  0x4f   : > { %3382 = vmatmul.mubr.bf16.gmra.mxu0 %v4816_v1  ;;  %3518 = vmatprep.mubr.bf16.mxu1 %v4861_v9  ;;  %v4637_v1 = vrot.slane %v715_v55, 9  ;;  %v473_v53 = vsel %vm6051_vm2, %v468_v37, %v472_v11  ;;  %v490_v63 = vrot.slane %v488_v31, 4  ;;  %v994_v41 = vshrl.u32 %v4656_v32, 16  ;;  %v4700_v44 = vld [vmem:[%s6009_s22 + $0xc] sm:$0xe] }
  0x50   : > { %5554 = vmatprep.subr.bf16.mxu1 %v5833_v60  ;;  %v496_v54 = vrot.slane %v494_v28, 5  ;;  %v4833_v55 = vcombine.low %v463_v0, %v473_v53  ;;  %v481_v56 = vor.u32 %v480_v43, %v477_v12  ;;  %v997_v58 = vshll.u32 %v4656_v32, 16  ;;  %v5843_v0 = vld [vmem:[%s8159_s1 + $0x110] sm:$0xff]  }
  0x51   : > { %v791_v62 = vsel %vm6245_vm5, %v4637_v1, %v790_v40  ;;  %v5841_v40 = vld [vmem:[%s8159_s1 + $0x150] sm:$0xff]   ;;  %v491_v60 = vor.u32 %v490_v63, %v486_v47  ;;  %v6408_v2 = vrot.slane %v994_v41, 4  ;;  %v4862_v3 = vcombine.low %v4656_v32, %v6396_v38  ;;  %v717_v63 = vld [vmem:[%s6009_s22 + $0x24] sm:$0xe] }
  0x52   : > { %v4845_v42 = vcombine.low %v791_v62, %v794_v20  ;;  %5555 = vmatpush3.bf16.msra.mxu1 %v5834_v10  ;;  %v4818_v4 = vcombine.low %v6368_v17, %v6378_v21  ;;  %5450 = vmatprep.subr.bf16.mxu0 %v5841_v40  ;;  %v482_v6 = vrot.slane %v481_v56, 4  ;;  %v6416_v7 = vrot.slane %v997_v58, 5  ;;  %v6437_v20 = vld [vmem:[%s6009_s22 + $0x5c] sm:$0x1]  ;;  %v6453_v12 = vld [vmem:[%s6009_s22 + $0x34] sm:$0xf] }
  0x53   : > { %3389 = vmatprep.mubr.bf16.mxu0 %v4833_v55  ;;  %v4638_v9 = vrot.slane %v716_v39, 9  ;;  %v797_v10 = vrot.slane %v6145_v48, 5  ;;  %v492_v11 = vrot.slane %v491_v60, 4  ;;  %v800_v17 = vrot.slane %v6148_v49, 5  ;;  %v6434_v49 = vld [vmem:[%s6009_s22 + $0x58] sm:$0xf]  ;;  %5556 = vmatprep.subr.bf16.mxu1 %v5842_v5 }
  0x54   : > { %v487_v1 = vsel %vm6051_vm2, %v482_v6, %v486_v47  ;;  %v499_v25 = vshrl.u32 %v6421_v18, 16  ;;  %v502_v30 = vshll.u32 %v6421_v18, 16  ;;  %v508_v31 = vshll.u32 %v6434_v49, 16  ;;  %5451 = vmatpush3.bf16.msra.mxu0 %v5843_v0  ;;  %v6461_v58 = vld [vmem:[%s6009_s22 + $0x60] sm:$0xf] }
  0x55   : > { %3519 = vmatmul.mubr.bf16.gmra.mxu1 %v4845_v42  ;;  %v798_v48 = vsel %vm6245_vm5, %v4638_v9, %v797_v10  ;;  %v497_v26 = vsel %vm6051_vm2, %v492_v11, %v496_v54  ;;  %v512_v32 = vshrl.u32 %v6434_v49, 16  ;;  %v518_v39 = vshll.u32 %v6437_v20, 16  ;;  %v4658_v42 = vld [vmem:[%s6009_s22 + $0x30] sm:$0xf]  ;;  %v5844_v54 = vld [vmem:[%s8159_s1 + $0x1a8] sm:$0xff]  }
  0x56   : > { %3526 = vmatprep.mubr.bf16.mxu1 %v4862_v3  ;;  %v4834_v37 = vcombine.low %v487_v1, %v497_v26  ;;  %v501_v28 = vrot.slane %v499_v25, 4  ;;  %v504_v47 = vrot.slane %v502_v30, 5  ;;  %v510_v46 = vrot.slane %v508_v31, 5  ;;  %v6467_v9 = vld [vmem:[%s6009_s22 + $0x64] sm:$0xf]  ;;  %5557 = vmatpush3.bf16.msra.mxu1 %v5844_v54 }
  0x57   : > { %3390 = vmatmul.mubr.bf16.gmra.mxu0 %v4817_v16  ;;  %v799_v16 = vrot.slane %v797_v10, 4  ;;  %v514_v53 = vrot.slane %v512_v32, 4  ;;  %v520_v41 = vrot.slane %v518_v39, 5  ;;  %v1018_v40 = vshrl.u32 %v4658_v42, 16  ;;  %v4660_v30 = vld [vmem:[%s6009_s22 + $0x3c] sm:$0xf] }
  0x58   : > { %3397 = vmatprep.mubr.bf16.mxu0 %v4834_v37  ;;  %v1021_v55 = vshll.u32 %v4658_v42, 16  ;;  %v505_v60 = vor.u32 %v504_v47, %v501_v28  ;;  %v4863_v5 = vcombine.low %v4658_v42, %v6453_v12  ;;  %v4819_v6 = vcombine.low %v6421_v18, %v6434_v49  ;;  %v6481_v31 = vld [vmem:[%s6009_s22 + $0x40] sm:$0xf]  ;;  %v718_v42 = vld [vmem:[%s6009_s22 + $0x30] sm:$0xe] }
  0x59   : > { %v801_v62 = vsel %vm6245_vm5, %v799_v16, %v800_v17  ;;  %v515_v3 = vor.u32 %v514_v53, %v510_v46  ;;  %v6469_v10 = vrot.slane %v1018_v40, 4  ;;  %v4639_v17 = vrot.slane %v717_v63, 9  ;;  %v6594_v56 = vld [vmem:[%s6009_s22 + $0x84] sm:$0xf] }
  0x5a   : > { %v4846_v43 = vcombine.low %v798_v48, %v801_v62  ;;  %v6471_v11 = vrot.slane %v1021_v55, 5  ;;  %v804_v1 = vrot.slane %v6205_v51, 5  ;;  %v6475_v48 = vld [vmem:[%s6009_s22 + $0x68] sm:$0x1]  ;;  %v506_v16 = vrot.slane %v505_v60, 4 }
  0x5b   : > { %v516_v25 = vrot.slane %v515_v3, 4  ;;  %v807_v18 = vrot.slane %v6211_v52, 5  ;;  %v523_v26 = vshrl.u32 %v6461_v58, 16  ;;  %v526_v51 = vshll.u32 %v6461_v58, 16 }
  0x5c   : > { %v805_v32 = vsel %vm6245_vm5, %v4639_v17, %v804_v1  ;;  %v806_v0 = vrot.slane %v804_v1, 4  ;;  %v532_v37 = vshll.u32 %v6467_v9, 16  ;;  %v511_v52 = vsel %vm6051_vm2, %v506_v16, %v510_v46  ;;  %v6505_v1 = vld [vmem:[%s6009_s22 + $0x6c] sm:$0xf] }
  0x5d   : > { %3527 = vmatmul.mubr.bf16.gmra.mxu1 %v4846_v43  ;;  %v521_v62 = vsel %vm6051_vm2, %v516_v25, %v520_v41  ;;  %v525_v28 = vrot.slane %v523_v26, 4  ;;  %v536_v39 = vshrl.u32 %v6467_v9, 16  ;;  %v528_v53 = vrot.slane %v526_v51, 5  ;;  %v5848_v41 = vld [vmem:[%s8159_s1 + $0x108] sm:$0xff]  }
  0x5e   : > { %3534 = vmatprep.mubr.bf16.mxu1 %v4863_v5  ;;  %v4835_v43 = vcombine.low %v511_v52, %v521_v62  ;;  %v808_v47 = vsel %vm6245_vm5, %v806_v0, %v807_v18  ;;  %v534_v63 = vrot.slane %v532_v37, 5  ;;  %v542_v46 = vshll.u32 %v6475_v48, 16 }
  0x5f   : > { %3398 = vmatmul.mubr.bf16.gmra.mxu0 %v4818_v4  ;;  %v5847_v4 = vld [vmem:[%s8159_s1 + $0x148] sm:$0xff]   ;;  %v4847_v54 = vcombine.low %v805_v32, %v808_v47  ;;  %v538_v40 = vrot.slane %v536_v39, 4  ;;  %v1042_v55 = vshrl.u32 %v4660_v30, 16  ;;  %v529_v60 = vor.u32 %v528_v53, %v525_v28  ;;  %v6512_v32 = vld [vmem:[%s6009_s22 + $0x70] sm:$0xf] }
  0x60   : > { %5452 = vmatprep.subr.bf16.mxu0 %v5847_v4  ;;  %3405 = vmatprep.mubr.bf16.mxu0 %v4835_v43  ;;  %v1045_v3 = vshll.u32 %v4660_v30, 16  ;;  %v4864_v17 = vcombine.low %v4660_v30, %v6481_v31  ;;  %v544_v25 = vrot.slane %v542_v46, 5  ;;  %v4820_v26 = vcombine.low %v6461_v58, %v6467_v9  ;;  %v6518_v4 = vld [vmem:[%s6009_s22 + $0x74] sm:$0x1]  ;;  %v4662_v39 = vld [vmem:[%s6009_s22 + $0x48] sm:$0xf] }
  0x61   : > { %v539_v16 = vor.u32 %v538_v40, %v534_v63  ;;  %v6507_v18 = vrot.slane %v1042_v55, 4  ;;  %5453 = vmatpush3.bf16.msra.mxu0 %v5848_v41  ;;  %v530_v0 = vrot.slane %v529_v60, 4  ;;  %v4640_v37 = vrot.slane %v718_v42, 9 }
  0x62   : > { %v6514_v51 = vrot.slane %v1045_v3, 5  ;;  %v811_v30 = vrot.slane %v6277_v13, 5  ;;  %v814_v62 = vrot.slane %v6282_v35, 5  ;;  %v547_v58 = vshrl.u32 %v6505_v1, 16 }
  0x63   : > { %v540_v52 = vrot.slane %v539_v16, 4  ;;  %v550_v28 = vshll.u32 %v6505_v1, 16  ;;  %v535_v43 = vsel %vm6051_vm2, %v530_v0, %v534_v63  ;;  %v556_v13 = vshll.u32 %v6512_v32, 16  ;;  %v5851_v63 = vld [vmem:[%s8159_s1 + $0x1e0] sm:$0xff]   ;;  %v719_v0 = vld [vmem:[%s6009_s22 + $0x3c] sm:$0xe] }
  0x64   : > { %v812_v42 = vsel %vm6245_vm5, %v4640_v37, %v811_v30  ;;  %v813_v47 = vrot.slane %v811_v30, 4  ;;  %v549_v53 = vrot.slane %v547_v58, 4  ;;  %v560_v40 = vshrl.u32 %v6512_v32, 16  ;;  %5558 = vmatprep.subr.bf16.mxu1 %v5851_v63  ;;  %v6562_v63 = vld [vmem:[%s6009_s22 + $0x80] sm:$0x1] }
  0x65   : > { %3535 = vmatmul.mubr.bf16.gmra.mxu1 %v4847_v54  ;;  %v545_v35 = vsel %vm6051_vm2, %v540_v52, %v544_v25  ;;  %v552_v54 = vrot.slane %v550_v28, 5  ;;  %v558_v41 = vrot.slane %v556_v13, 5  ;;  %v566_v60 = vshll.u32 %v6518_v4, 16  ;;  %v6545_v28 = vld [vmem:[%s6009_s22 + $0x78] sm:$0xf] }
  0x66   : > { %3542 = vmatprep.mubr.bf16.mxu1 %v4864_v17  ;;  %v4836_v46 = vcombine.low %v535_v43, %v545_v35  ;;  %v815_v55 = vsel %vm6245_vm5, %v813_v47, %v814_v62  ;;  %v562_v16 = vrot.slane %v560_v40, 4  ;;  %v1066_v25 = vshrl.u32 %v4662_v39, 16  ;;  %v5852_v62 = vld [vmem:[%s8159_s1 + $0x1a0] sm:$0xff]   ;;  %v6555_v35 = vld [vmem:[%s6009_s22 + $0x7c] sm:$0xf] }
  0x67   : > { %3406 = vmatmul.mubr.bf16.gmra.mxu0 %v4819_v6  ;;  %v6530_v6 = vld [vmem:[%s6009_s22 + $0x4c] sm:$0xf]  ;;  %v4848_v3 = vcombine.low %v812_v42, %v815_v55  ;;  %v553_v17 = vor.u32 %v552_v54, %v549_v53  ;;  %v568_v37 = vrot.slane %v566_v60, 5  ;;  %v1069_v30 = vshll.u32 %v4662_v39, 16  ;;  %5559 = vmatpush3.bf16.msra.mxu1 %v5852_v62 }
  0x68   : > { %3413 = vmatprep.mubr.bf16.mxu0 %v4836_v46  ;;  %v4865_v58 = vcombine.low %v4662_v39, %v6530_v6  ;;  %v563_v42 = vor.u32 %v562_v16, %v558_v41  ;;  %v6550_v47 = vrot.slane %v1066_v25, 4  ;;  %v4821_v13 = vcombine.low %v6505_v1, %v6512_v32  ;;  %v5856_v25 = vld [vmem:[%s8159_s1 + $0x100] sm:$0xff]  }
  0x69   : > { %v554_v43 = vrot.slane %v553_v17, 4  ;;  %v6557_v53 = vrot.slane %v1069_v30, 5  ;;  %v4641_v39 = vrot.slane %v719_v0, 9  ;;  %v818_v54 = vrot.slane %v6319_v33, 5  ;;  %v6570_v17 = vld [vmem:[%s6009_s22 + $0x58] sm:$0xf] }
  0x6a   : > { %v821_v40 = vrot.slane %v6322_v36, 5  ;;  %v564_v55 = vrot.slane %v563_v42, 4  ;;  %v571_v1 = vshrl.u32 %v6545_v28, 16  ;;  %v574_v60 = vshll.u32 %v6545_v28, 16  ;;  %v5855_v33 = vld [vmem:[%s8159_s1 + $0x140] sm:$0xff]   ;;  %v5858_v42 = vld [vmem:[%s8159_s1 + $0x1d8] sm:$0xff]  }
  0x6b   : > { %v559_v46 = vsel %vm6051_vm2, %v554_v43, %v558_v41  ;;  %v819_v36 = vsel %vm6245_vm5, %v4641_v39, %v818_v54  ;;  %v580_v41 = vshll.u32 %v6555_v35, 16  ;;  %v584_v16 = vshrl.u32 %v6555_v35, 16  ;;  %5454 = vmatprep.subr.bf16.mxu0 %v5855_v33  ;;  %5560 = vmatprep.subr.bf16.mxu1 %v5858_v42 }
  0x6c   : > { %v569_v0 = vsel %vm6051_vm2, %v564_v55, %v568_v37  ;;  %v573_v30 = vrot.slane %v571_v1, 4  ;;  %v590_v43 = vshll.u32 %v6562_v63, 16  ;;  %5455 = vmatpush3.bf16.msra.mxu0 %v5856_v25  ;;  %v6604_v25 = vld [vmem:[%s6009_s22 + $0x8c] sm:$0x1] }
  0x6d   : > { %3543 = vmatmul.mubr.bf16.gmra.mxu1 %v4848_v3  ;;  %v4664_v3 = vld [vmem:[%s6009_s22 + $0x54] sm:$0xf]  ;;  %v4837_v39 = vcombine.low %v559_v46, %v569_v0  ;;  %v586_v52 = vrot.slane %v584_v16, 4  ;;  %v4642_v16 = vrot.slane %v720_v27, 9  ;;  %v595_v27 = vshrl.u32 %v6594_v56, 16 }
  0x6e   : > { %3550 = vmatprep.mubr.bf16.mxu1 %v4865_v58  ;;  %v576_v58 = vrot.slane %v574_v60, 5  ;;  %v592_v1 = vrot.slane %v590_v43, 5  ;;  %v1090_v60 = vshrl.u32 %v4664_v3, 16  ;;  %v1093_v5 = vshll.u32 %v4664_v3, 16  ;;  %v6645_v46 = vld [vmem:[%s6009_s22 + $0x6c] sm:$0xf] }
  0x6f   : > { %3414 = vmatmul.mubr.bf16.gmra.mxu0 %v4820_v26  ;;  %v820_v26 = vrot.slane %v818_v54, 4  ;;  %v582_v54 = vrot.slane %v580_v41, 5  ;;  %v4866_v0 = vcombine.low %v4664_v3, %v6570_v17  ;;  %v828_v43 = vrot.slane %v6381_v23, 5 }
  0x70   : > { %v577_v55 = vor.u32 %v576_v58, %v573_v30  ;;  %3421 = vmatprep.mubr.bf16.mxu0 %v4837_v39  ;;  %v6599_v41 = vrot.slane %v1090_v60, 4  ;;  %v6609_v30 = vrot.slane %v1093_v5, 5  ;;  %v825_v58 = vrot.slane %v6378_v21, 5  ;;  %v6622_v5 = vld [vmem:[%s8159_s1 + $0x238] sm:$0xff]  }
  0x71   : > { %v822_v62 = vsel %vm6245_vm5, %v820_v26, %v821_v40  ;;  %v587_v33 = vor.u32 %v586_v52, %v582_v54  ;;  %v6597_v40 = vld [vmem:[%s6009_s22 + $0x88] sm:$0xf]  ;;  %v5859_v52 = vld [vmem:[%s8159_s1 + $0x198] sm:$0xff]   ;;  %5688 = vmatprep.subr.bf16.mxu0 %v6622_v5 }
  0x72   : > { %v4849_v37 = vcombine.low %v819_v36, %v822_v62  ;;  %v578_v26 = vrot.slane %v577_v55, 4  ;;  %v4822_v36 = vcombine.low %v6545_v28, %v6555_v35  ;;  %v598_v28 = vshll.u32 %v6594_v56, 16  ;;  %v4666_v62 = vld [vmem:[%s6009_s22 + $0x60] sm:$0xf]  ;;  %5561 = vmatpush3.bf16.msra.mxu1 %v5859_v52 }
  0x73   : > { %v588_v3 = vrot.slane %v587_v33, 4  ;;  %v604_v39 = vshll.u32 %v6597_v40, 16  ;;  %v826_v23 = vsel %vm6245_vm5, %v4642_v16, %v825_v58  ;;  %v597_v55 = vrot.slane %v595_v27, 4 }
  0x74   : > { %v583_v42 = vsel %vm6051_vm2, %v578_v26, %v582_v54  ;;  %v608_v54 = vshrl.u32 %v6597_v40, 16  ;;  %v600_v60 = vrot.slane %v598_v28, 5  ;;  %v614_v52 = vshll.u32 %v6604_v25, 16 }
  0x75   : > { %3551 = vmatmul.mubr.bf16.gmra.mxu1 %v4849_v37  ;;  %v593_v21 = vsel %vm6051_vm2, %v588_v3, %v592_v1  ;;  %v606_v33 = vrot.slane %v604_v39, 5  ;;  %v5863_v1 = vld [vmem:[%s8159_s1 + $0x1d0] sm:$0xff]   ;;  %v1114_v3 = vshrl.u32 %v4666_v62, 16  ;;  %v1117_v39 = vshll.u32 %v4666_v62, 16 }
  0x76   : > { %3558 = vmatprep.mubr.bf16.mxu1 %v4866_v0  ;;  %v4838_v37 = vcombine.low %v583_v42, %v593_v21  ;;  %v6630_v0 = vld [vmem:[%s6009_s22 + $0x64] sm:$0xf]  ;;  %v610_v16 = vrot.slane %v608_v54, 4  ;;  %v5864_v42 = vld [vmem:[%s8159_s1 + $0x190] sm:$0xff]   ;;  %v601_v28 = vor.u32 %v600_v60, %v597_v55  ;;  %5562 = vmatprep.subr.bf16.mxu1 %v5863_v1  ;;  %v616_v54 = vrot.slane %v614_v52, 5 }
  0x77   : > { %3422 = vmatmul.mubr.bf16.gmra.mxu0 %v4821_v13  ;;  %v827_v13 = vrot.slane %v825_v58, 4  ;;  %v721_v58 = vld [vmem:[%s6009_s22 + $0x54] sm:$0xe]  ;;  %v6650_v59 = vrot.slane %v1114_v3, 4  ;;  %v4867_v8 = vcombine.low %v4666_v62, %v6630_v0  ;;  %5563 = vmatpush3.bf16.msra.mxu1 %v5864_v42  ;;  %v4823_v55 = vcombine.low %v6594_v56, %v6597_v40 }
  0x78   : > { %3429 = vmatprep.mubr.bf16.mxu0 %v4838_v37  ;;  %v6655_v37 = vrot.slane %v1117_v39, 5  ;;  %v4643_v60 = vrot.slane %v721_v58, 9  ;;  %v832_v1 = vrot.slane %v6434_v49, 5  ;;  %v1138_v52 = vshrl.u32 %v6645_v46, 16  ;;  %v5868_v39 = vld [vmem:[%s8159_s1 + $0x1c8] sm:$0xff]  }
  0x79   : > { %v829_v26 = vsel %vm6245_vm5, %v827_v13, %v828_v43  ;;  %v6648_v43 = vld [vmem:[%s6009_s22 + $0x70] sm:$0xf]  ;;  %v611_v13 = vor.u32 %v610_v16, %v606_v33  ;;  %v835_v16 = vrot.slane %v6437_v20, 5  ;;  %v1141_v3 = vshll.u32 %v6645_v46, 16  ;;  %5564 = vmatprep.subr.bf16.mxu1 %v5868_v39 }
  0x7a   : > { %v4850_v27 = vcombine.low %v826_v23, %v829_v26  ;;  %v602_v23 = vrot.slane %v601_v28, 4  ;;  %v722_v26 = vld [vmem:[%s6009_s22 + $0x60] sm:$0xe]  ;;  %v1151_v56 = vshrl.u32 %v6648_v43, 16  ;;  %v4868_v58 = vcombine.low %v6645_v46, %v6648_v43 }
  0x7b   : > { %v612_v21 = vrot.slane %v611_v13, 4  ;;  %v833_v20 = vsel %vm6245_vm5, %v4643_v60, %v832_v1  ;;  %v834_v42 = vrot.slane %v832_v1, 4  ;;  %v4716_v28 = vrot.slane %v4700_v44, 9  ;;  %v5869_v60 = vld [vmem:[%s8159_s1 + $0x188] sm:$0xff]  }
  0x7c   : > { %v607_v62 = vsel %vm6051_vm2, %v602_v23, %v606_v33  ;;  %v965_v33 = vshll.u32 %v4684_v19, 16  ;;  %v1398_v13 = vrot.slane %v4684_v19, 5  ;;  %v6684_v23 = vld [vmem:[%s6009_s22 + $0x78] sm:$0xf]  ;;  %5565 = vmatpush3.bf16.msra.mxu1 %v5869_v60 }
  0x7d   : > { %3559 = vmatmul.mubr.bf16.gmra.mxu1 %v4850_v27  ;;  %v617_v49 = vsel %vm6051_vm2, %v612_v21, %v616_v54  ;;  %v836_v46 = vsel %vm6245_vm5, %v834_v42, %v835_v16  ;;  %v1395_v21 = vrot.slane %v6296_v61, 5  ;;  %v4644_v54 = vrot.slane %v722_v26, 9 }
  0x7e   : > { %3566 = vmatprep.mubr.bf16.mxu1 %v4867_v8  ;;  %v4839_v27 = vcombine.low %v607_v62, %v617_v49  ;;  %v6675_v8 = vrot.slane %v1141_v3, 5  ;;  %v4851_v44 = vcombine.low %v833_v20, %v836_v46  ;;  %v967_v1 = vrot.slane %v965_v33, 5  ;;  %v6692_v62 = vld [vmem:[%s6009_s22 + $0x7c] sm:$0xf]  ;;  %v4701_v49 = vld [vmem:[%s6009_s22 + $0x18] sm:$0xe] }
  0x7f   : > { %3430 = vmatmul.mubr.bf16.gmra.mxu0 %v4822_v36  ;;  %v6673_v36 = vrot.slane %v1138_v52, 4  ;;  %v839_v52 = vrot.slane %v6467_v9, 5  ;;  %v842_v16 = vrot.slane %v6475_v48, 5  ;;  %v1396_v61 = vsel %vm6245_vm5, %v4716_v28, %v1395_v21  ;;  %v5873_v9 = vld [vmem:[%s8159_s1 + $0x1c0] sm:$0xff]   ;;  %v723_v28 = vld [vmem:[%s6009_s22 + $0x6c] sm:$0xe] }
  0x80   : > { %3437 = vmatprep.mubr.bf16.mxu0 %v4839_v27  ;;  %v1397_v19 = vrot.slane %v1395_v21, 4  ;;  %v1162_v26 = vshrl.u32 %v6684_v23, 16  ;;  %v1165_v3 = vshll.u32 %v6684_v23, 16  ;;  %v968_v42 = vsel %vm6051_vm2, %v6346_v57, %v967_v1  ;;  %v4685_v33 = vld [vmem:[%s6009_s22 + $0x20] sm:$0x1]  ;;  %5566 = vmatprep.subr.bf16.mxu1 %v5873_v9 }
  0x81   : > { %v840_v48 = vsel %vm6245_vm5, %v4644_v54, %v839_v52  ;;  %v841_v20 = vrot.slane %v839_v52, 4  ;;  %v1175_v27 = vshrl.u32 %v6692_v62, 16  ;;  %v8168_v46 = vsel %vm6051_vm2, %v6339_v50, %v6307_v24  ;;  %v5874_v24 = vld [vmem:[%s8159_s1 + $0x180] sm:$0xff]  }
  0x82   : > { %v1399_v39 = vsel %vm6245_vm5, %v1397_v19, %v1398_v13  ;;  %v4876_v21 = vcombine.low %v8168_v46, %v968_v42  ;;  %v6717_v54 = vrot.slane %v1162_v26, 4  ;;  %v6719_v60 = vrot.slane %v1165_v3, 5  ;;  %v6730_v19 = vld [vmem:[%s6009_s22 + $0x84] sm:$0xf]  ;;  %5567 = vmatpush3.bf16.msra.mxu1 %v5874_v24 }
  0x83   : > { %v4892_v57 = vcombine.low %v1396_v61, %v1399_v39  ;;  %v4869_v13 = vcombine.low %v6684_v23, %v6692_v62  ;;  %v4717_v1 = vrot.slane %v4701_v49, 9  ;;  %v1402_v52 = vrot.slane %v6332_v45, 5  ;;  %v6739_v49 = vld [vmem:[%s6009_s22 + $0x88] sm:$0xf] }
  0x84   : > { %v849_v61 = vrot.slane %v6518_v4, 5  ;;  %v8169_v23 = vor.u32 %v6363_v15, %v6361_v14  ;;  %v979_v3 = vshll.u32 %v6332_v45, 16  ;;  %v4702_v4 = vld [vmem:[%s6009_s22 + $0x24] sm:$0xe]  ;;  %v1186_v46 = vshrl.u32 %v6730_v19, 16 }
  0x85   : > { %3567 = vmatmul.mubr.bf16.gmra.mxu1 %v4851_v44  ;;  %v843_v44 = vsel %vm6245_vm5, %v841_v20, %v842_v16  ;;  %v846_v16 = vrot.slane %v6512_v32, 5  ;;  %v1403_v9 = vsel %vm6245_vm5, %v4717_v1, %v1402_v52  ;;  %v8170_v20 = vshrl.u32 %v6332_v45, 16 }
  0x86   : > { %3574 = vmatprep.mubr.bf16.mxu1 %v4868_v58  ;;  %v4852_v50 = vcombine.low %v840_v48, %v843_v44  ;;  %v4645_v58 = vrot.slane %v723_v28, 9  ;;  %v977_v26 = vrot.slane %v8169_v23, 4  ;;  %v1404_v48 = vrot.slane %v1402_v52, 4  ;;  %v4686_v28 = vld [vmem:[%s6009_s22 + $0x2c] sm:$0x1]  ;;  %v5865_v23 = vld [vmem:[%s8159_s1 + $0x230] sm:$0xff]  }
  0x87   : > { %3438 = vmatmul.mubr.bf16.gmra.mxu0 %v4823_v55  ;;  %v1405_v55 = vrot.slane %v4685_v33, 5  ;;  %v985_v42 = vrot.slane %v8170_v20, 4  ;;  %v989_v32 = vshll.u32 %v4685_v33, 16  ;;  %v848_v15 = vrot.slane %v846_v16, 4 }
  0x88   : > { %3671 = vmatprep.mubr.bf16.mxu0 %v4892_v57  ;;  %v847_v14 = vsel %vm6245_vm5, %v4645_v58, %v846_v16  ;;  %v981_v39 = vrot.slane %v979_v3, 5  ;;  %v1189_v1 = vshll.u32 %v6730_v19, 16  ;;  %v1199_v45 = vshrl.u32 %v6739_v49, 16  ;;  %v724_v16 = vld [vmem:[%s6009_s22 + $0x78] sm:$0xe] }
  0x89   : > { %v1406_v57 = vsel %vm6245_vm5, %v1404_v48, %v1405_v55  ;;  %v991_v44 = vrot.slane %v989_v32, 5  ;;  %v850_v33 = vsel %vm6245_vm5, %v848_v15, %v849_v61  ;;  %v6762_v3 = vrot.slane %v1186_v46, 4  ;;  %v6783_v15 = vld [vmem:[%s6009_s22 + $0x90] sm:$0xf] }
  0x8a   : > { %v4893_v24 = vcombine.low %v1403_v9, %v1406_v57  ;;  %v982_v52 = vsel %vm6051_vm2, %v977_v26, %v981_v39  ;;  %v986_v58 = vor.u32 %v985_v42, %v981_v39  ;;  %v4853_v55 = vcombine.low %v847_v14, %v850_v33  ;;  %v4687_v57 = vld [vmem:[%s6009_s22 + $0x38] sm:$0x1] }
  0x8b   : > { %v6764_v48 = vrot.slane %v1189_v1, 5  ;;  %v4870_v9 = vcombine.low %v6730_v19, %v6739_v49  ;;  %v4718_v26 = vrot.slane %v4702_v4, 9  ;;  %v1409_v20 = vrot.slane %v6396_v38, 5 }
  0x8c   : > { %v987_v61 = vrot.slane %v986_v58, 4  ;;  %v1412_v42 = vrot.slane %v4686_v28, 5  ;;  %v853_v32 = vrot.slane %v6555_v35, 5  ;;  %v856_v14 = vrot.slane %v6562_v63, 5  ;;  %v6786_v63 = vld [vmem:[%s6009_s22 + $0x94] sm:$0xf] }
  0x8d   : > { %3575 = vmatmul.mubr.bf16.gmra.mxu1 %v4852_v50  ;;  %v4646_v50 = vrot.slane %v724_v16, 9  ;;  %v1411_v4 = vrot.slane %v1409_v20, 4  ;;  %v1003_v35 = vshll.u32 %v6396_v38, 16  ;;  %v8171_v33 = vshrl.u32 %v6396_v38, 16  ;;  %v5875_v38 = vld [vmem:[%s8159_s1 + $0x220] sm:$0xff]  }
  0x8e   : > { %3582 = vmatprep.mubr.bf16.mxu1 %v4869_v13  ;;  %v5870_v13 = vld [vmem:[%s8159_s1 + $0x228] sm:$0xff]   ;;  %v992_v19 = vsel %vm6051_vm2, %v987_v61, %v991_v44  ;;  %v855_v39 = vrot.slane %v853_v32, 4  ;;  %v4703_v44 = vld [vmem:[%s6009_s22 + $0x30] sm:$0xe]  ;;  %v1013_v16 = vshll.u32 %v4686_v28, 16 }
  0x8f   : > { %3672 = vmatmul.mubr.bf16.vlgmr.msra.gmra.mxu0 %v4876_v21  ;;  %v1000_v21 = vor.u32 %v6416_v7, %v6408_v2  ;;  %v4877_v2 = vcombine.low %v982_v52, %v992_v19  ;;  %v6790_v7 = vsel %vm6245_vm5, %v4646_v50, %v853_v32  ;;  %v1413_v1 = vsel %vm6245_vm5, %v1411_v4, %v1412_v42  ;;  %v725_v61 = vld [vmem:[%s6009_s22 + $0x84] sm:$0xe] }
  0x90   : > { %5689 = vmatpush3.bf16.msra.mxu0 %v6622_v5  ;;  %3679 = vmatprep.mubr.bf16.mxu0 %v4893_v24  ;;  %v1410_v5 = vsel %vm6245_vm5, %v4718_v26, %v1409_v20  ;;  %v1005_v24 = vrot.slane %v1003_v35, 5  ;;  %v1009_v58 = vrot.slane %v8171_v33, 4  ;;  %v857_v52 = vsel %vm6245_vm5, %v855_v39, %v856_v14  ;;  %v6834_v33 = vld [vmem:[%s6009_s22 + $0x9c] sm:$0xf] }
  0x91   : > { %5690 = vmatprep.subr.bf16.mxu0 %v5865_v23  ;;  %v1001_v46 = vrot.slane %v1000_v21, 4  ;;  %v4894_v26 = vcombine.low %v1410_v5, %v1413_v1  ;;  %v1210_v20 = vshrl.u32 %v6783_v15, 16  ;;  %v1213_v50 = vshll.u32 %v6783_v15, 16 }
  0x92   : > { %v4854_v32 = vcombine.low %v6790_v7, %v857_v52  ;;  %v1010_v21 = vor.u32 %v1009_v58, %v1005_v24  ;;  %v1015_v19 = vrot.slane %v1013_v16, 5  ;;  %v1223_v14 = vshrl.u32 %v6786_v63, 16  ;;  %v6837_v58 = vld [vmem:[%s6009_s22 + $0xa0] sm:$0xf] }
  0x93   : > { %v1006_v42 = vsel %vm6051_vm2, %v1001_v46, %v1005_v24  ;;  %v6809_v28 = vrot.slane %v1210_v20, 4  ;;  %v4871_v5 = vcombine.low %v6783_v15, %v6786_v63  ;;  %v4719_v35 = vrot.slane %v4703_v44, 9 }
  0x94   : > { %5691 = vmatpush3.bf16.msra.mxu0 %v5865_v23  ;;  %v6811_v23 = vrot.slane %v1213_v50, 5  ;;  %v1011_v4 = vrot.slane %v1010_v21, 4  ;;  %v1416_v7 = vrot.slane %v6453_v12, 5  ;;  %v1419_v39 = vrot.slane %v4687_v57, 5  ;;  %v4688_v50 = vld [vmem:[%s6009_s22 + $0x44] sm:$0x1] }
  0x95   : > { %5692 = vmatprep.subr.bf16.mxu0 %v5870_v13  ;;  %3583 = vmatmul.mubr.bf16.gmra.mxu1 %v4853_v55  ;;  %v4647_v46 = vrot.slane %v725_v61, 9  ;;  %v860_v55 = vrot.slane %v6597_v40, 5  ;;  %v863_v1 = vrot.slane %v6604_v25, 5  ;;  %v1024_v24 = vor.u32 %v6471_v11, %v6469_v10  ;;  %v5878_v40 = vld [vmem:[%s8159_s1 + $0x218] sm:$0xff]  }
  0x96   : > { %3590 = vmatprep.mubr.bf16.mxu1 %v4870_v9  ;;  %v1016_v9 = vsel %vm6051_vm2, %v1011_v4, %v1015_v19  ;;  %v1417_v15 = vsel %vm6245_vm5, %v4719_v35, %v1416_v7  ;;  %v1027_v44 = vshll.u32 %v6453_v12, 16  ;;  %v1037_v20 = vshll.u32 %v4687_v57, 16  ;;  %v4704_v35 = vld [vmem:[%s6009_s22 + $0x3c] sm:$0xe]  ;;  %v5881_v57 = vld [vmem:[%s8159_s1 + $0x210] sm:$0xff]  }
  0x97   : > { %3680 = vmatmul.mubr.bf16.gmra.mxu0 %v4877_v2  ;;  %v1418_v2 = vrot.slane %v1416_v7, 4  ;;  %v4878_v25 = vcombine.low %v1006_v42, %v1016_v9  ;;  %v6831_v10 = vsel %vm6245_vm5, %v4647_v46, %v860_v55  ;;  %v862_v11 = vrot.slane %v860_v55, 4  ;;  %v726_v7 = vld [vmem:[%s6009_s22 + $0x90] sm:$0xe] }
  0x98   : > { %3687 = vmatprep.mubr.bf16.mxu0 %v4894_v26  ;;  %5693 = vmatpush3.bf16.msra.mxu0 %v5870_v13  ;;  %v1025_v13 = vrot.slane %v1024_v24, 4  ;;  %v1029_v61 = vrot.slane %v1027_v44, 5  ;;  %v8172_v26 = vshrl.u32 %v6453_v12, 16  ;;  %v1234_v19 = vshrl.u32 %v6834_v33, 16 }
  0x99   : > { %5694 = vmatprep.subr.bf16.mxu0 %v5875_v38  ;;  %v1420_v16 = vsel %vm6245_vm5, %v1418_v2, %v1419_v39  ;;  %v864_v21 = vsel %vm6245_vm5, %v862_v11, %v863_v1  ;;  %v1237_v4 = vshll.u32 %v6834_v33, 16  ;;  %v1039_v55 = vrot.slane %v1037_v20, 5  ;;  %v5884_v20 = vld [vmem:[%s8159_s1 + $0x208] sm:$0xff]  }
  0x9a   : > { %v1033_v52 = vrot.slane %v8172_v26, 4  ;;  %v4895_v42 = vcombine.low %v1417_v15, %v1420_v16  ;;  %v4855_v46 = vcombine.low %v6831_v10, %v864_v21  ;;  %v1030_v39 = vsel %vm6051_vm2, %v1025_v13, %v1029_v61  ;;  %v6882_v21 = vld [vmem:[%s6009_s22 + $0xa8] sm:$0xf] }
  0x9b   : > { %v6856_v1 = vrot.slane %v1234_v19, 4  ;;  %v6858_v24 = vrot.slane %v1237_v4, 5  ;;  %v4872_v9 = vcombine.low %v6834_v33, %v6837_v58  ;;  %v4720_v2 = vrot.slane %v4704_v35, 9  ;;  %v6885_v19 = vld [vmem:[%s6009_s22 + $0xac] sm:$0xf] }
  0x9c   : > { %5695 = vmatpush3.bf16.msra.mxu0 %v5875_v38  ;;  %v1034_v12 = vor.u32 %v1033_v52, %v1029_v61  ;;  %v1247_v38 = vshrl.u32 %v6837_v58, 16  ;;  %v1423_v44 = vrot.slane %v6481_v31, 5  ;;  %v1426_v10 = vrot.slane %v4688_v50, 5 }
  0x9d   : > { %5696 = vmatprep.subr.bf16.mxu0 %v5878_v40  ;;  %3591 = vmatmul.mubr.bf16.gmra.mxu1 %v4854_v32  ;;  %v4648_v11 = vrot.slane %v726_v7, 9  ;;  %v5897_v32 = vld [vmem:[%s6009_s22 + $0x94] sm:$0xf]  ;;  %v1048_v16 = vor.u32 %v6514_v51, %v6507_v18  ;;  %v1051_v61 = vshll.u32 %v6481_v31, 16  ;;  %v8173_v26 = vshrl.u32 %v6481_v31, 16 }
  0x9e   : > { %3598 = vmatprep.mubr.bf16.mxu1 %v4871_v5  ;;  %v1035_v15 = vrot.slane %v1034_v12, 4  ;;  %v867_v13 = vrot.slane %v5897_v32, 5  ;;  %v1425_v33 = vrot.slane %v1423_v44, 4  ;;  %v1061_v35 = vshll.u32 %v4688_v50, 16  ;;  %v4705_v12 = vld [vmem:[%s6009_s22 + $0x48] sm:$0xe] }
  0x9f   : > { %3688 = vmatmul.mubr.bf16.gmra.mxu0 %v4878_v25  ;;  %v1424_v25 = vsel %vm6245_vm5, %v4720_v2, %v1423_v44  ;;  %v1057_v52 = vrot.slane %v8173_v26, 4  ;;  %v1053_v4 = vrot.slane %v1051_v61, 5  ;;  %v1258_v7 = vshrl.u32 %v6882_v21, 16  ;;  %v727_v32 = vld [vmem:[%s6009_s22 + $0x9c] sm:$0xe] }
  0xa0   : > { %3695 = vmatprep.mubr.bf16.mxu0 %v4895_v42  ;;  %5697 = vmatpush3.bf16.msra.mxu0 %v5878_v40  ;;  %v1040_v5 = vsel %vm6051_vm2, %v1035_v15, %v1039_v55  ;;  %v6879_v51 = vsel %vm6245_vm5, %v4648_v11, %v867_v13  ;;  %v869_v40 = vrot.slane %v867_v13, 4  ;;  %v1049_v42 = vrot.slane %v1048_v16, 4  ;;  %v4689_v11 = vld [vmem:[%s6009_s22 + $0x50] sm:$0x1] }
  0xa1   : > { %5698 = vmatprep.subr.bf16.mxu0 %v5881_v57  ;;  %v4879_v18 = vcombine.low %v1030_v39, %v1040_v5  ;;  %v1427_v31 = vsel %vm6245_vm5, %v1425_v33, %v1426_v10  ;;  %v8174_v55 = vrot.slane %v6045_v29, 5  ;;  %v1261_v2 = vshll.u32 %v6882_v21, 16  ;;  %v5887_v29 = vld [vmem:[%s8159_s1 + $0x200] sm:$0xff]  }
  0xa2   : > { %v4896_v39 = vcombine.low %v1424_v25, %v1427_v31  ;;  %v1271_v44 = vshrl.u32 %v6885_v19, 16  ;;  %v1054_v50 = vsel %vm6051_vm2, %v1049_v42, %v1053_v4  ;;  %v1058_v13 = vor.u32 %v1057_v52, %v1053_v4 }
  0xa3   : > { %v871_v15 = vsel %vm6245_vm5, %v869_v40, %v8174_v55  ;;  %v1063_v16 = vrot.slane %v1061_v35, 5  ;;  %v6905_v61 = vrot.slane %v1258_v7, 4  ;;  %v6907_v5 = vrot.slane %v1261_v2, 5  ;;  %v5898_v40 = vld [vmem:[%s6009_s22 + $0xa0] sm:$0xf] }
  0xa4   : > { %5699 = vmatpush3.bf16.msra.mxu0 %v5881_v57  ;;  %v4856_v10 = vcombine.low %v6879_v51, %v871_v15  ;;  %v4873_v57 = vcombine.low %v6882_v21, %v6885_v19  ;;  %v4721_v25 = vrot.slane %v4705_v12, 9  ;;  %v1059_v33 = vrot.slane %v1058_v13, 4  ;;  %v6928_v55 = vld [vmem:[%s6009_s22 + $0xb4] sm:$0xf]  ;;  %v6931_v15 = vld [vmem:[%s6009_s22 + $0xb8] sm:$0xf] }
  0xa5   : > { %5700 = vmatprep.subr.bf16.mxu0 %v5884_v20  ;;  %3599 = vmatmul.mubr.bf16.gmra.mxu1 %v4855_v46  ;;  %v1430_v26 = vrot.slane %v6530_v6, 5  ;;  %v1433_v52 = vrot.slane %v4689_v11, 5  ;;  %v4649_v51 = vrot.slane %v727_v32, 9  ;;  %v874_v42 = vrot.slane %v5898_v40, 5  ;;  %v5899_v46 = vld [vmem:[%s6009_s22 + $0xa4] sm:$0x1] }
  0xa6   : > { %3606 = vmatprep.mubr.bf16.mxu1 %v4872_v9  ;;  %v877_v31 = vrot.slane %v5899_v46, 5  ;;  %v1072_v4 = vor.u32 %v6557_v53, %v6550_v47  ;;  %v1075_v21 = vshll.u32 %v6530_v6, 16  ;;  %v1064_v9 = vsel %vm6051_vm2, %v1059_v33, %v1063_v16  ;;  %v4706_v16 = vld [vmem:[%s6009_s22 + $0x54] sm:$0xe]  ;;  %v728_v40 = vld [vmem:[%s6009_s22 + $0xa8] sm:$0xe] }
  0xa7   : > { %3696 = vmatmul.mubr.bf16.gmra.mxu0 %v4879_v18  ;;  %v1431_v18 = vsel %vm6245_vm5, %v4721_v25, %v1430_v26  ;;  %v1432_v35 = vrot.slane %v1430_v26, 4  ;;  %v8175_v7 = vshrl.u32 %v6530_v6, 16  ;;  %v6925_v47 = vsel %vm6245_vm5, %v4649_v51, %v874_v42  ;;  %v4690_v51 = vld [vmem:[%s6009_s22 + $0x5c] sm:$0x1] }
  0xa8   : > { %3703 = vmatprep.mubr.bf16.mxu0 %v4896_v39  ;;  %5701 = vmatpush3.bf16.msra.mxu0 %v5884_v20  ;;  %v4880_v39 = vcombine.low %v1054_v50, %v1064_v9  ;;  %v876_v53 = vrot.slane %v874_v42, 4  ;;  %v1073_v20 = vrot.slane %v1072_v4, 4  ;;  %v1077_v32 = vrot.slane %v1075_v21, 5 }
  0xa9   : > { %v1081_v12 = vrot.slane %v8175_v7, 4  ;;  %5702 = vmatprep.subr.bf16.mxu0 %v5887_v29  ;;  %v1434_v2 = vsel %vm6245_vm5, %v1432_v35, %v1433_v52  ;;  %v1085_v6 = vshll.u32 %v4689_v11, 16  ;;  %v1282_v13 = vshrl.u32 %v6928_v55, 16 }
  0xaa   : > { %v4897_v50 = vcombine.low %v1431_v18, %v1434_v2  ;;  %v878_v25 = vsel %vm6245_vm5, %v876_v53, %v877_v31  ;;  %v1285_v33 = vshll.u32 %v6928_v55, 16  ;;  %v1295_v26 = vshrl.u32 %v6931_v15, 16 }
  0xab   : > { %v4857_v42 = vcombine.low %v6925_v47, %v878_v25  ;;  %v1078_v11 = vsel %vm6051_vm2, %v1073_v20, %v1077_v32  ;;  %v1082_v52 = vor.u32 %v1081_v12, %v1077_v32  ;;  %v1087_v46 = vrot.slane %v1085_v6, 5  ;;  %v5900_v12 = vld [vmem:[%s6009_s22 + $0xac] sm:$0xf]  ;;  %v5901_v47 = vld [vmem:[%s6009_s22 + $0xb0] sm:$0x1] }
  0xac   : > { %5703 = vmatpush3.bf16.msra.mxu0 %v5887_v29  ;;  %v6946_v4 = vrot.slane %v1282_v13, 4  ;;  %v6948_v31 = vrot.slane %v1285_v33, 5  ;;  %v4874_v21 = vcombine.low %v6928_v55, %v6931_v15  ;;  %v4722_v9 = vrot.slane %v4706_v16, 9  ;;  %v6972_v25 = vld [vmem:[%s6009_s22 + $0xc4] sm:$0xf] }
  0xad   : > { %3607 = vmatmul.mubr.bf16.gmra.mxu1 %v4856_v10  ;;  %v1083_v29 = vrot.slane %v1082_v52, 4  ;;  %v1437_v18 = vrot.slane %v6570_v17, 5  ;;  %v1440_v35 = vrot.slane %v4690_v51, 5  ;;  %v4650_v7 = vrot.slane %v728_v40, 9 }
  0xae   : > { %3614 = vmatprep.mubr.bf16.mxu1 %v4873_v57  ;;  %v881_v10 = vrot.slane %v5900_v12, 5  ;;  %v884_v53 = vrot.slane %v5901_v47, 5  ;;  %v1096_v20 = vor.u32 %v6609_v30, %v6599_v41  ;;  %v1099_v55 = vshll.u32 %v6570_v17, 16  ;;  %v729_v12 = vld [vmem:[%s6009_s22 + $0xb4] sm:$0xe] }
  0xaf   : > { %3704 = vmatmul.mubr.bf16.gmra.mxu0 %v4880_v39  ;;  %v1088_v57 = vsel %vm6051_vm2, %v1083_v29, %v1087_v46  ;;  %v1438_v39 = vsel %vm6245_vm5, %v4722_v9, %v1437_v18  ;;  %v1439_v2 = vrot.slane %v1437_v18, 4  ;;  %v8176_v32 = vshrl.u32 %v6570_v17, 16  ;;  %v4707_v46 = vld [vmem:[%s6009_s22 + $0x60] sm:$0xe] }
  0xb0   : > { %3711 = vmatprep.mubr.bf16.mxu0 %v4897_v50  ;;  %v4881_v13 = vcombine.low %v1078_v11, %v1088_v57  ;;  %v6966_v16 = vsel %vm6245_vm5, %v4650_v7, %v881_v10  ;;  %v883_v41 = vrot.slane %v881_v10, 4  ;;  %v1097_v30 = vrot.slane %v1096_v20, 4  ;;  %v6969_v50 = vld [vmem:[%s6009_s22 + $0xc0] sm:$0xf]  ;;  %v4691_v7 = vld [vmem:[%s6009_s22 + $0x68] sm:$0x1] }
  0xb1   : > { %v1105_v6 = vrot.slane %v8176_v32, 4  ;;  %v1441_v33 = vsel %vm6245_vm5, %v1439_v2, %v1440_v35  ;;  %v1101_v40 = vrot.slane %v1099_v55, 5  ;;  %v1109_v52 = vshll.u32 %v4690_v51, 16 }
  0xb2   : > { %v1306_v17 = vshrl.u32 %v6969_v50, 16  ;;  %v4898_v11 = vcombine.low %v1438_v39, %v1441_v33  ;;  %v885_v9 = vsel %vm6245_vm5, %v883_v41, %v884_v53  ;;  %v1309_v29 = vshll.u32 %v6969_v50, 16  ;;  %v5902_v41 = vld [vmem:[%s6009_s22 + $0xb8] sm:$0xf] }
  0xb3   : > { %v1319_v18 = vshrl.u32 %v6972_v25, 16  ;;  %v4858_v10 = vcombine.low %v6966_v16, %v885_v9  ;;  %v1102_v35 = vsel %vm6051_vm2, %v1097_v30, %v1101_v40  ;;  %v1106_v51 = vor.u32 %v1105_v6, %v1101_v40  ;;  %v4708_v6 = vld [vmem:[%s6009_s22 + $0x6c] sm:$0xe]  ;;  %v5903_v30 = vld [vmem:[%s6009_s22 + $0xbc] sm:$0x1] }
  0xb4   : > { %v1111_v47 = vrot.slane %v1109_v52, 5  ;;  %v6987_v20 = vrot.slane %v1306_v17, 4  ;;  %v6989_v53 = vrot.slane %v1309_v29, 5  ;;  %v4875_v55 = vcombine.low %v6969_v50, %v6972_v25 }
  0xb5   : > { %3615 = vmatmul.mubr.bf16.gmra.mxu1 %v4857_v42  ;;  %v4723_v57 = vrot.slane %v4707_v46, 9  ;;  %v1107_v39 = vrot.slane %v1106_v51, 4  ;;  %v1444_v2 = vrot.slane %v6630_v0, 5  ;;  %v1447_v32 = vrot.slane %v4691_v7, 5 }
  0xb6   : > { %3622 = vmatprep.mubr.bf16.mxu1 %v4874_v21  ;;  %v4651_v16 = vrot.slane %v729_v12, 9  ;;  %v888_v42 = vrot.slane %v5902_v41, 5  ;;  %v891_v33 = vrot.slane %v5903_v30, 5  ;;  %v1120_v40 = vor.u32 %v6655_v37, %v6650_v59  ;;  %v7018_v30 = vld [vmem:[%s6009_s22 + $0x1c] sm:$0xf] }
  0xb7   : > { %3712 = vmatmul.mubr.bf16.gmra.mxu0 %v4881_v13  ;;  %v1123_v50 = vshll.u32 %v6630_v0, 16  ;;  %v1112_v21 = vsel %vm6051_vm2, %v1107_v39, %v1111_v47  ;;  %v1445_v13 = vsel %vm6245_vm5, %v4723_v57, %v1444_v2  ;;  %v1446_v52 = vrot.slane %v1444_v2, 4  ;;  %v7012_v57 = vld [vmem:[%s6009_s22 + $0x18] sm:$0xf] }
  0xb8   : > { %3719 = vmatprep.mubr.bf16.mxu0 %v4898_v11  ;;  %v8177_v17 = vshrl.u32 %v6630_v0, 16  ;;  %v4692_v11 = vld [vmem:[%s6009_s22 + $0x74] sm:$0x1]  ;;  %v4882_v9 = vcombine.low %v1102_v35, %v1112_v21  ;;  %v889_v29 = vsel %vm6245_vm5, %v4651_v16, %v888_v42  ;;  %v890_v59 = vrot.slane %v888_v42, 4  ;;  %v7021_v16 = vld [vmem:[%s6009_s22 + $0x20] sm:$0x1] }
  0xb9   : > { %v1121_v37 = vrot.slane %v1120_v40, 4  ;;  %v1448_v12 = vsel %vm6245_vm5, %v1446_v52, %v1447_v32  ;;  %v1125_v51 = vrot.slane %v1123_v50, 5  ;;  %v1133_v47 = vshll.u32 %v4691_v7, 16 }
  0xba   : > { %v1129_v46 = vrot.slane %v8177_v17, 4  ;;  %v4724_v39 = vrot.slane %v4708_v6, 9  ;;  %v4899_v2 = vcombine.low %v1445_v13, %v1448_v12  ;;  %v892_v0 = vsel %vm6245_vm5, %v890_v59, %v891_v33 }
  0xbb   : > { %v1451_v41 = vrot.slane %v6648_v43, 5  ;;  %v1454_v35 = vrot.slane %v4692_v11, 5  ;;  %v4859_v42 = vcombine.low %v889_v29, %v892_v0  ;;  %v1126_v32 = vsel %vm6051_vm2, %v1121_v37, %v1125_v51 }
  0xbc   : > { %v1130_v40 = vor.u32 %v1129_v46, %v1125_v51  ;;  %v1135_v7 = vrot.slane %v1133_v47, 5  ;;  %v1558_v33 = vshrl.u32 %v7012_v57, 16  ;;  %v1561_v21 = vshll.u32 %v7012_v57, 16  ;;  %v4709_v47 = vld [vmem:[%s6009_s22 + $0x78] sm:$0xe] }
  0xbd   : > { %3623 = vmatmul.mubr.bf16.gmra.mxu1 %v4858_v10  ;;  %v1452_v6 = vsel %vm6245_vm5, %v4724_v39, %v1451_v41  ;;  %v1453_v50 = vrot.slane %v1451_v41, 4  ;;  %v1567_v52 = vshll.u32 %v7018_v30, 16  ;;  %v1571_v17 = vshrl.u32 %v7018_v30, 16 }
  0xbe   : > { %3630 = vmatprep.mubr.bf16.mxu1 %v4875_v55  ;;  %v1131_v13 = vrot.slane %v1130_v40, 4  ;;  %v1577_v46 = vshll.u32 %v7021_v16, 16  ;;  %v1560_v29 = vrot.slane %v1558_v33, 4  ;;  %v1563_v59 = vrot.slane %v1561_v21, 5  ;;  %v7040_v40 = vld [vmem:[%s6009_s22 + $0x80] sm:$0x1] }
  0xbf   : > { %3720 = vmatmul.mubr.bf16.gmra.mxu0 %v4882_v9  ;;  %v1455_v10 = vsel %vm6245_vm5, %v1453_v50, %v1454_v35  ;;  %v1144_v37 = vor.u32 %v6675_v8, %v6673_v36  ;;  %v1569_v12 = vrot.slane %v1567_v52, 5  ;;  %v1573_v51 = vrot.slane %v1571_v17, 4  ;;  %v7046_v33 = vld [vmem:[%s6009_s22 + $0x24] sm:$0xf] }
  0xc0   : > { %3727 = vmatprep.mubr.bf16.mxu0 %v4899_v2  ;;  %v1136_v55 = vsel %vm6051_vm2, %v1131_v13, %v1135_v7  ;;  %v4900_v9 = vcombine.low %v1452_v6, %v1455_v10  ;;  %v1564_v0 = vor.u32 %v1563_v59, %v1560_v29  ;;  %v1579_v41 = vrot.slane %v1577_v46, 5  ;;  %v7053_v10 = vld [vmem:[%s6009_s22 + $0x28] sm:$0xf] }
  0xc1   : > { %v4883_v39 = vcombine.low %v1126_v32, %v1136_v55  ;;  %v1145_v2 = vrot.slane %v1144_v37, 4  ;;  %v1574_v35 = vor.u32 %v1573_v51, %v1569_v12  ;;  %v1147_v50 = vshll.u32 %v6648_v43, 16  ;;  %v4765_v55 = vld [vmem:[%s6009_s22 + $0x2c] sm:$0x1] }
  0xc2   : > { %v1153_v36 = vrot.slane %v1151_v56, 4  ;;  %v1157_v8 = vshll.u32 %v4692_v11, 16  ;;  %v1565_v7 = vrot.slane %v1564_v0, 4  ;;  %v4908_v6 = vcombine.low %v7012_v57, %v7018_v30 }
  0xc3   : > { %v4725_v32 = vrot.slane %v4709_v47, 9  ;;  %v1458_v21 = vrot.slane %v6692_v62, 5  ;;  %v1575_v13 = vrot.slane %v1574_v35, 4  ;;  %v1149_v52 = vrot.slane %v1147_v50, 5 }
  0xc4   : > { %v1159_v17 = vrot.slane %v1157_v8, 5  ;;  %v1461_v46 = vrot.slane %v7040_v40, 5  ;;  %v1570_v43 = vsel %vm6051_vm2, %v1565_v7, %v1569_v12  ;;  %v1582_v57 = vshrl.u32 %v7046_v33, 16 }
  0xc5   : > { %3631 = vmatmul.mubr.bf16.gmra.mxu1 %v4859_v42  ;;  %v1459_v56 = vsel %vm6245_vm5, %v4725_v32, %v1458_v21  ;;  %v1460_v11 = vrot.slane %v1458_v21, 4  ;;  %v1580_v29 = vsel %vm6051_vm2, %v1575_v13, %v1579_v41  ;;  %v1150_v59 = vsel %vm6051_vm2, %v1145_v2, %v1149_v52 }
  0xc6   : > { %v1154_v37 = vor.u32 %v1153_v36, %v1149_v52  ;;  %v1585_v42 = vshll.u32 %v7046_v33, 16  ;;  %v4924_v51 = vcombine.low %v1570_v43, %v1580_v29  ;;  %v1584_v47 = vrot.slane %v1582_v57, 4 }
  0xc7   : > { %3728 = vmatmul.mubr.bf16.gmra.mxu0 %v4883_v39  ;;  %v1462_v12 = vsel %vm6245_vm5, %v1460_v11, %v1461_v46  ;;  %v1591_v0 = vshll.u32 %v7053_v10, 16  ;;  %v1595_v41 = vshrl.u32 %v7053_v10, 16  ;;  %v1601_v36 = vshll.u32 %v4765_v55, 16  ;;  %v4710_v11 = vld [vmem:[%s6009_s22 + $0x84] sm:$0xe] }
  0xc8   : > { %3735 = vmatprep.mubr.bf16.mxu0 %v4900_v9  ;;  %v1155_v35 = vrot.slane %v1154_v37, 4  ;;  %v4901_v39 = vcombine.low %v1459_v56, %v1462_v12  ;;  %v1587_v50 = vrot.slane %v1585_v42, 5  ;;  %3832 = vmatprep.mubr.bf16.mxu1 %v4924_v51  ;;  %v2014_v8 = vrot.slane %v7053_v10, 5  ;;  %v7090_v51 = vld [vmem:[%s6009_s22 + $0x30] sm:$0xf] }
  0xc9   : > { %v1593_v2 = vrot.slane %v1591_v0, 5  ;;  %v2017_v9 = vrot.slane %v4765_v55, 5  ;;  %v1597_v21 = vrot.slane %v1595_v41, 4  ;;  %v1168_v13 = vor.u32 %v6719_v60, %v6717_v54  ;;  %v4694_v55 = vld [vmem:[%s6009_s22 + $0x8c] sm:$0x1] }
  0xca   : > { %v1160_v7 = vsel %vm6051_vm2, %v1155_v35, %v1159_v17  ;;  %v1588_v32 = vor.u32 %v1587_v50, %v1584_v47  ;;  %v1603_v46 = vrot.slane %v1601_v36, 5  ;;  %v2016_v43 = vrot.slane %v2014_v8, 4  ;;  %v7096_v47 = vld [vmem:[%s6009_s22 + $0x34] sm:$0xf] }
  0xcb   : > { %v4884_v52 = vcombine.low %v1150_v59, %v1160_v7  ;;  %v1171_v56 = vshll.u32 %v6692_v62, 16  ;;  %v1598_v29 = vor.u32 %v1597_v21, %v1593_v2  ;;  %v1169_v37 = vrot.slane %v1168_v13, 4 }
  0xcc   : > { %v1589_v57 = vrot.slane %v1588_v32, 4  ;;  %v1177_v17 = vrot.slane %v1175_v27, 4  ;;  %v7084_v54 = vsel %vm6245_vm5, %v2016_v43, %v2017_v9  ;;  %v1181_v59 = vshll.u32 %v7040_v40, 16 }
  0xcd   : > { %3833 = vmatmul.mubr.bf16.vlgmr.msra.gmra.mxu1 %v4908_v6  ;;  %v1173_v60 = vrot.slane %v1171_v56, 5  ;;  %v4909_v42 = vcombine.low %v7046_v33, %v7053_v10  ;;  %v1599_v27 = vrot.slane %v1598_v29, 4  ;;  %v4726_v12 = vrot.slane %v4710_v11, 9  ;;  %v7101_v33 = vld [vmem:[%s6009_s22 + $0x38] sm:$0x1] }
  0xce   : > { %v1594_v62 = vsel %vm6051_vm2, %v1589_v57, %v1593_v2  ;;  %v1465_v6 = vrot.slane %v6739_v49, 5  ;;  %v1183_v35 = vrot.slane %v1181_v59, 5  ;;  %v1468_v50 = vrot.slane %v4694_v55, 5 }
  0xcf   : > { %3736 = vmatmul.mubr.bf16.gmra.mxu0 %v4884_v52  ;;  %v1174_v0 = vsel %vm6051_vm2, %v1169_v37, %v1173_v60  ;;  %v1178_v40 = vor.u32 %v1177_v17, %v1173_v60  ;;  %v1604_v41 = vsel %vm6051_vm2, %v1599_v27, %v1603_v46  ;;  %v1606_v9 = vshrl.u32 %v7090_v51, 16  ;;  %v4711_v37 = vld [vmem:[%s6009_s22 + $0x90] sm:$0xe]  ;;  %v7120_v27 = vld [vmem:[%s6009_s22 + $0x98] sm:$0x1] }
  0xd0   : > { %3743 = vmatprep.mubr.bf16.mxu0 %v4901_v39  ;;  %v1466_v2 = vsel %vm6245_vm5, %v4726_v12, %v1465_v6  ;;  %v1467_v36 = vrot.slane %v1465_v6, 4  ;;  %v4925_v7 = vcombine.low %v1594_v62, %v1604_v41  ;;  %v1609_v32 = vshll.u32 %v7090_v51, 16 }
  0xd1   : > { %v1179_v39 = vrot.slane %v1178_v40, 4  ;;  %v1615_v21 = vshll.u32 %v7096_v47, 16  ;;  %v1608_v52 = vrot.slane %v1606_v9, 4  ;;  %v1619_v46 = vshrl.u32 %v7096_v47, 16 }
  0xd2   : > { %v1469_v13 = vsel %vm6245_vm5, %v1467_v36, %v1468_v50  ;;  %v1625_v43 = vshll.u32 %v7101_v33, 16  ;;  %3840 = vmatprep.mubr.bf16.mxu1 %v4925_v7  ;;  %v1611_v57 = vrot.slane %v1609_v32, 5  ;;  %v1192_v62 = vor.u32 %v6764_v48, %v6762_v3  ;;  %v7126_v50 = vld [vmem:[%s6009_s22 + $0x3c] sm:$0xf] }
  0xd3   : > { %v1184_v56 = vsel %vm6051_vm2, %v1179_v39, %v1183_v35  ;;  %v4902_v11 = vcombine.low %v1466_v2, %v1469_v13  ;;  %v1617_v29 = vrot.slane %v1615_v21, 5  ;;  %v1621_v60 = vrot.slane %v1619_v46, 4 }
  0xd4   : > { %v4885_v17 = vcombine.low %v1174_v0, %v1184_v56  ;;  %v1627_v59 = vrot.slane %v1625_v43, 5  ;;  %v1612_v12 = vor.u32 %v1611_v57, %v1608_v52  ;;  %v1195_v6 = vshll.u32 %v6739_v49, 16  ;;  %v7144_v52 = vld [vmem:[%s6009_s22 + $0x44] sm:$0x1] }
  0xd5   : > { %3841 = vmatmul.mubr.bf16.gmra.mxu1 %v4909_v42  ;;  %v1201_v40 = vrot.slane %v1199_v45, 4  ;;  %v1205_v35 = vshll.u32 %v4694_v55, 16  ;;  %v1622_v0 = vor.u32 %v1621_v60, %v1617_v29  ;;  %v1193_v41 = vrot.slane %v1192_v62, 4  ;;  %v7133_v55 = vld [vmem:[%s6009_s22 + $0x40] sm:$0xf] }
  0xd6   : > { %v4910_v2 = vcombine.low %v7090_v51, %v7096_v47  ;;  %v4727_v3 = vrot.slane %v4711_v37, 9  ;;  %v1613_v48 = vrot.slane %v1612_v12, 4  ;;  %v1197_v42 = vrot.slane %v1195_v6, 5 }
  0xd7   : > { %3744 = vmatmul.mubr.bf16.gmra.mxu0 %v4885_v17  ;;  %v1207_v36 = vrot.slane %v1205_v35, 5  ;;  %v1472_v9 = vrot.slane %v6786_v63, 5  ;;  %v1623_v49 = vrot.slane %v1622_v0, 4  ;;  %v1475_v45 = vrot.slane %v7120_v27, 5 }
  0xd8   : > { %3751 = vmatprep.mubr.bf16.mxu0 %v4902_v11  ;;  %v1630_v7 = vshrl.u32 %v7126_v50, 16  ;;  %v1633_v39 = vshll.u32 %v7126_v50, 16  ;;  %v1618_v51 = vsel %vm6051_vm2, %v1613_v48, %v1617_v29  ;;  %v1198_v32 = vsel %vm6051_vm2, %v1193_v41, %v1197_v42  ;;  %v4712_v41 = vld [vmem:[%s6009_s22 + $0x9c] sm:$0xe] }
  0xd9   : > { %v1202_v21 = vor.u32 %v1201_v40, %v1197_v42  ;;  %v1473_v13 = vsel %vm6245_vm5, %v4727_v3, %v1472_v9  ;;  %v1628_v46 = vsel %vm6051_vm2, %v1623_v49, %v1627_v59  ;;  %v1474_v43 = vrot.slane %v1472_v9, 4  ;;  %v7160_v49 = vld [vmem:[%s6009_s22 + $0xa4] sm:$0x1] }
  0xda   : > { %v1632_v56 = vrot.slane %v1630_v7, 4  ;;  %v1635_v11 = vrot.slane %v1633_v39, 5  ;;  %v4926_v57 = vcombine.low %v1618_v51, %v1628_v46  ;;  %v1639_v29 = vshll.u32 %v7133_v55, 16 }
  0xdb   : > { %v1203_v37 = vrot.slane %v1202_v21, 4  ;;  %v1643_v17 = vshrl.u32 %v7133_v55, 16  ;;  %v1476_v60 = vsel %vm6245_vm5, %v1474_v43, %v1475_v45  ;;  %v1649_v12 = vshll.u32 %v7144_v52, 16  ;;  %v7163_v45 = vld [vmem:[%s6009_s22 + $0x48] sm:$0xf] }
  0xdc   : > { %v1636_v62 = vor.u32 %v1635_v11, %v1632_v56  ;;  %3848 = vmatprep.mubr.bf16.mxu1 %v4926_v57  ;;  %v4903_v40 = vcombine.low %v1473_v13, %v1476_v60  ;;  %v1641_v35 = vrot.slane %v1639_v29, 5  ;;  %v1216_v9 = vor.u32 %v6811_v23, %v6809_v28 }
  0xdd   : > { %v1208_v6 = vsel %vm6051_vm2, %v1203_v37, %v1207_v36  ;;  %v1645_v0 = vrot.slane %v1643_v17, 4  ;;  %3849 = vmatmul.mubr.bf16.gmra.mxu1 %v4910_v2  ;;  %v1651_v42 = vrot.slane %v1649_v12, 5  ;;  %v1219_v36 = vshll.u32 %v6786_v63, 16 }
  0xde   : > { %v4886_v3 = vcombine.low %v1198_v32, %v1208_v6  ;;  %v1637_v48 = vrot.slane %v1636_v62, 4  ;;  %v1225_v39 = vrot.slane %v1223_v14, 4  ;;  %v1229_v51 = vshll.u32 %v7120_v27, 16  ;;  %v7170_v32 = vld [vmem:[%s6009_s22 + $0x4c] sm:$0xf] }
  0xdf   : > { %v1646_v7 = vor.u32 %v1645_v0, %v1641_v35  ;;  %v1217_v28 = vrot.slane %v1216_v9, 4  ;;  %v4911_v23 = vcombine.low %v7126_v50, %v7133_v55  ;;  %v4728_v21 = vrot.slane %v4712_v41, 9  ;;  %v7179_v27 = vld [vmem:[%s6009_s22 + $0x50] sm:$0x1] }
  0xe0   : > { %3752 = vmatmul.mubr.bf16.gmra.mxu0 %v4886_v3  ;;  %v1642_v2 = vsel %vm6051_vm2, %v1637_v48, %v1641_v35  ;;  %v1221_v46 = vrot.slane %v1219_v36, 5  ;;  %v1231_v43 = vrot.slane %v1229_v51, 5  ;;  %v1479_v63 = vrot.slane %v6837_v58, 5 }
  0xe1   : > { %3759 = vmatprep.mubr.bf16.mxu0 %v4903_v40  ;;  %v1647_v13 = vrot.slane %v1646_v7, 4  ;;  %v1482_v14 = vrot.slane %v7160_v49, 5  ;;  %v1654_v56 = vshrl.u32 %v7163_v45, 16  ;;  %v1657_v11 = vshll.u32 %v7163_v45, 16 }
  0xe2   : > { %v1663_v57 = vshll.u32 %v7170_v32, 16  ;;  %v1222_v37 = vsel %vm6051_vm2, %v1217_v28, %v1221_v46  ;;  %v1226_v29 = vor.u32 %v1225_v39, %v1221_v46  ;;  %v1480_v17 = vsel %vm6245_vm5, %v4728_v21, %v1479_v63 }
  0xe3   : > { %v1652_v50 = vsel %vm6051_vm2, %v1647_v13, %v1651_v42  ;;  %v1481_v62 = vrot.slane %v1479_v63, 4  ;;  %v1656_v12 = vrot.slane %v1654_v56, 4  ;;  %v1659_v6 = vrot.slane %v1657_v11, 5  ;;  %v4713_v11 = vld [vmem:[%s6009_s22 + $0xa8] sm:$0xe] }
  0xe4   : > { %v4927_v60 = vcombine.low %v1642_v2, %v1652_v50  ;;  %v1227_v40 = vrot.slane %v1226_v29, 4  ;;  %v1665_v35 = vrot.slane %v1663_v57, 5  ;;  %v1667_v0 = vshrl.u32 %v7170_v32, 16  ;;  %v7206_v29 = vld [vmem:[%s6009_s22 + $0xb0] sm:$0x1] }
  0xe5   : > { %v1673_v41 = vshll.u32 %v7179_v27, 16  ;;  %v1483_v42 = vsel %vm6245_vm5, %v1481_v62, %v1482_v14  ;;  %v1660_v9 = vor.u32 %v1659_v6, %v1656_v12  ;;  %v1240_v7 = vor.u32 %v6858_v24, %v6856_v1 }
  0xe6   : > { %3856 = vmatprep.mubr.bf16.mxu1 %v4927_v60  ;;  %v1243_v36 = vshll.u32 %v6837_v58, 16  ;;  %v1232_v39 = vsel %vm6051_vm2, %v1227_v40, %v1231_v43  ;;  %v4904_v51 = vcombine.low %v1480_v17, %v1483_v42  ;;  %v1669_v2 = vrot.slane %v1667_v0, 4  ;;  %v7220_v0 = vld [vmem:[%s6009_s22 + $0x58] sm:$0xf] }
  0xe7   : > { %3857 = vmatmul.mubr.bf16.gmra.mxu1 %v4911_v23  ;;  %v1675_v28 = vrot.slane %v1673_v41, 5  ;;  %v4887_v46 = vcombine.low %v1222_v37, %v1232_v39  ;;  %v1661_v63 = vrot.slane %v1660_v9, 4  ;;  %v1241_v14 = vrot.slane %v1240_v7, 4  ;;  %v7231_v7 = vld [vmem:[%s6009_s22 + $0x5c] sm:$0x1] }
  0xe8   : > { %v1245_v56 = vrot.slane %v1243_v36, 5  ;;  %v1670_v57 = vor.u32 %v1669_v2, %v1665_v35  ;;  %v1249_v1 = vrot.slane %v1247_v38, 4  ;;  %v1253_v24 = vshll.u32 %v7160_v49, 16  ;;  %v7217_v38 = vld [vmem:[%s6009_s22 + $0x54] sm:$0xf] }
  0xe9   : > { %v4912_v23 = vcombine.low %v7163_v45, %v7170_v32  ;;  %3760 = vmatmul.mubr.bf16.gmra.mxu0 %v4887_v46  ;;  %v1666_v37 = vsel %vm6051_vm2, %v1661_v63, %v1665_v35  ;;  %v4729_v40 = vrot.slane %v4713_v11, 9  ;;  %v1678_v36 = vshrl.u32 %v7217_v38, 16 }
  0xea   : > { %v1246_v17 = vsel %vm6051_vm2, %v1241_v14, %v1245_v56  ;;  %3767 = vmatprep.mubr.bf16.mxu0 %v4904_v51  ;;  %v1671_v49 = vrot.slane %v1670_v57, 4  ;;  %v1250_v45 = vor.u32 %v1249_v1, %v1245_v56  ;;  %v1255_v62 = vrot.slane %v1253_v24, 5 }
  0xeb   : > { %v1681_v39 = vshll.u32 %v7217_v38, 16  ;;  %v1687_v46 = vshll.u32 %v7220_v0, 16  ;;  %v1680_v14 = vrot.slane %v1678_v36, 4  ;;  %v1691_v56 = vshrl.u32 %v7220_v0, 16 }
  0xec   : > { %v1676_v42 = vsel %vm6051_vm2, %v1671_v49, %v1675_v28  ;;  %v1251_v9 = vrot.slane %v1250_v45, 4  ;;  %v4913_v36 = vcombine.low %v7217_v38, %v7220_v0  ;;  %v2007_v59 = vrot.slane %v7018_v30, 5 }
  0xed   : > { %v5232_v3 = vpop.f32.mrf.mxu0  ;;  %v5304_v48 = vpop.f32.mrf.mxu1  ;;  %v4928_v2 = vcombine.low %v1666_v37, %v1676_v42  ;;  %v1683_v28 = vrot.slane %v1681_v39, 5  ;;  %v1689_v24 = vrot.slane %v1687_v46, 5  ;;  %v1693_v45 = vrot.slane %v1691_v56, 4  ;;  %v7260_v46 = vld [vmem:[%s6009_s22 + $0x60] sm:$0xf] }
  0xee   : > { %v1256_v63 = vsel %vm6051_vm2, %v1251_v9, %v1255_v62  ;;  %v1277_v9 = vshll.u32 %v7206_v29, 16 }
  0xef   : > { %v5233_v21 = vpop.f32.mrf.mxu0  ;;  %v5305_v13 = vpop.f32.mrf.mxu1  ;;  %3864 = vmatprep.mubr.bf16.mxu1 %v4928_v2  ;;  %v4888_v57 = vcombine.low %v1246_v17, %v1256_v63  ;;  %v1684_v49 = vor.u32 %v1683_v28, %v1680_v14  ;;  %v1264_v17 = vor.u32 %v6907_v5, %v6905_v61  ;;  %v1694_v42 = vor.u32 %v1693_v45, %v1689_v24  ;;  %v4714_v2 = vld [vmem:[%s6009_s22 + $0xb4] sm:$0xe] }
  0xf0   : > { %v7212_v60 = vadd.f32 %v5233_v21, %v5232_v3  ;;  %v7214_v58 = vadd.f32 %v5305_v13, %v5304_v48  ;;  %v1486_v3 = vrot.slane %v6885_v19, 5  ;;  %v1489_v48 = vrot.slane %v7206_v29, 5  ;;  %3865 = vmatmul.mubr.bf16.gmra.mxu1 %v4912_v23 }
  0xf1   : > { %v5235_v43 = vpop.f32.mrf.mxu0  ;;  %v5307_v50 = vpop.f32.mrf.mxu1  ;;  %3768 = vmatmul.mubr.bf16.gmra.mxu0 %v4888_v57  ;;  %v1695_v63 = vrot.slane %v1694_v42, 4  ;;  %v1279_v14 = vrot.slane %v1277_v9, 5  ;;  %v1493_v57 = vrot.slane %v6931_v15, 5 }
  0xf2   : > { %v1487_v21 = vsel %vm6245_vm5, %v4729_v40, %v1486_v3  ;;  %v1488_v13 = vrot.slane %v1486_v3, 4  ;;  %v1267_v40 = vshll.u32 %v6885_v19, 16  ;;  %v1273_v3 = vrot.slane %v1271_v44, 4  ;;  %v4698_v44 = vld [vmem:[%s6009_s22 + $0xbc] sm:$0x1] }
  0xf3   : > { %v5236_v12 = vpop.f32.mrf.mxu0  ;;  %v5308_v6 = vpop.f32.mrf.mxu1 }
  0xf4   : > { %v7222_v35 = vadd.f32 %v5236_v12, %v5235_v43  ;;  %v7224_v41 = vadd.f32 %v5308_v6, %v5307_v50  ;;  %v1490_v1 = vsel %vm6245_vm5, %v1488_v13, %v1489_v48  ;;  %v1697_v43 = vshll.u32 %v7231_v7, 16 }
  0xf5   : > { %v5238_v51 = vpop.f32.mrf.mxu0  ;;  %v5310_v50 = vpop.f32.mrf.mxu1  ;;  %v4905_v37 = vcombine.low %v1487_v21, %v1490_v1  ;;  %v1685_v48 = vrot.slane %v1684_v49, 4  ;;  %v1265_v21 = vrot.slane %v1264_v17, 4  ;;  %v1269_v61 = vrot.slane %v1267_v40, 5  ;;  %v7270_v1 = vld [vmem:[%s6009_s22 + $0x64] sm:$0xf] }
  0xf6   : > { %v1699_v6 = vrot.slane %v1697_v43, 5  ;;  %v1702_v49 = vshrl.u32 %v7260_v46, 16  ;;  %v1711_v42 = vshll.u32 %v7270_v1, 16 }
  0xf7   : > { %v5239_v11 = vpop.f32.mrf.mxu0  ;;  %v5311_v23 = vpop.f32.mrf.mxu1  ;;  %3775 = vmatprep.mubr.bf16.mxu0 %v4905_v37  ;;  %v1690_v29 = vsel %vm6051_vm2, %v1685_v48, %v1689_v24  ;;  %v1270_v28 = vsel %vm6051_vm2, %v1265_v21, %v1269_v61  ;;  %v1274_v56 = vor.u32 %v1273_v3, %v1269_v61  ;;  %v1496_v24 = vrot.slane %v4698_v44, 5  ;;  %v7277_v37 = vld [vmem:[%s6009_s22 + $0x68] sm:$0x1] }
  0xf8   : > { %v7254_v5 = vadd.f32 %v5239_v11, %v5238_v51  ;;  %v7256_v13 = vadd.f32 %v5311_v23, %v5310_v50  ;;  %v4730_v11 = vrot.slane %v4714_v2, 9  ;;  %v1700_v43 = vsel %vm6051_vm2, %v1695_v63, %v1699_v6 }
  0xf9   : > { %v5241_v12 = vpop.f32.mrf.mxu0  ;;  %v5313_v19 = vpop.f32.mrf.mxu1  ;;  %v1275_v17 = vrot.slane %v1274_v56, 4  ;;  %v1495_v3 = vrot.slane %v1493_v57, 4  ;;  %v1704_v23 = vrot.slane %v1702_v49, 4  ;;  %v1705_v48 = vshll.u32 %v7260_v46, 16 }
  0xfa   : > { %v1494_v40 = vsel %vm6245_vm5, %v4730_v11, %v1493_v57  ;;  %v1715_v6 = vshrl.u32 %v7270_v1, 16  ;;  %v1721_v21 = vshll.u32 %v7277_v37, 16 }
  0xfb   : > { %v5242_v39 = vpop.f32.mrf.mxu0  ;;  %v5314_v51 = vpop.f32.mrf.mxu1  ;;  %v1497_v2 = vsel %vm6245_vm5, %v1495_v3, %v1496_v24  ;;  %v1707_v56 = vrot.slane %v1705_v48, 5 }
  0xfc   : > { %v7264_v38 = vadd.f32 %v5242_v39, %v5241_v12  ;;  %v7274_v50 = vadd.f32 %v5314_v51, %v5313_v19  ;;  %v4929_v12 = vcombine.low %v1690_v29, %v1700_v43  ;;  %v1280_v39 = vsel %vm6051_vm2, %v1275_v17, %v1279_v14 }
  0xfd   : > { %v5244_v45 = vpop.f32.mrf.mxu0  ;;  %v5316_v61 = vpop.f32.mrf.mxu1  ;;  %v1288_v19 = vor.u32 %v6948_v31, %v6946_v4  ;;  %v4889_v29 = vcombine.low %v1270_v28, %v1280_v39  ;;  %v4906_v63 = vcombine.low %v1494_v40, %v1497_v2  ;;  %v1713_v51 = vrot.slane %v1711_v42, 5  ;;  %v4699_v39 = vld [vmem:[%s6009_s22 + $0xc8] sm:$0x1] }
  0xfe   : > { %3872 = vmatprep.mubr.bf16.mxu1 %v4929_v12  ;;  %v1717_v57 = vrot.slane %v1715_v6, 4  ;;  %v1723_v43 = vrot.slane %v1721_v21, 5  ;;  %v1291_v14 = vshll.u32 %v6931_v15, 16  ;;  %v4715_v12 = vld [vmem:[%s6009_s22 + $0xc0] sm:$0xe]  ;;  %v1708_v17 = vor.u32 %v1707_v56, %v1704_v23 }
  0xff   : > { %v5245_v9 = vpop.f32.mrf.mxu0  ;;  %3873 = vmatmul.mubr.bf16.gmra.mxu1 %v4913_v36  ;;  %v1289_v49 = vrot.slane %v1288_v19, 4  ;;  %v5317_v24 = vpop.f32.mrf.mxu1  ;;  %3776 = vmatmul.mubr.bf16.gmra.mxu0 %v4889_v29  ;;  %v1297_v4 = vrot.slane %v1295_v26, 4  ;;  %v1301_v31 = vshll.u32 %v4698_v44, 16  ;;  %v4914_v36 = vcombine.low %v7260_v46, %v7270_v1  ;;  %v7304_v23 = vld [vmem:[%s6009_s22 + $0x6c] sm:$0xf] }
 0x100   : > { %3783 = vmatprep.mubr.bf16.mxu0 %v4906_v63  ;;  %v1718_v40 = vor.u32 %v1717_v57, %v1713_v51  ;;  %v1293_v3 = vrot.slane %v1291_v14, 5  ;;  %v7298_v48 = vadd.f32 %v5245_v9, %v5244_v45  ;;  %v7300_v42 = vadd.f32 %v5317_v24, %v5316_v61  ;;  %v7312_v9 = vld [vmem:[%s6009_s22 + $0x70] sm:$0xf]  ;;  %v7319_v57 = vld [vmem:[%s6009_s22 + $0x74] sm:$0x1] }
 0x101   : > { %v5247_v11 = vpop.f32.mrf.mxu0  ;;  %v5319_v6 = vpop.f32.mrf.mxu1  ;;  %v1709_v15 = vrot.slane %v1708_v17, 4  ;;  %v1303_v26 = vrot.slane %v1301_v31, 5  ;;  %v4731_v2 = vrot.slane %v4715_v12, 9  ;;  %v1500_v45 = vrot.slane %v6972_v25, 5 }
 0x102   : > { %8178 = vst [vmem:[#allocation3_spill] sm:$0xff] %v7300_v42  ;;  %v1719_v46 = vrot.slane %v1718_v40, 4  ;;  %v1294_v21 = vsel %vm6051_vm2, %v1289_v49, %v1293_v3  ;;  %v1298_v19 = vor.u32 %v1297_v4, %v1293_v3  ;;  %v1503_v56 = vrot.slane %v4699_v39, 5 }
 0x103   : > { %v5248_v28 = vpop.f32.mrf.mxu0  ;;  %v5320_v29 = vpop.f32.mrf.mxu1  ;;  %v1714_v61 = vsel %vm6051_vm2, %v1709_v15, %v1713_v51  ;;  %v1501_v24 = vsel %vm6245_vm5, %v4731_v2, %v1500_v45  ;;  %v1502_v12 = vrot.slane %v1500_v45, 4  ;;  %v1729_v51 = vshll.u32 %v7304_v23, 16 }
 0x104   : > { %v7306_v44 = vadd.f32 %v5248_v28, %v5247_v11  ;;  %v7316_v63 = vadd.f32 %v5320_v29, %v5319_v6  ;;  %v1726_v11 = vshrl.u32 %v7304_v23, 16  ;;  %v1724_v14 = vsel %vm6051_vm2, %v1719_v46, %v1723_v43 }
 0x105   : > { %v1299_v49 = vrot.slane %v1298_v19, 4  ;;  %v5250_v17 = vpop.f32.mrf.mxu0  ;;  %v4930_v4 = vcombine.low %v1714_v61, %v1724_v14  ;;  %v1735_v28 = vshll.u32 %v7312_v9, 16  ;;  %v1504_v3 = vsel %vm6245_vm5, %v1502_v12, %v1503_v56  ;;  %v5322_v45 = vpop.f32.mrf.mxu1 }
 0x106   : > { %8179 = vst [vmem:[#allocation4_spill] sm:$0xff] %v7316_v63  ;;  %v1728_v31 = vrot.slane %v1726_v11, 4  ;;  %v1739_v43 = vshrl.u32 %v7312_v9, 16  ;;  %v1745_v6 = vshll.u32 %v7319_v57, 16  ;;  %v4907_v46 = vcombine.low %v1501_v24, %v1504_v3 }
 0x107   : > { %v1304_v40 = vsel %vm6051_vm2, %v1299_v49, %v1303_v26  ;;  %v5251_v15 = vpop.f32.mrf.mxu0  ;;  %3880 = vmatprep.mubr.bf16.mxu1 %v4930_v4  ;;  %v1731_v19 = vrot.slane %v1729_v51, 5  ;;  %v1737_v29 = vrot.slane %v1735_v28, 5  ;;  %v1312_v56 = vor.u32 %v6989_v53, %v6987_v20  ;;  %v5323_v4 = vpop.f32.mrf.mxu1  ;;  %v7341_v51 = vld [vmem:[%s6009_s22 + $0x78] sm:$0xf]  ;;  %v7348_v53 = vld [vmem:[%s6009_s22 + $0x7c] sm:$0xf] }
 0x108   : > { %v4890_v2 = vcombine.low %v1294_v21, %v1304_v40  ;;  %3881 = vmatmul.mubr.bf16.gmra.mxu1 %v4914_v36  ;;  %v1741_v61 = vrot.slane %v1739_v43, 4  ;;  %v1747_v11 = vrot.slane %v1745_v6, 5  ;;  %v1315_v12 = vshll.u32 %v6972_v25, 16 }
 0x109   : > { %v5253_v14 = vpop.f32.mrf.mxu0  ;;  %v1732_v49 = vor.u32 %v1731_v19, %v1728_v31  ;;  %v1321_v21 = vrot.slane %v1319_v18, 4  ;;  %v1325_v24 = vshll.u32 %v4699_v39, 16  ;;  %v1313_v28 = vrot.slane %v1312_v56, 4  ;;  %v5325_v43 = vpop.f32.mrf.mxu1  ;;  %v7361_v56 = vld [vmem:[%s6009_s22 + $0x80] sm:$0x1] }
 0x10a   : > { %3784 = vmatmul.mubr.bf16.gmra.mxu0 %v4890_v2  ;;  %v1742_v36 = vor.u32 %v1741_v61, %v1737_v29  ;;  %v4915_v40 = vcombine.low %v7304_v23, %v7312_v9  ;;  %v7345_v3 = vadd.f32 %v5251_v15, %v5250_v17  ;;  %v1317_v25 = vrot.slane %v1315_v12, 5 }
 0x10b   : > { %3791 = vmatprep.mubr.bf16.mxu0 %v4907_v46  ;;  %v5254_v20 = vpop.f32.mrf.mxu0  ;;  %v1733_v31 = vrot.slane %v1732_v49, 4  ;;  %v1327_v18 = vrot.slane %v1325_v24, 5  ;;  %v7350_v39 = vadd.f32 %v5323_v4, %v5322_v45  ;;  %v1750_v46 = vshrl.u32 %v7341_v51, 16  ;;  %v5326_v61 = vpop.f32.mrf.mxu1  ;;  %v4780_v49 = vld [vmem:[%s6009_s22 + $0x18] sm:$0xe] }
 0x10c   : > { %v1743_v6 = vrot.slane %v1742_v36, 4  ;;  %v7352_v2 = vadd.f32 %v5254_v20, %v5253_v14  ;;  %v1753_v23 = vshll.u32 %v7341_v51, 16  ;;  %v1318_v15 = vsel %vm6051_vm2, %v1313_v28, %v1317_v25 }
 0x10d   : > { %8180 = vst [vmem:[#allocation5_spill] sm:$0xff] %v7350_v39  ;;  %v1738_v17 = vsel %vm6051_vm2, %v1733_v31, %v1737_v29  ;;  %v1322_v19 = vor.u32 %v1321_v21, %v1317_v25  ;;  %v1759_v45 = vshll.u32 %v7348_v53, 16  ;;  %v7367_v12 = vadd.f32 %v5326_v61, %v5325_v43  ;;  %v5344_v31 = vpop.f32.mrf.mxu1  ;;  %v7379_v61 = vld [vmem:[%s6009_s22 + $0x84] sm:$0xf] }
 0x10e   : > { %v1748_v14 = vsel %vm6051_vm2, %v1743_v6, %v1747_v11  ;;  %v1752_v24 = vrot.slane %v1750_v46, 4  ;;  %v1755_v4 = vrot.slane %v1753_v23, 5  ;;  %v1763_v21 = vshrl.u32 %v7348_v53, 16  ;;  %v4781_v11 = vld [vmem:[%s6009_s22 + $0x24] sm:$0xe] }
 0x10f   : > { %8181 = vst [vmem:[#allocation6_spill] sm:$0xff] %v7367_v12  ;;  %v4931_v36 = vcombine.low %v1738_v17, %v1748_v14  ;;  %v1323_v29 = vrot.slane %v1322_v19, 4  ;;  %v1761_v20 = vrot.slane %v1759_v45, 5  ;;  %v5256_v28 = vpop.f32.mrf.mxu0  ;;  %v1769_v26 = vshll.u32 %v7361_v56, 16  ;;  %v5345_v19 = vpop.f32.mrf.mxu1 }
 0x110   : > { %v1756_v25 = vor.u32 %v1755_v4, %v1752_v24  ;;  %v4796_v62 = vrot.slane %v4780_v49, 9  ;;  %v1765_v6 = vrot.slane %v1763_v21, 4  ;;  %v2010_v46 = vrot.slane %v7021_v16, 5  ;;  %v7384_v24 = vld [vmem:[%s6009_s22 + $0x88] sm:$0xf] }
 0x111   : > { %3888 = vmatprep.mubr.bf16.mxu1 %v4931_v36  ;;  %v1328_v43 = vsel %vm6051_vm2, %v1323_v29, %v1327_v18  ;;  %v4916_v23 = vcombine.low %v7341_v51, %v7348_v53  ;;  %v5257_v17 = vpop.f32.mrf.mxu0  ;;  %v1771_v14 = vrot.slane %v1769_v26, 5  ;;  %v2009_v4 = vrot.slane %v2007_v59, 4  ;;  %v5347_v29 = vpop.f32.mrf.mxu1 }
 0x112   : > { %v4891_v45 = vcombine.low %v1318_v15, %v1328_v43  ;;  %3889 = vmatmul.mubr.bf16.gmra.mxu1 %v4915_v40  ;;  %v1757_v49 = vrot.slane %v1756_v25, 4  ;;  %v2008_v30 = vsel %vm6245_vm5, %v4796_v62, %v2007_v59  ;;  %v1766_v18 = vor.u32 %v1765_v6, %v1761_v20  ;;  %v7399_v43 = vld [vmem:[%s6009_s22 + $0x8c] sm:$0x1] }
 0x113   : > { %v4797_v16 = vrot.slane %v4781_v11, 9  ;;  %v7386_v36 = vadd.f32 %v5257_v17, %v5256_v28  ;;  %v5259_v51 = vpop.f32.mrf.mxu0  ;;  %v5346_v15 = vadd.f32 %v5345_v19, %v5344_v31  ;;  %v1774_v26 = vshrl.u32 %v7379_v61, 16  ;;  %v5348_v11 = vpop.f32.mrf.mxu1 }
 0x114   : > { %3792 = vmatmul.mubr.bf16.gmra.mxu0 %v4891_v45  ;;  %v1762_v40 = vsel %vm6051_vm2, %v1757_v49, %v1761_v20  ;;  %v1777_v62 = vshll.u32 %v7379_v61, 16  ;;  %v1767_v21 = vrot.slane %v1766_v18, 4  ;;  %v2011_v25 = vsel %vm6245_vm5, %v2009_v4, %v2010_v46  ;;  %v4782_v46 = vld [vmem:[%s6009_s22 + $0x30] sm:$0xe] }
 0x115   : > { %v2015_v59 = vsel %vm6245_vm5, %v4797_v16, %v2014_v8  ;;  %v5260_v28 = vpop.f32.mrf.mxu0  ;;  %v1783_v20 = vshll.u32 %v7384_v24, 16  ;;  %v4940_v31 = vcombine.low %v2008_v30, %v2011_v25  ;;  %v7404_v17 = vadd.f32 %v5346_v15, %v7212_v60  ;;  %v5350_v18 = vpop.f32.mrf.mxu1  ;;  %v4783_v60 = vld [vmem:[%s6009_s22 + $0x3c] sm:$0xe] }
 0x116   : > { %v4941_v6 = vcombine.low %v2015_v59, %v7084_v54  ;;  %v7406_v19 = vadd.f32 %v5260_v28, %v5259_v51  ;;  %v1772_v10 = vsel %vm6051_vm2, %v1767_v21, %v1771_v14  ;;  %v5349_v8 = vadd.f32 %v5348_v11, %v5347_v29 }
 0x117   : > { %v1776_v45 = vrot.slane %v1774_v26, 4  ;;  %v1779_v49 = vrot.slane %v1777_v62, 5  ;;  %v4932_v4 = vcombine.low %v1762_v40, %v1772_v10  ;;  %5704 = vmatprep.mubr.bf16.mxu0 %v4940_v31  ;;  %v1785_v16 = vrot.slane %v1783_v20, 5  ;;  %v5262_v25 = vpop.f32.mrf.mxu0  ;;  %v5351_v26 = vpop.f32.mrf.mxu1 }
 0x118   : > { %v1787_v30 = vshrl.u32 %v7384_v24, 16  ;;  %v1793_v54 = vshll.u32 %v7399_v43, 16  ;;  %v7415_v51 = vadd.f32 %v5349_v8, %v7222_v35  ;;  %v4798_v29 = vrot.slane %v4782_v46, 9  ;;  %v7424_v8 = vld [vmem:[%s6009_s22 + $0x90] sm:$0xf] }
 0x119   : > { %v1780_v15 = vor.u32 %v1779_v49, %v1776_v45  ;;  %3896 = vmatprep.mubr.bf16.mxu1 %v4932_v4  ;;  %v2021_v21 = vrot.slane %v7096_v47, 5  ;;  %v2024_v59 = vrot.slane %v7101_v33, 5  ;;  %v5263_v28 = vpop.f32.mrf.mxu0  ;;  %v4917_v35 = vcombine.low %v7379_v61, %v7384_v24  ;;  %v5353_v10 = vpop.f32.mrf.mxu1 }
 0x11a   : > { %v1789_v62 = vrot.slane %v1787_v30, 4  ;;  %v1795_v40 = vrot.slane %v1793_v54, 5  ;;  %3897 = vmatmul.mubr.bf16.gmra.mxu1 %v4916_v23  ;;  %v4799_v20 = vrot.slane %v4783_v60, 9  ;;  %v2028_v31 = vrot.slane %v7133_v55, 5 }
 0x11b   : > { %v1781_v11 = vrot.slane %v1780_v15, 4  ;;  %v2022_v47 = vsel %vm6245_vm5, %v4798_v29, %v2021_v21  ;;  %v2023_v45 = vrot.slane %v2021_v21, 4  ;;  %v7428_v33 = vadd.f32 %v5263_v28, %v5262_v25  ;;  %v5265_v23 = vpop.f32.mrf.mxu0  ;;  %v5354_v30 = vpop.f32.mrf.mxu1  ;;  %v7437_v25 = vld [vmem:[%s6009_s22 + $0x94] sm:$0xf]  ;;  %v7450_v28 = vld [vmem:[%s6009_s22 + $0x98] sm:$0x1] }
 0x11c   : > { %5705 = vmatmul.mubr.bf16.vlgmr.msra.gmra.mxu0 %v4941_v6  ;;  %v1790_v46 = vor.u32 %v1789_v62, %v1785_v16  ;;  %v2029_v55 = vsel %vm6245_vm5, %v4799_v20, %v2028_v31  ;;  %v2030_v49 = vrot.slane %v2028_v31, 4  ;;  %v5352_v4 = vadd.f32 %v5351_v26, %v5350_v18 }
 0x11d   : > { %v1786_v61 = vsel %vm6051_vm2, %v1781_v11, %v1785_v16  ;;  %v2025_v54 = vsel %vm6245_vm5, %v2023_v45, %v2024_v59  ;;  %v5266_v60 = vpop.f32.mrf.mxu0  ;;  %v5355_v15 = vadd.f32 %v5354_v30, %v5353_v10  ;;  %v1798_v29 = vshrl.u32 %v7424_v8, 16  ;;  %v4784_v59 = vld [vmem:[%s6009_s22 + $0x48] sm:$0xe]  ;;  %v5356_v11 = vpop.f32.mrf.mxu1 }
 0x11e   : > { %v1791_v6 = vrot.slane %v1790_v46, 4  ;;  %v4942_v62 = vcombine.low %v2022_v47, %v2025_v54  ;;  %v8182_v16 = vrot.slane %v7144_v52, 5  ;;  %v7445_v18 = vadd.f32 %v5352_v4, %v7254_v5 }
 0x11f   : > { %v7447_v26 = vadd.f32 %v5266_v60, %v5265_v23  ;;  %v7456_v10 = vadd.f32 %v5355_v15, %v7264_v38  ;;  %v1800_v52 = vrot.slane %v1798_v29, 4  ;;  %v5268_v46 = vpop.f32.mrf.mxu0  ;;  %v1801_v5 = vshll.u32 %v7424_v8, 16  ;;  %v5357_v4 = vpop.f32.mrf.mxu1 }
 0x120   : > { %v2032_v21 = vsel %vm6245_vm5, %v2030_v49, %v8182_v16  ;;  %v1796_v20 = vsel %vm6051_vm2, %v1791_v6, %v1795_v40  ;;  %5708 = vmatprep.mubr.bf16.mxu0 %v4942_v62  ;;  %v1807_v45 = vshll.u32 %v7437_v25, 16  ;;  %v1811_v23 = vshrl.u32 %v7437_v25, 16  ;;  %v4785_v49 = vld [vmem:[%s6009_s22 + $0x54] sm:$0xe]  ;;  %v7468_v62 = vld [vmem:[%s6009_s22 + $0x9c] sm:$0xf] }
 0x121   : > { %v4943_v31 = vcombine.low %v2029_v55, %v2032_v21  ;;  %v4933_v47 = vcombine.low %v1786_v61, %v1796_v20  ;;  %v1817_v30 = vshll.u32 %v7450_v28, 16  ;;  %v4800_v40 = vrot.slane %v4784_v59, 9  ;;  %v5269_v6 = vpop.f32.mrf.mxu0  ;;  %v5359_v29 = vpop.f32.mrf.mxu1 }
 0x122   : > { %v2035_v55 = vrot.slane %v7170_v32, 5  ;;  %v2038_v38 = vrot.slane %v7179_v27, 5  ;;  %v1803_v61 = vrot.slane %v1801_v5, 5  ;;  %v1809_v54 = vrot.slane %v1807_v45, 5 }
 0x123   : > { %3904 = vmatprep.mubr.bf16.mxu1 %v4933_v47  ;;  %v1813_v60 = vrot.slane %v1811_v23, 4  ;;  %v4918_v15 = vcombine.low %v7424_v8, %v7437_v25  ;;  %v1819_v16 = vrot.slane %v1817_v30, 5  ;;  %v4801_v59 = vrot.slane %v4785_v49, 9  ;;  %v5271_v27 = vpop.f32.mrf.mxu0  ;;  %v5360_v8 = vpop.f32.mrf.mxu1 }
 0x124   : > { %3905 = vmatmul.mubr.bf16.gmra.mxu1 %v4917_v35  ;;  %5709 = vmatmul.mubr.bf16.gmra.mxu0 %v4943_v31  ;;  %v2036_v21 = vsel %vm6245_vm5, %v4800_v40, %v2035_v55  ;;  %v2037_v32 = vrot.slane %v2035_v55, 4  ;;  %v1804_v20 = vor.u32 %v1803_v61, %v1800_v52  ;;  %v2042_v5 = vrot.slane %v7220_v0, 5  ;;  %v7481_v0 = vld [vmem:[%s6009_s22 + $0xa0] sm:$0xf] }
 0x125   : > { %v1814_v47 = vor.u32 %v1813_v60, %v1809_v54  ;;  %v7473_v45 = vadd.f32 %v5269_v6, %v5268_v46  ;;  %v5358_v31 = vadd.f32 %v5357_v4, %v5356_v11  ;;  %v5272_v23 = vpop.f32.mrf.mxu0  ;;  %v5361_v30 = vadd.f32 %v5360_v8, %v5359_v29  ;;  %v5362_v46 = vpop.f32.mrf.mxu1  ;;  %v7492_v4 = vld [vmem:[%s6009_s22 + $0xa4] sm:$0x1] }
 0x126   : > { %v2039_v35 = vsel %vm6245_vm5, %v2037_v32, %v2038_v38  ;;  %v1822_v40 = vshrl.u32 %v7468_v62, 16  ;;  %v1805_v55 = vrot.slane %v1804_v20, 4  ;;  %v2043_v52 = vsel %vm6245_vm5, %v4801_v59, %v2042_v5  ;;  %v4786_v59 = vld [vmem:[%s6009_s22 + $0x60] sm:$0xe] }
 0x127   : > { %v1815_v49 = vrot.slane %v1814_v47, 4  ;;  %v4944_v14 = vcombine.low %v2036_v21, %v2039_v35  ;;  %v2044_v6 = vrot.slane %v2042_v5, 4  ;;  %v7484_v61 = vadd.f32 %v5358_v31, %v7298_v48  ;;  %v5274_v60 = vpop.f32.mrf.mxu0 }
 0x128   : > { %v7486_v38 = vadd.f32 %v5272_v23, %v5271_v27  ;;  %v7489_v11 = vadd.f32 %v5361_v30, %v7306_v44  ;;  %v1810_v29 = vsel %vm6051_vm2, %v1805_v55, %v1809_v54  ;;  %v1824_v32 = vrot.slane %v1822_v40, 4  ;;  %v5363_v27 = vpop.f32.mrf.mxu1  ;;  %v4787_v23 = vld [vmem:[%s6009_s22 + $0x6c] sm:$0xe] }
 0x129   : > { %v1820_v21 = vsel %vm6051_vm2, %v1815_v49, %v1819_v16  ;;  %5712 = vmatprep.mubr.bf16.mxu0 %v4944_v14  ;;  %v1825_v48 = vshll.u32 %v7468_v62, 16  ;;  %v8183_v44 = vrot.slane %v7231_v7, 5  ;;  %v1831_v5 = vshll.u32 %v7481_v0, 16  ;;  %v5275_v8 = vpop.f32.mrf.mxu0 }
 0x12a   : > { %v4934_v20 = vcombine.low %v1810_v29, %v1820_v21  ;;  %v1835_v54 = vshrl.u32 %v7481_v0, 16  ;;  %v1841_v14 = vshll.u32 %v7492_v4, 16  ;;  %v5365_v30 = vpop.f32.mrf.mxu1  ;;  %v4802_v7 = vrot.slane %v4786_v59, 9 }
 0x12b   : > { %v2046_v47 = vsel %vm6245_vm5, %v2044_v6, %v8183_v44  ;;  %v1827_v31 = vrot.slane %v1825_v48, 5  ;;  %v1833_v40 = vrot.slane %v1831_v5, 5  ;;  %v2049_v49 = vrot.slane %v7270_v1, 5  ;;  %v5277_v6 = vpop.f32.mrf.mxu0 }
 0x12c   : > { %v4945_v35 = vcombine.low %v2043_v52, %v2046_v47  ;;  %3912 = vmatprep.mubr.bf16.mxu1 %v4934_v20  ;;  %v1837_v55 = vrot.slane %v1835_v54, 4  ;;  %v1843_v21 = vrot.slane %v1841_v14, 5  ;;  %v2052_v52 = vrot.slane %v7277_v37, 5  ;;  %v5366_v44 = vpop.f32.mrf.mxu1  ;;  %v7519_v37 = vld [vmem:[%s6009_s22 + $0xa8] sm:$0xf] }
 0x12d   : > { %3913 = vmatmul.mubr.bf16.gmra.mxu1 %v4918_v15  ;;  %v1828_v29 = vor.u32 %v1827_v31, %v1824_v32  ;;  %v4919_v48 = vcombine.low %v7468_v62, %v7481_v0  ;;  %v2050_v20 = vsel %vm6245_vm5, %v4802_v7, %v2049_v49  ;;  %v2051_v59 = vrot.slane %v2049_v49, 4  ;;  %v5278_v1 = vpop.f32.mrf.mxu0 }
 0x12e   : > { %5713 = vmatmul.mubr.bf16.gmra.mxu0 %v4945_v35  ;;  %v1838_v47 = vor.u32 %v1837_v55, %v1833_v40  ;;  %v4803_v5 = vrot.slane %v4787_v23, 9  ;;  %v2056_v15 = vrot.slane %v7312_v9, 5  ;;  %v7516_v32 = vadd.f32 %v5275_v8, %v5274_v60  ;;  %v5368_v31 = vpop.f32.mrf.mxu1  ;;  %v7526_v23 = vld [vmem:[%s6009_s22 + $0xac] sm:$0xf]  ;;  %v7533_v8 = vld [vmem:[%s6009_s22 + $0xb0] sm:$0x1] }
 0x12f   : > { %v1829_v54 = vrot.slane %v1828_v29, 4  ;;  %v5364_v35 = vadd.f32 %v5363_v27, %v5362_v46  ;;  %v2053_v14 = vsel %vm6245_vm5, %v2051_v59, %v2052_v52  ;;  %v7523_v55 = vadd.f32 %v5278_v1, %v5277_v6  ;;  %v5280_v49 = vpop.f32.mrf.mxu0 }
 0x130   : > { %v1839_v62 = vrot.slane %v1838_v47, 4  ;;  %v5367_v7 = vadd.f32 %v5366_v44, %v5365_v30  ;;  %v4946_v60 = vcombine.low %v2050_v20, %v2053_v14  ;;  %v2057_v46 = vsel %vm6245_vm5, %v4803_v5, %v2056_v15  ;;  %v5369_v29 = vpop.f32.mrf.mxu1  ;;  %v4788_v44 = vld [vmem:[%s6009_s22 + $0x78] sm:$0xe] }
 0x131   : > { %v1834_v9 = vsel %vm6051_vm2, %v1829_v54, %v1833_v40  ;;  %v2058_v27 = vrot.slane %v2056_v15, 4  ;;  %v7538_v30 = vadd.f32 %v5364_v35, %v7345_v3  ;;  %v1846_v40 = vshrl.u32 %v7519_v37, 16  ;;  %v5281_v47 = vpop.f32.mrf.mxu0 }
 0x132   : > { %v1844_v52 = vsel %vm6051_vm2, %v1839_v62, %v1843_v21  ;;  %v7541_v6 = vadd.f32 %v5367_v7, %v7352_v2  ;;  %5716 = vmatprep.mubr.bf16.mxu0 %v4946_v60  ;;  %v8184_v59 = vrot.slane %v7319_v57, 5  ;;  %v1849_v21 = vshll.u32 %v7519_v37, 16  ;;  %v5371_v3 = vpop.f32.mrf.mxu1  ;;  %v4789_v62 = vld [vmem:[%s6009_s22 + $0x84] sm:$0xe] }
 0x133   : > { %v4935_v20 = vcombine.low %v1834_v9, %v1844_v52  ;;  %v1855_v1 = vshll.u32 %v7526_v23, 16  ;;  %v1848_v15 = vrot.slane %v1846_v40, 4  ;;  %v1859_v2 = vshrl.u32 %v7526_v23, 16  ;;  %v5283_v14 = vpop.f32.mrf.mxu0 }
 0x134   : > { %v2060_v5 = vsel %vm6245_vm5, %v2058_v27, %v8184_v59  ;;  %v1865_v35 = vshll.u32 %v7533_v8, 16  ;;  %v1851_v7 = vrot.slane %v1849_v21, 5  ;;  %v4804_v57 = vrot.slane %v4788_v44, 9  ;;  %v5372_v27 = vpop.f32.mrf.mxu1 }
 0x135   : > { %v4947_v54 = vcombine.low %v2057_v46, %v2060_v5  ;;  %3920 = vmatprep.mubr.bf16.mxu1 %v4935_v20  ;;  %v1857_v9 = vrot.slane %v1855_v1, 5  ;;  %v2063_v60 = vrot.slane %v7348_v53, 5  ;;  %v1861_v52 = vrot.slane %v1859_v2, 4  ;;  %v5284_v5 = vpop.f32.mrf.mxu0 }
 0x136   : > { %3921 = vmatmul.mubr.bf16.gmra.mxu1 %v4919_v48  ;;  %v1867_v59 = vrot.slane %v1865_v35, 5  ;;  %v2066_v46 = vrot.slane %v7361_v56, 5  ;;  %v4920_v40 = vcombine.low %v7519_v37, %v7526_v23  ;;  %v1852_v16 = vor.u32 %v1851_v7, %v1848_v15  ;;  %v5374_v53 = vpop.f32.mrf.mxu1  ;;  %v7564_v35 = vld [vmem:[%s6009_s22 + $0xb4] sm:$0xf] }
 0x137   : > { %5717 = vmatmul.mubr.bf16.gmra.mxu0 %v4947_v54  ;;  %v2064_v20 = vsel %vm6245_vm5, %v4804_v57, %v2063_v60  ;;  %v2065_v44 = vrot.slane %v2063_v60, 4  ;;  %v4805_v21 = vrot.slane %v4789_v62, 9  ;;  %v1862_v1 = vor.u32 %v1861_v52, %v1857_v9  ;;  %v5286_v56 = vpop.f32.mrf.mxu0  ;;  %v7571_v60 = vld [vmem:[%s6009_s22 + $0xb8] sm:$0xf] }
 0x138   : > { %v2070_v48 = vrot.slane %v7384_v24, 5  ;;  %v7561_v54 = vadd.f32 %v5281_v47, %v5280_v49  ;;  %v5370_v2 = vadd.f32 %v5369_v29, %v5368_v31  ;;  %v1853_v37 = vrot.slane %v1852_v16, 4  ;;  %v5375_v62 = vpop.f32.mrf.mxu1 }
 0x139   : > { %v2067_v15 = vsel %vm6245_vm5, %v2065_v44, %v2066_v46  ;;  %v7568_v7 = vadd.f32 %v5284_v5, %v5283_v14  ;;  %v5373_v57 = vadd.f32 %v5372_v27, %v5371_v3  ;;  %v1863_v52 = vrot.slane %v1862_v1, 4  ;;  %v5287_v29 = vpop.f32.mrf.mxu0  ;;  %v7584_v14 = vld [vmem:[%s6009_s22 + $0xbc] sm:$0x1] }
 0x13a   : > { %v4948_v24 = vcombine.low %v2064_v20, %v2067_v15  ;;  %v2071_v31 = vsel %vm6245_vm5, %v4805_v21, %v2070_v48  ;;  %v2072_v49 = vrot.slane %v2070_v48, 4  ;;  %v1858_v16 = vsel %vm6051_vm2, %v1853_v37, %v1857_v9  ;;  %v5377_v46 = vpop.f32.mrf.mxu1  ;;  %v4791_v15 = vld [vmem:[%s6009_s22 + $0x9c] sm:$0xe] }
 0x13b   : > { %v7578_v47 = vadd.f32 %v5370_v2, %v7386_v36  ;;  %v7581_v3 = vadd.f32 %v5373_v57, %v7406_v19  ;;  %v1870_v27 = vshrl.u32 %v7564_v35, 16  ;;  %v1868_v5 = vsel %vm6051_vm2, %v1863_v52, %v1867_v59  ;;  %v4790_v19 = vld [vmem:[%s6009_s22 + $0x90] sm:$0xe]  ;;  %v5289_v21 = vpop.f32.mrf.mxu0 }
 0x13c   : > { %5720 = vmatprep.mubr.bf16.mxu0 %v4948_v24  ;;  %v8185_v20 = vrot.slane %v7399_v43, 5  ;;  %v1873_v36 = vshll.u32 %v7564_v35, 16  ;;  %v1879_v44 = vshll.u32 %v7571_v60, 16  ;;  %v4936_v1 = vcombine.low %v1858_v16, %v1868_v5  ;;  %v5378_v57 = vpop.f32.mrf.mxu1 }
 0x13d   : > { %v1872_v2 = vrot.slane %v1870_v27, 4  ;;  %v1883_v37 = vshrl.u32 %v7571_v60, 16  ;;  %v1889_v43 = vshll.u32 %v7584_v14, 16  ;;  %v4806_v12 = vrot.slane %v4790_v19, 9 }
 0x13e   : > { %v2074_v9 = vsel %vm6245_vm5, %v2072_v49, %v8185_v20  ;;  %v1875_v59 = vrot.slane %v1873_v36, 5  ;;  %v1881_v52 = vrot.slane %v1879_v44, 5  ;;  %v5290_v49 = vpop.f32.mrf.mxu0  ;;  %3928 = vmatprep.mubr.bf16.mxu1 %v4936_v1  ;;  %v2077_v39 = vrot.slane %v7437_v25, 5  ;;  %v7602_v16 = vpop.f32.mrf.mxu1 }
 0x13f   : > { %v4949_v48 = vcombine.low %v2071_v31, %v2074_v9  ;;  %v1885_v20 = vrot.slane %v1883_v37, 4  ;;  %v2080_v31 = vrot.slane %v7450_v28, 5  ;;  %3929 = vmatmul.mubr.bf16.gmra.mxu1 %v4920_v40  ;;  %v1891_v5 = vrot.slane %v1889_v43, 5 }
 0x140   : > { %v1876_v27 = vor.u32 %v1875_v59, %v1872_v2  ;;  %v4921_v9 = vcombine.low %v7564_v35, %v7571_v60  ;;  %v4807_v36 = vrot.slane %v4791_v15, 9  ;;  %v5292_v44 = vpop.f32.mrf.mxu0  ;;  %v2078_v19 = vsel %vm6245_vm5, %v4806_v12, %v2077_v39  ;;  %v5381_v28 = vpop.f32.mrf.mxu1  ;;  %v7614_v59 = vld [vmem:[%s6009_s22 + $0xc0] sm:$0xf] }
 0x141   : > { %5721 = vmatmul.mubr.bf16.gmra.mxu0 %v4949_v48  ;;  %v1886_v1 = vor.u32 %v1885_v20, %v1881_v52  ;;  %v2079_v48 = vrot.slane %v2077_v39, 4  ;;  %v2084_v25 = vrot.slane %v7481_v0, 5  ;;  %v7609_v24 = vadd.f32 %v5287_v29, %v5286_v56  ;;  %v7621_v0 = vld [vmem:[%s6009_s22 + $0xc4] sm:$0xf] }
 0x142   : > { %v1877_v37 = vrot.slane %v1876_v27, 4  ;;  %v5376_v40 = vadd.f32 %v5375_v62, %v5374_v53  ;;  %v7611_v2 = vadd.f32 %v5290_v49, %v5289_v21  ;;  %v5293_v35 = vpop.f32.mrf.mxu0  ;;  %v5383_v20 = vpop.f32.mrf.mxu1  ;;  %v5379_v29 = vadd.f32 %v5378_v57, %v5377_v46  ;;  %v7629_v21 = vld [vmem:[%s6009_s22 + $0xc8] sm:$0x1] }
 0x143   : > { %v1887_v15 = vrot.slane %v1886_v1, 4  ;;  %v2081_v43 = vsel %vm6245_vm5, %v2079_v48, %v2080_v31  ;;  %v2085_v39 = vsel %vm6245_vm5, %v4807_v36, %v2084_v25  ;;  %v2086_v12 = vrot.slane %v2084_v25, 4 }
 0x144   : > { %v1882_v53 = vsel %vm6051_vm2, %v1877_v37, %v1881_v52  ;;  %v4950_v56 = vcombine.low %v2078_v19, %v2081_v43  ;;  %v7626_v62 = vadd.f32 %v5376_v40, %v7428_v33  ;;  %v5295_v49 = vpop.f32.mrf.mxu0  ;;  %v8186_v27 = vrot.slane %v7492_v4, 5  ;;  %v4792_v19 = vld [vmem:[%s6009_s22 + $0xa8] sm:$0xe]  ;;  %v5384_v33 = vpop.f32.mrf.mxu1  ;;  %v4793_v43 = vld [vmem:[%s6009_s22 + $0xb4] sm:$0xe] }
 0x145   : > { %v1892_v31 = vsel %vm6051_vm2, %v1887_v15, %v1891_v5  ;;  %v1894_v1 = vshrl.u32 %v7614_v59, 16  ;;  %v1897_v52 = vshll.u32 %v7614_v59, 16  ;;  %v7641_v57 = vadd.f32 %v5379_v29, %v7447_v26 }
 0x146   : > { %v2088_v36 = vsel %vm6245_vm5, %v2086_v12, %v8186_v27  ;;  %v4937_v48 = vcombine.low %v1882_v53, %v1892_v31  ;;  %5724 = vmatprep.mubr.bf16.mxu0 %v4950_v56  ;;  %v1903_v5 = vshll.u32 %v7621_v0, 16  ;;  %v5296_v25 = vpop.f32.mrf.mxu0  ;;  %v1907_v40 = vshrl.u32 %v7621_v0, 16  ;;  %v7647_v12 = vpop.f32.mrf.mxu1 }
 0x147   : > { %v4951_v46 = vcombine.low %v2085_v39, %v2088_v36  ;;  %8187 = vst [vmem:[#allocation7_spill] sm:$0xff] %v7641_v57  ;;  %v1896_v4 = vrot.slane %v1894_v1, 4  ;;  %v1899_v37 = vrot.slane %v1897_v52, 5  ;;  %v1913_v15 = vshll.u32 %v7629_v21, 16 }
 0x148   : > { %3936 = vmatprep.mubr.bf16.mxu1 %v4937_v48  ;;  %v1905_v53 = vrot.slane %v1903_v5, 5  ;;  %v4808_v56 = vrot.slane %v4792_v19, 9  ;;  %v2091_v39 = vrot.slane %v7526_v23, 5  ;;  %v2094_v26 = vrot.slane %v7533_v8, 5  ;;  %v7651_v29 = vpop.f32.mrf.mxu0  ;;  %v7655_v52 = vpop.f32.mrf.mxu1 }
 0x149   : > { %5725 = vmatmul.mubr.bf16.gmra.mxu0 %v4951_v46  ;;  %3937 = vmatmul.mubr.bf16.gmra.mxu1 %v4921_v9  ;;  %v1900_v31 = vor.u32 %v1899_v37, %v1896_v4  ;;  %v1909_v27 = vrot.slane %v1907_v40, 4  ;;  %v1915_v36 = vrot.slane %v1913_v15, 5  ;;  %v4922_v1 = vcombine.low %v7614_v59, %v7621_v0  ;;  %v7664_v37 = vld [vmem:[%s6009_s22 + $0xcc] sm:$0xf] }
 0x14a   : > { %v2092_v19 = vsel %vm6245_vm5, %v4808_v56, %v2091_v39  ;;  %v2093_v48 = vrot.slane %v2091_v39, 4  ;;  %v4809_v23 = vrot.slane %v4793_v43, 9  ;;  %v2098_v8 = vrot.slane %v7571_v60, 5  ;;  %v5299_v46 = vpop.f32.mrf.mxu0  ;;  %v7666_v59 = vpop.f32.mrf.mxu1  ;;  %v7675_v56 = vld [vmem:[%s6009_s22 + $0xd0] sm:$0xf] }
 0x14b   : > { %v1901_v5 = vrot.slane %v1900_v31, 4  ;;  %v1910_v63 = vor.u32 %v1909_v27, %v1905_v53  ;;  %v7660_v9 = vadd.f32 %v5293_v35, %v5292_v44  ;;  %v5382_v4 = vadd.f32 %v5381_v28, %v7602_v16 }
 0x14c   : > { %v2095_v40 = vsel %vm6245_vm5, %v2093_v48, %v2094_v26  ;;  %v2099_v15 = vsel %vm6245_vm5, %v4809_v23, %v2098_v8  ;;  %v2100_v43 = vrot.slane %v2098_v8, 4  ;;  %v7672_v60 = vadd.f32 %v5296_v25, %v5295_v49  ;;  %v5301_v44 = vpop.f32.mrf.mxu0  ;;  %v5390_v31 = vpop.f32.mrf.mxu1  ;;  %v4779_v25 = vld [vmem:[%s6009_s22 + $0xd4] sm:$0x1]  ;;  %v4794_v8 = vld [vmem:[%s6009_s22 + $0xc0] sm:$0xe] }
 0x14d   : > { %v1906_v16 = vsel %vm6051_vm2, %v1901_v5, %v1905_v53  ;;  %v1911_v28 = vrot.slane %v1910_v63, 4  ;;  %v4952_v35 = vcombine.low %v2092_v19, %v2095_v40  ;;  %v7680_v39 = vadd.f32 %v5382_v4, %v7473_v45 }
 0x14e   : > { %v8189_v26 = vrot.slane %v7584_v14, 5  ;;  %v5385_v49 = vadd.f32 %v5384_v33, %v5383_v20  ;;  %v1918_v48 = vshrl.u32 %v7664_v37, 16  ;;  %v1921_v23 = vshll.u32 %v7664_v37, 16  ;;  %v5302_v53 = vpop.f32.mrf.mxu0  ;;  %v5392_v5 = vpop.f32.mrf.mxu1 }
 0x14f   : > { %8188 = vst [vmem:[#allocation8_spill] sm:$0xff] %v7680_v39  ;;  %v1916_v63 = vsel %vm6051_vm2, %v1911_v28, %v1915_v36  ;;  %5728 = vmatprep.mubr.bf16.mxu0 %v4952_v35  ;;  %v1927_v19 = vshll.u32 %v7675_v56, 16  ;;  %v1931_v14 = vshrl.u32 %v7675_v56, 16  ;;  %v1937_v36 = vshll.u32 %v4779_v25, 16 }
 0x150   : > { %v2102_v27 = vsel %vm6245_vm5, %v2100_v43, %v8189_v26  ;;  %v4938_v4 = vcombine.low %v1906_v16, %v1916_v63  ;;  %v7695_v20 = vadd.f32 %v5385_v49, %v7486_v38  ;;  %v1920_v33 = vrot.slane %v1918_v48, 4  ;;  %v4795_v43 = vld [vmem:[%s6009_s22 + $0xcc] sm:$0xe]  ;;  %v5456_v26 = vpop.f32.mrf.mxu0 }
 0x151   : > { %v4953_v45 = vcombine.low %v2099_v15, %v2102_v27  ;;  %v1923_v40 = vrot.slane %v1921_v23, 5  ;;  %v1929_v39 = vrot.slane %v1927_v19, 5  ;;  %v1933_v42 = vrot.slane %v1931_v14, 4  ;;  %v5393_v15 = vpop.f32.mrf.mxu1 }
 0x152   : > { %v2115_v28 = vrot.slane %v4779_v25, 5  ;;  %3944 = vmatprep.mubr.bf16.mxu1 %v4938_v4  ;;  %v4810_v27 = vrot.slane %v4794_v8, 9  ;;  %v2105_v57 = vrot.slane %v7621_v0, 5  ;;  %v2108_v16 = vrot.slane %v7629_v21, 5  ;;  %v5457_v63 = vpop.f32.mrf.mxu0 }
 0x153   : > { %5729 = vmatmul.mubr.bf16.gmra.mxu0 %v4953_v45  ;;  %v1924_v35 = vor.u32 %v1923_v40, %v1920_v33  ;;  %3945 = vmatmul.mubr.bf16.gmra.mxu1 %v4922_v1  ;;  %v1934_v38 = vor.u32 %v1933_v42, %v1929_v39  ;;  %v1939_v49 = vrot.slane %v1937_v36, 5  ;;  %v4923_v48 = vcombine.low %v7664_v37, %v7675_v56  ;;  %v5395_v45 = vpop.f32.mrf.mxu1 }
 0x154   : > { %v4811_v23 = vrot.slane %v4795_v43, 9  ;;  %v2106_v25 = vsel %vm6245_vm5, %v4810_v27, %v2105_v57  ;;  %v2107_v14 = vrot.slane %v2105_v57, 4  ;;  %v2112_v8 = vrot.slane %v7675_v56, 5  ;;  %v5459_v4 = vpop.f32.mrf.mxu0 }
 0x155   : > { %v1925_v19 = vrot.slane %v1924_v35, 4  ;;  %v1935_v0 = vrot.slane %v1934_v38, 4  ;;  %v7706_v21 = vadd.f32 %v5299_v46, %v7651_v29  ;;  %v5388_v42 = vadd.f32 %v7655_v52, %v7647_v12  ;;  %v5396_v37 = vpop.f32.mrf.mxu1 }
 0x156   : > { %v7710_v1 = vadd.f32 %v5302_v53, %v5301_v44  ;;  %v2109_v40 = vsel %vm6245_vm5, %v2107_v14, %v2108_v16  ;;  %v2113_v57 = vsel %vm6245_vm5, %v4811_v23, %v2112_v8  ;;  %v2114_v56 = vrot.slane %v2112_v8, 4  ;;  %v5460_v43 = vpop.f32.mrf.mxu0 }
 0x157   : > { %v1930_v33 = vsel %vm6051_vm2, %v1925_v19, %v1929_v39  ;;  %v1940_v29 = vsel %vm6051_vm2, %v1935_v0, %v1939_v49  ;;  %v4954_v46 = vcombine.low %v2106_v25, %v2109_v40  ;;  %v7721_v12 = vadd.f32 %v5388_v42, %v7516_v32  ;;  %v5398_v44 = vpop.f32.mrf.mxu1 }
 0x158   : > { %v5391_v52 = vadd.f32 %v5390_v31, %v7666_v59  ;;  %v4939_v53 = vcombine.low %v1930_v33, %v1940_v29  ;;  %v2116_v39 = vsel %vm6245_vm5, %v2114_v56, %v2115_v28  ;;  %v5394_v36 = vadd.f32 %v5393_v15, %v5392_v5  ;;  %v5462_v27 = vpop.f32.mrf.mxu0 }
 0x159   : > { %v5458_v35 = vadd.f32 %v5457_v63, %v5456_v26  ;;  %5732 = vmatprep.mubr.bf16.mxu0 %v4954_v46  ;;  %v4955_v16 = vcombine.low %v2113_v57, %v2116_v39  ;;  %v5397_v34 = vadd.f32 %v5396_v37, %v5395_v45  ;;  %v5461_v49 = vadd.f32 %v5460_v43, %v5459_v4  ;;  %v5399_v23 = vpop.f32.mrf.mxu1 }
 0x15a   : > { %v7727_v38 = vadd.f32 %v5391_v52, %v7523_v55  ;;  %3952 = vmatprep.mubr.bf16.mxu1 %v4939_v53  ;;  %v7730_v32 = vadd.f32 %v5394_v36, %v7561_v54  ;;  %v5400_v22 = vadd.f32 %v5399_v23, %v5398_v44  ;;  %v5463_v31 = vpop.f32.mrf.mxu0 }
 0x15b   : > { %v7733_v59 = vadd.f32 %v5458_v35, %v7404_v17  ;;  %3953 = vmatmul.mubr.bf16.gmra.mxu1 %v4923_v48  ;;  %5733 = vmatmul.mubr.bf16.gmra.mxu0 %v4955_v16  ;;  %v7736_v5 = vadd.f32 %v5397_v34, %v7568_v7  ;;  %v7739_v55 = vadd.f32 %v5461_v49, %v7415_v51  ;;  %v5401_v28 = vpop.f32.mrf.mxu1 }
 0x15c   : > { %v5464_v26 = vadd.f32 %v5463_v31, %v5462_v27  ;;  %v7742_v15 = vadd.f32 %v5400_v22, %v7609_v24  ;;  %v5465_v54 = vpop.f32.mrf.mxu0 }
 0x15d   : > { %v5402_v17 = vpop.f32.mrf.mxu1 }
 0x15e   : > { %v7745_v63 = vadd.f32 %v5464_v26, %v7445_v18  ;;  %v5403_v45 = vadd.f32 %v5402_v17, %v5401_v28  ;;  %v5466_v19 = vpop.f32.mrf.mxu0 }
 0x15f   : > { %v5467_v48 = vadd.f32 %v5466_v19, %v5465_v54  ;;  %v5404_v25 = vpop.f32.mrf.mxu1 }
 0x160   : > { %v7748_v7 = vadd.f32 %v5403_v45, %v7611_v2  ;;  %v5468_v14 = vpop.f32.mrf.mxu0 }
 0x161   : > { %v7751_v51 = vadd.f32 %v5467_v48, %v7456_v10  ;;  %v5405_v8 = vpop.f32.mrf.mxu1 }
 0x162   : > { %v5406_v4 = vadd.f32 %v5405_v8, %v5404_v25  ;;  %v5469_v24 = vpop.f32.mrf.mxu0 }
 0x163   : > { %v5470_v0 = vadd.f32 %v5469_v24, %v5468_v14  ;;  %v5407_v42 = vpop.f32.mrf.mxu1 }
 0x164   : > { %v7754_v18 = vadd.f32 %v5406_v4, %v7660_v9  ;;  %v5471_v37 = vpop.f32.mrf.mxu0 }
 0x165   : > { %v7757_v33 = vadd.f32 %v5470_v0, %v7484_v61  ;;  %v5408_v40 = vpop.f32.mrf.mxu1 }
 0x166   : > { %v5409_v57 = vadd.f32 %v5408_v40, %v5407_v42  ;;  %v5472_v2 = vpop.f32.mrf.mxu0 }
 0x167   : > { %v5473_v56 = vadd.f32 %v5472_v2, %v5471_v37  ;;  %v5410_v43 = vpop.f32.mrf.mxu1 }
 0x168   : > { %v7760_v10 = vadd.f32 %v5409_v57, %v7672_v60  ;;  %v5474_v29 = vpop.f32.mrf.mxu0 }
 0x169   : > { %v7763_v46 = vadd.f32 %v5473_v56, %v7489_v11  ;;  %v5411_v52 = vpop.f32.mrf.mxu1 }
 0x16a   : > { %v5412_v44 = vadd.f32 %v5411_v52, %v5410_v43  ;;  %v5475_v9 = vpop.f32.mrf.mxu0 }
 0x16b   : > { %v5476_v53 = vadd.f32 %v5475_v9, %v5474_v29  ;;  %v5413_v39 = vpop.f32.mrf.mxu1 }
 0x16c   : > { %v7766_v61 = vadd.f32 %v5412_v44, %v7706_v21  ;;  %v5477_v36 = vpop.f32.mrf.mxu0  ;;  %v8190_v44 = vld [vmem:[#allocation7_spill] sm:$0xff] }
 0x16d   : > { %v7769_v35 = vadd.f32 %v5476_v53, %v7538_v30  ;;  %v5414_v27 = vpop.f32.mrf.mxu1 }
 0x16e   : > { %v5415_v16 = vadd.f32 %v5414_v27, %v5413_v39  ;;  %v5478_v60 = vpop.f32.mrf.mxu0 }
 0x16f   : > { %v5479_v34 = vadd.f32 %v5478_v60, %v5477_v36  ;;  %v5416_v49 = vpop.f32.mrf.mxu1 }
 0x170   : > { %v7772_v11 = vadd.f32 %v5415_v16, %v7710_v1  ;;  %v5480_v23 = vpop.f32.mrf.mxu0  ;;  %v8191_v16 = vld [vmem:[#allocation3_spill] sm:$0xff] }
 0x171   : > { %v7775_v22 = vadd.f32 %v5479_v34, %v7541_v6  ;;  %v5417_v31 = vpop.f32.mrf.mxu1  ;;  %v8192_v34 = vld [vmem:[#allocation8_spill] sm:$0xff] }
 0x172   : > { %v5418_v26 = vadd.f32 %v5417_v31, %v5416_v49  ;;  %v5481_v21 = vpop.f32.mrf.mxu0 }
 0x173   : > { %v5482_v28 = vadd.f32 %v5481_v21, %v5480_v23  ;;  %v5419_v54 = vpop.f32.mrf.mxu1 }
 0x174   : > { %v7778_v30 = vadd.f32 %v5418_v26, %v7214_v58  ;;  %v5483_v17 = vpop.f32.mrf.mxu0 }
 0x175   : > { %v7781_v45 = vadd.f32 %v5482_v28, %v7578_v47  ;;  %v5420_v19 = vpop.f32.mrf.mxu1  ;;  %v8193_v28 = vld [vmem:[#allocation4_spill] sm:$0xff] }
 0x176   : > { %v5421_v48 = vadd.f32 %v5420_v19, %v5419_v54  ;;  %v5484_v1 = vpop.f32.mrf.mxu0 }
 0x177   : > { %v5485_v25 = vadd.f32 %v5484_v1, %v5483_v17  ;;  %v5422_v14 = vpop.f32.mrf.mxu1 }
 0x178   : > { %v7784_v6 = vadd.f32 %v5421_v48, %v7224_v41  ;;  %v5486_v8 = vpop.f32.mrf.mxu0 }
 0x179   : > { %v7787_v4 = vadd.f32 %v5485_v25, %v7581_v3  ;;  %v5423_v24 = vpop.f32.mrf.mxu1 }
 0x17a   : > { %v5424_v0 = vadd.f32 %v5423_v24, %v5422_v14  ;;  %v5487_v58 = vpop.f32.mrf.mxu0  ;;  %v8194_v24 = vld [vmem:[#allocation5_spill] sm:$0xff] }
 0x17b   : > { %v5488_v42 = vadd.f32 %v5487_v58, %v5486_v8  ;;  %v5425_v37 = vpop.f32.mrf.mxu1 }
 0x17c   : > { %v7790_v47 = vadd.f32 %v5424_v0, %v7256_v13  ;;  %v5489_v40 = vpop.f32.mrf.mxu0 }
 0x17d   : > { %v7793_v57 = vadd.f32 %v5488_v42, %v7626_v62  ;;  %v5426_v2 = vpop.f32.mrf.mxu1 }
 0x17e   : > { %v5427_v56 = vadd.f32 %v5426_v2, %v5425_v37  ;;  %v5490_v41 = vpop.f32.mrf.mxu0 }
 0x17f   : > { %v5491_v43 = vadd.f32 %v5490_v41, %v5489_v40  ;;  %v5428_v29 = vpop.f32.mrf.mxu1 }
 0x180   : > { %v7796_v3 = vadd.f32 %v5427_v56, %v7274_v50  ;;  %v5492_v52 = vpop.f32.mrf.mxu0 }
 0x181   : > { %v7799_v9 = vadd.f32 %v5491_v43, %v8190_v44  ;;  %v5429_v53 = vpop.f32.mrf.mxu1 }
 0x182   : > { %v5430_v39 = vadd.f32 %v5429_v53, %v5428_v29  ;;  %v5493_v13 = vpop.f32.mrf.mxu0 }
 0x183   : > { %v5494_v36 = vadd.f32 %v5493_v13, %v5492_v52  ;;  %v5431_v27 = vpop.f32.mrf.mxu1 }
 0x184   : > { %v7802_v62 = vadd.f32 %v5430_v39, %v8191_v16  ;;  %v5495_v60 = vpop.f32.mrf.mxu0 }
 0x185   : > { %v7805_v49 = vadd.f32 %v5494_v36, %v8192_v34  ;;  %v5432_v23 = vpop.f32.mrf.mxu1 }
 0x186   : > { %v5433_v31 = vadd.f32 %v5432_v23, %v5431_v27  ;;  %v5496_v50 = vpop.f32.mrf.mxu0 }
 0x187   : > { %v5497_v26 = vadd.f32 %v5496_v50, %v5495_v60  ;;  %v5434_v21 = vpop.f32.mrf.mxu1 }
 0x188   : > { %v7808_v54 = vadd.f32 %v5433_v31, %v8193_v28  ;;  %v5498_v17 = vpop.f32.mrf.mxu0 }
 0x189   : > { %v7811_v19 = vadd.f32 %v5497_v26, %v7695_v20  ;;  %v5435_v48 = vpop.f32.mrf.mxu1  ;;  %v8195_v20 = vld [vmem:[#allocation6_spill] sm:$0xff] }
 0x18a   : > { %v5436_v1 = vadd.f32 %v5435_v48, %v5434_v21  ;;  %v5499_v25 = vpop.f32.mrf.mxu0 }
 0x18b   : > { %v5500_v14 = vadd.f32 %v5499_v25, %v5498_v17  ;;  %v5437_v8 = vpop.f32.mrf.mxu1 }
 0x18c   : > { %v7814_v0 = vadd.f32 %v5436_v1, %v8194_v24  ;;  %v5501_v58 = vpop.f32.mrf.mxu0 }
 0x18d   : > { %v7817_v42 = vadd.f32 %v5500_v14, %v7721_v12  ;;  %v5438_v37 = vpop.f32.mrf.mxu1 }
 0x18e   : > { %v5439_v40 = vadd.f32 %v5438_v37, %v5437_v8  ;;  %v5502_v2 = vpop.f32.mrf.mxu0 }
 0x18f   : > { %v5503_v56 = vadd.f32 %v5502_v2, %v5501_v58  ;;  %v7819_v41 = vpop.f32.mrf.mxu1 }
 0x190   : > { %v7822_v43 = vadd.f32 %v5439_v40, %v8195_v20  ;;  %v5504_v29 = vpop.f32.mrf.mxu0 }
 0x191   : > { %v7825_v52 = vadd.f32 %v5503_v56, %v7727_v38  ;;  %v7827_v44 = vpop.f32.mrf.mxu1 }
 0x192   : > { %v5505_v53 = vpop.f32.mrf.mxu0 }
 0x193   : > { %v5506_v39 = vadd.f32 %v5505_v53, %v5504_v29  ;;  %v7829_v13 = vpop.f32.mrf.mxu1 }
 0x194   : > { %v5507_v12 = vpop.f32.mrf.mxu0 }
 0x195   : > { %v7832_v36 = vadd.f32 %v5506_v39, %v7730_v32  ;;  %v7834_v27 = vpop.f32.mrf.mxu1 }
 0x196   : > { %v5508_v16 = vpop.f32.mrf.mxu0 }
 0x197   : > { %v5509_v60 = vadd.f32 %v5508_v16, %v5507_v12  ;;  %v7836_v34 = vpop.f32.mrf.mxu1 }
 0x198   : > { %v5510_v23 = vpop.f32.mrf.mxu0 }
 0x199   : > { %v7839_v38 = vadd.f32 %v5509_v60, %v7736_v5  ;;  %v7841_v31 = vpop.f32.mrf.mxu1 }
 0x19a   : > { %v5511_v50 = vpop.f32.mrf.mxu0 }
 0x19b   : > { %8196 = vst [vmem:[#allocation7_spill] sm:$0xff] %v7839_v38  ;;  %v5512_v26 = vadd.f32 %v5511_v50, %v5510_v23  ;;  %v7843_v21 = vpop.f32.mrf.mxu1 }
 0x19c   : > { %v5513_v28 = vpop.f32.mrf.mxu0 }
 0x19d   : > { %v7846_v32 = vadd.f32 %v5512_v26, %v7742_v15  ;;  %v7848_v17 = vpop.f32.mrf.mxu1 }
 0x19e   : > { %v5514_v48 = vpop.f32.mrf.mxu0 }
 0x19f   : > { %v5515_v1 = vadd.f32 %v5514_v48, %v5513_v28  ;;  %v7850_v25 = vpop.f32.mrf.mxu1 }
 0x1a0   : > { %v5516_v5 = vpop.f32.mrf.mxu0 }
 0x1a1   : > { %v7853_v14 = vadd.f32 %v5515_v1, %v7748_v7  ;;  %v7855_v8 = vpop.f32.mrf.mxu1 }
 0x1a2   : > { %v5517_v24 = vpop.f32.mrf.mxu0 }
 0x1a3   : > { %8197 = vst [vmem:[#allocation3_spill] sm:$0xff] %v7853_v14  ;;  %v7857_v58 = vpop.f32.mrf.mxu1  ;;  %v5518_v37 = vadd.f32 %v5517_v24, %v5516_v5 }
 0x1a4   : > { %v5519_v40 = vpop.f32.mrf.mxu0 }
 0x1a5   : > { %v7859_v2 = vpop.f32.mrf.mxu1  ;;  %v7862_v15 = vadd.f32 %v5518_v37, %v7754_v18 }
 0x1a6   : > { %v5520_v56 = vpop.f32.mrf.mxu0 }
 0x1a7   : > { %8198 = vst [vmem:[#allocation8_spill] sm:$0xff] %v7862_v15  ;;  %v5521_v20 = vadd.f32 %v5520_v56, %v5519_v40  ;;  %v7864_v29 = vpop.f32.mrf.mxu1 }
 0x1a9   : > { %v7867_v7 = vadd.f32 %v5521_v20, %v7760_v10  ;;  %v7869_v53 = vpop.f32.mrf.mxu1  ;;  %v5522_v39 = vpop.f32.mrf.mxu0 }
 0x1ab   : > { %8199 = vst [vmem:[#allocation4_spill] sm:$0xff] %v7867_v7  ;;  %v7871_v12 = vpop.f32.mrf.mxu1  ;;  %v5523_v16 = vpop.f32.mrf.mxu0 }
 0x1ac   : > { %v5524_v60 = vadd.f32 %v5523_v16, %v5522_v39 }
 0x1ad   : > { %v7873_v23 = vpop.f32.mrf.mxu1  ;;  %v5525_v50 = vpop.f32.mrf.mxu0 }
 0x1ae   : > { %v7876_v18 = vadd.f32 %v5524_v60, %v7766_v61 }
 0x1af   : > { %v5526_v26 = vpop.f32.mrf.mxu0 }
 0x1b0   : > { %8200 = vst [vmem:[#allocation5_spill] sm:$0xff] %v7876_v18  ;;  %v5527_v28 = vadd.f32 %v5526_v26, %v5525_v50  ;;  %v7878_v48 = vpop.f32.mrf.mxu1 }
 0x1b1   : > { %v5528_v1 = vpop.f32.mrf.mxu0 }
 0x1b2   : > { %v7881_v10 = vadd.f32 %v5527_v28, %v7772_v11  ;;  %v7883_v5 = vpop.f32.mrf.mxu1 }
 0x1b3   : > { %v5529_v24 = vpop.f32.mrf.mxu0 }
 0x1b4   : > { %8201 = vst [vmem:[#allocation6_spill] sm:$0xff] %v7881_v10  ;;  %v5530_v37 = vadd.f32 %v5529_v24, %v5528_v1  ;;  %v7885_v40 = vpop.f32.mrf.mxu1 }
 0x1b5   : > { %v5531_v56 = vpop.f32.mrf.mxu0 }
 0x1b6   : > { %v7888_v20 = vadd.f32 %v5530_v37, %v7778_v30  ;;  %v7890_v61 = vpop.f32.mrf.mxu1 }
 0x1b7   : > { %v5532_v39 = vpop.f32.mrf.mxu0 }
 0x1b8   : > { %8202 = vst [vmem:[#allocation9_spill] sm:$0xff] %v7888_v20  ;;  %v5533_v16 = vadd.f32 %v5532_v39, %v5531_v56 }
 0x1ba   : > { %v7893_v60 = vadd.f32 %v5533_v16, %v7784_v6 }
 0x1bc   : > { %8203 = vst [vmem:[#allocation10_spill] sm:$0xff] %v7893_v60 }
 0x1bf   : > { %v7895_v50 = vpop.f32.mrf.mxu1  ;;  %v5534_v11 = vpop.f32.mrf.mxu0 }
 0x1c1   : > { %v7897_v26 = vpop.f32.mrf.mxu1  ;;  %v5535_v28 = vpop.f32.mrf.mxu0 }
 0x1c2   : > { %v5536_v24 = vadd.f32 %v5535_v28, %v5534_v11 }
 0x1c3   : > { %v7899_v1 = vpop.f32.mrf.mxu1  ;;  %v5537_v7 = vpop.f32.mrf.mxu0 }
 0x1c4   : > { %v7902_v30 = vadd.f32 %v5536_v24, %v7790_v47 }
 0x1c5   : > { %v7904_v37 = vpop.f32.mrf.mxu1  ;;  %v5538_v20 = vpop.f32.mrf.mxu0 }
 0x1c6   : > { %8204 = vst [vmem:[#allocation11_spill] sm:$0xff] %v7902_v30  ;;  %v5539_v56 = vadd.f32 %v5538_v20, %v5537_v7 }
 0x1c8   : > { %v7907_v6 = vadd.f32 %v5539_v56, %v7796_v3  ;;  %v7909_v39 = vpop.f32.mrf.mxu1 }
 0x1ca   : > { %8205 = vst [vmem:[#allocation12_spill] sm:$0xff] %v7907_v6  ;;  %v5540_v16 = vpop.f32.mrf.mxu0  ;;  %v7911_v60 = vpop.f32.mrf.mxu1 }
 0x1cc   : > { %v5541_v10 = vpop.f32.mrf.mxu0  ;;  %v7913_v18 = vpop.f32.mrf.mxu1 }
 0x1cd   : > { %v5542_v15 = vadd.f32 %v5541_v10, %v5540_v16  ;;  %v5576_v16 = vadd.f32 %v7841_v31, %v7836_v34  ;;  %v7946_v31 = vld [vmem:[%s8160_s2] ss:$0 sm:$0xff] }
 0x1ce   : > { %v5543_v11 = vpop.f32.mrf.mxu0  ;;  %v7918_v28 = vpop.f32.mrf.mxu1 }
 0x1cf   : > { %v7916_v47 = vadd.f32 %v5542_v15, %v7802_v62  ;;  %v3843_v14 = vadd.f32 %v5576_v16, %v7745_v63  ;;  %v7959_v63 = vld [vmem:[%s8161_s3] ss:$0 sm:$0xff] }
 0x1d0   : > { %v5544_v24 = vpop.f32.mrf.mxu0 }
 0x1d1   : > { %8206 = vst [vmem:[#allocation13_spill] sm:$0xff] %v7916_v47  ;;  %v5545_v7 = vadd.f32 %v5544_v24, %v5543_v11  ;;  %v5570_v11 = vadd.f32 %v7827_v44, %v7819_v41  ;;  %v5573_v41 = vadd.f32 %v7834_v27, %v7829_v13 }
 0x1d2   : > { %v7923_v20 = vpop.f32.mrf.mxu1 }
 0x1d3   : > { %v7921_v3 = vadd.f32 %v5545_v7, %v7808_v54  ;;  %v5579_v7 = vadd.f32 %v7848_v17, %v7843_v21  ;;  %v3835_v21 = vadd.f32 %v5570_v11, %v7733_v59  ;;  %v3838_v11 = vadd.f32 %v5573_v41, %v7739_v55 }
 0x1d4   : > { %v5546_v56 = vpop.f32.mrf.mxu0  ;;  %v7925_v6 = vpop.f32.mrf.mxu1 }
 0x1d5   : > { %8207 = vst [vmem:[#allocation14_spill] sm:$0xff] %v7921_v3 }
 0x1d6   : > { %v5547_v30 = vpop.f32.mrf.mxu0  ;;  %v7927_v10 = vpop.f32.mrf.mxu1 }
 0x1d7   : > { %v5548_v62 = vadd.f32 %v5547_v30, %v5546_v56  ;;  %v5588_v56 = vadd.f32 %v7869_v53, %v7864_v29  ;;  %v5582_v29 = vadd.f32 %v7855_v8, %v7850_v25  ;;  %v5591_v53 = vadd.f32 %v7873_v23, %v7871_v12 }
 0x1d8   : > { %v5549_v15 = vpop.f32.mrf.mxu0  ;;  %v7931_v47 = vpop.f32.mrf.mxu1  ;;  %v5585_v12 = vadd.f32 %v7859_v2, %v7857_v58 }
 0x1d9   : > { %v7936_v54 = vadd.f32 %v5548_v62, %v7814_v0  ;;  %v3851_v41 = vadd.f32 %v5582_v29, %v7757_v33 }
 0x1da   : > { %v5550_v24 = vpop.f32.mrf.mxu0  ;;  %v7940_v38 = vpop.f32.mrf.mxu1 }
 0x1db   : > { %v5551_v3 = vadd.f32 %v5550_v24, %v5549_v15 }
 0x1dc   : > { %v5706_v34 = vpop.f32.mrf.mxu0  ;;  %v7953_v30 = vpop.f32.mrf.mxu1 }
 0x1dd   : > { %v7951_v0 = vadd.f32 %v5551_v3, %v7822_v43  ;;  %v4004_v44 = vadd.f32 %v5706_v34, %v3843_v14  ;;  %v3846_v43 = vadd.f32 %v5579_v7, %v7751_v51 }
 0x1de   : > { %v3995_v17 = vpop.f32.mrf.mxu0  ;;  %v7964_v27 = vpop.f32.mrf.mxu1 }
 0x1df   : > { %v4131_v16 = vmul.f32 %v7946_v31, %v4004_v44  ;;  %v3996_v13 = vadd.f32 %v3995_v17, %v3835_v21  ;;  %v3859_v44 = vadd.f32 %v5588_v56, %v7769_v35  ;;  %v3862_v35 = vadd.f32 %v5591_v53, %v7775_v22 }
 0x1e0   : > { %v5707_v14 = vpop.f32.mrf.mxu0  ;;  %v7969_v15 = vpop.f32.mrf.mxu1 }
 0x1e1   : > { %v4170_v3 = vadd.f32 %v7959_v63, %v4131_v16  ;;  %v4129_v59 = vmul.f32 %v7946_v31, %v3996_v13  ;;  %v4007_v62 = vadd.f32 %v5707_v14, %v3846_v43 }
 0x1e2   : > { %v3998_v24 = vpop.f32.mrf.mxu0 }
 0x1e3   : > { %v4168_v51 = vadd.f32 %v7959_v63, %v4129_v59  ;;  %v4132_v7 = vmul.f32 %v7946_v31, %v4007_v62  ;;  %v3999_v34 = vadd.f32 %v3998_v24, %v3838_v11  ;;  %v4202_v21 = vmax.f32 %v4170_v3, 0.0 }
 0x1e4   : > { %v7979_v17 = vpop.f32.mrf.mxu1  ;;  %v5710_v16 = vpop.f32.mrf.mxu0  ;;  %v5600_v62 = vadd.f32 %v7897_v26, %v7895_v50  ;;  %v3854_v26 = vadd.f32 %v5585_v12, %v7763_v46 }
 0x1e5   : > { %v4200_v13 = vmax.f32 %v4168_v51, 0.0  ;;  %v4171_v55 = vadd.f32 %v7959_v63, %v4132_v7  ;;  %v4130_v25 = vmul.f32 %v7946_v31, %v3999_v34  ;;  %v4020_v8 = vadd.f32 %v5710_v16, %v3859_v44 }
 0x1e6   : > { %v7986_v23 = vpop.f32.mrf.mxu1  ;;  %v4011_v43 = vpop.f32.mrf.mxu0  ;;  %v5594_v7 = vadd.f32 %v7883_v5, %v7878_v48  ;;  %v5603_v16 = vadd.f32 %v7904_v37, %v7899_v1  ;;  %v5597_v1 = vadd.f32 %v7890_v61, %v7885_v40 }
 0x1e7   : > { %v4392_v56 = vmax.f32 %v4200_v13, %v4202_v21  ;;  %v4203_v14 = vmax.f32 %v4171_v55, 0.0  ;;  %v4169_v3 = vadd.f32 %v7959_v63, %v4130_v25  ;;  %v4135_v59 = vmul.f32 %v7946_v31, %v4020_v8 }
 0x1e8   : > { %v4012_v58 = vadd.f32 %v4011_v43, %v3851_v41  ;;  %v7999_v33 = vpop.f32.mrf.mxu1  ;;  %v5711_v2 = vpop.f32.mrf.mxu0  ;;  %v3875_v8 = vadd.f32 %v5600_v62, %v7793_v57  ;;  %v3867_v57 = vadd.f32 %v5594_v7, %v7781_v45  ;;  %v3878_v62 = vadd.f32 %v5603_v16, %v7799_v9 }
 0x1e9   : > { %4408 = vst [vmem:[#allocation2] sm:$0xff] %v4392_v56  ;;  %v5106_v22 = vpack.c.bf16 %v4203_v14, %v4202_v21  ;;  %v4201_v11 = vmax.f32 %v4169_v3, 0.0  ;;  %v4023_v29 = vadd.f32 %v5711_v2, %v3862_v35  ;;  %v4174_v53 = vadd.f32 %v7959_v63, %v4135_v59 }
 0x1ea   : > { %v4133_v24 = vmul.f32 %v7946_v31, %v4012_v58  ;;  %v8003_v50 = vpop.f32.mrf.mxu1  ;;  %v4014_v51 = vpop.f32.mrf.mxu0  ;;  %v5612_v58 = vadd.f32 %v7925_v6, %v7923_v20  ;;  %v3870_v9 = vadd.f32 %v5597_v1, %v7787_v4  ;;  %v5606_v6 = vadd.f32 %v7911_v60, %v7909_v39 }
 0x1eb   : > { %5198 = vst [vmem:[%s7997_s10 + $0x8] sm:$0xff] %v5106_v22   ;;  %v5101_v34 = vpack.c.bf16 %v4201_v11, %v4200_v13  ;;  %v4393_v44 = vmax.f32 %v4201_v11, %v4203_v14  ;;  %v4136_v21 = vmul.f32 %v7946_v31, %v4023_v29  ;;  %v4015_v25 = vadd.f32 %v4014_v51, %v3854_v26 }
 0x1ec   : > { %v4172_v55 = vadd.f32 %v7959_v63, %v4133_v24  ;;  %v4206_v5 = vmax.f32 %v4174_v53, 0.0  ;;  %v3891_v16 = vadd.f32 %v5612_v58, %v7817_v42 }
 0x1ed   : > { %5102 = vst [vmem:[%s7997_s10] sm:$0xff] %v5101_v34   ;;  %4409 = vst [vmem:[#allocation2 + $0x8] sm:$0xff] %v4393_v44  ;;  %v4175_v46 = vadd.f32 %v7959_v63, %v4136_v21  ;;  %v8016_v12 = vpop.f32.mrf.mxu1  ;;  %v4134_v41 = vmul.f32 %v7946_v31, %v4015_v25  ;;  %v5615_v34 = vadd.f32 %v7931_v47, %v7927_v10 }
 0x1ee   : > { %v5714_v48 = vpop.f32.mrf.mxu0  ;;  %v4204_v13 = vmax.f32 %v4172_v55, 0.0  ;;  %v5609_v47 = vadd.f32 %v7918_v28, %v7913_v18  ;;  %v5624_v10 = vadd.f32 %v7986_v23, %v7979_v17  ;;  %v5618_v17 = vadd.f32 %v7953_v30, %v7940_v38 }
 0x1ef   : > { %v4036_v43 = vadd.f32 %v5714_v48, %v3875_v8  ;;  %v4207_v37 = vmax.f32 %v4175_v46, 0.0  ;;  %v8021_v35 = vpop.f32.mrf.mxu1  ;;  %v4173_v3 = vadd.f32 %v7959_v63, %v4134_v41  ;;  %v5627_v38 = vadd.f32 %v8003_v50, %v7999_v33 }
 0x1f0   : > { %v4027_v56 = vpop.f32.mrf.mxu0  ;;  %v4394_v14 = vmax.f32 %v4204_v13, %v4206_v5  ;;  %v3886_v58 = vadd.f32 %v5609_v47, %v7811_v19  ;;  %v3899_v50 = vadd.f32 %v5618_v17, %v7832_v36 }
 0x1f1   : > { %v4139_v59 = vmul.f32 %v7946_v31, %v4036_v43  ;;  %v5116_v2 = vpack.c.bf16 %v4207_v37, %v4206_v5  ;;  %v4028_v22 = vadd.f32 %v4027_v56, %v3867_v57  ;;  %v8029_v40 = vpop.f32.mrf.mxu1  ;;  %v4205_v11 = vmax.f32 %v4173_v3, 0.0 }
 0x1f2   : > { %v5715_v61 = vpop.f32.mrf.mxu0  ;;  %4410 = vst [vmem:[#allocation2 + $0x10] sm:$0xff] %v4394_v14  ;;  %v3883_v5 = vadd.f32 %v5606_v6, %v7805_v49 }
 0x1f3   : > { %v4039_v45 = vadd.f32 %v5715_v61, %v3878_v62  ;;  %5200 = vst [vmem:[%s7997_s10 + $0x18] sm:$0xff] %v5116_v2   ;;  %v4178_v29 = vadd.f32 %v7959_v63, %v4139_v59  ;;  %v4137_v53 = vmul.f32 %v7946_v31, %v4028_v22  ;;  %v8034_v24 = vpop.f32.mrf.mxu1  ;;  %v5111_v20 = vpack.c.bf16 %v4205_v11, %v4204_v13 }
 0x1f4   : > { %v4030_v26 = vpop.f32.mrf.mxu0  ;;  %v4395_v51 = vmax.f32 %v4205_v11, %v4207_v37  ;;  %v3894_v37 = vadd.f32 %v5615_v34, %v7825_v52  ;;  %v4424_v23 = vld [vmem:[#allocation2] ss:$2 sm:$0xff]  ;;  %v4440_v49 = vld [vmem:[#allocation2 + $0x1] ss:$2 sm:$0xff]  ;;  %v3907_v22 = vadd.f32 %v5624_v10, %v7846_v32 }
 0x1f5   : > { %v4140_v7 = vmul.f32 %v7946_v31, %v4039_v45  ;;  %v4176_v44 = vadd.f32 %v7959_v63, %v4137_v53  ;;  %v4031_v21 = vadd.f32 %v4030_v26, %v3870_v9  ;;  %5199 = vst [vmem:[%s7997_s10 + $0x10] sm:$0xff] %v5111_v20   ;;  %v4210_v60 = vmax.f32 %v4178_v29, 0.0 }
 0x1f6   : > { %4411 = vst [vmem:[#allocation2 + $0x18] sm:$0xff] %v4395_v51  ;;  %v8046_v55 = vpop.f32.mrf.mxu1  ;;  %v4455_v53 = vmax.f32 %v4424_v23, %v4440_v49 }
 0x1f7   : > { %v4179_v4 = vadd.f32 %v7959_v63, %v4140_v7  ;;  %v5718_v25 = vpop.f32.mrf.mxu0  ;;  %v4208_v39 = vmax.f32 %v4176_v44, 0.0  ;;  %v4138_v8 = vmul.f32 %v7946_v31, %v4031_v21  ;;  %v5621_v21 = vadd.f32 %v7969_v15, %v7964_v27 }
 0x1f8   : > { %v4052_v46 = vadd.f32 %v5718_v25, %v3891_v16  ;;  %v5635_v42 = vpop.f32.mrf.mxu1  ;;  %v8208_v25 = vld [vmem:[#allocation3_spill] sm:$0xff] }
 0x1f9   : > { %v4211_v48 = vmax.f32 %v4179_v4, 0.0  ;;  %v4043_v13 = vpop.f32.mrf.mxu0  ;;  %v4396_v41 = vmax.f32 %v4208_v39, %v4210_v60  ;;  %v4177_v43 = vadd.f32 %v7959_v63, %v4138_v8  ;;  %v5636_v10 = vadd.f32 %v5635_v42, %v8046_v55 }
 0x1fa   : > { %v4143_v1 = vmul.f32 %v7946_v31, %v4052_v46  ;;  %v4044_v56 = vadd.f32 %v4043_v13, %v3883_v5  ;;  %v8057_v18 = vpop.f32.mrf.mxu1 }
 0x1fb   : > { %v5126_v57 = vpack.c.bf16 %v4211_v48, %v4210_v60  ;;  %v5719_v28 = vpop.f32.mrf.mxu0  ;;  %4412 = vst [vmem:[#allocation2 + $0x20] sm:$0xff] %v4396_v41  ;;  %v4209_v14 = vmax.f32 %v4177_v43, 0.0  ;;  %v3910_v60 = vadd.f32 %v5627_v38, %v8208_v25 }
 0x1fc   : > { %v4182_v3 = vadd.f32 %v7959_v63, %v4143_v1  ;;  %v4055_v59 = vadd.f32 %v5719_v28, %v3894_v37  ;;  %v4141_v62 = vmul.f32 %v7946_v31, %v4044_v56  ;;  %v5638_v52 = vpop.f32.mrf.mxu1  ;;  %v5630_v1 = vadd.f32 %v8021_v35, %v8016_v12  ;;  %v8209_v37 = vld [vmem:[#allocation7_spill] sm:$0xff] }
 0x1fd   : > { %5202 = vst [vmem:[%s7997_s10 + $0x28] sm:$0xff] %v5126_v57   ;;  %v4046_v2 = vpop.f32.mrf.mxu0  ;;  %v4426_v30 = vld [vmem:[#allocation2 + $0x10] ss:$2 sm:$0xff]  ;;  %v4442_v61 = vld [vmem:[#allocation2 + $0x11] ss:$2 sm:$0xff]  ;;  %v5121_v11 = vpack.c.bf16 %v4209_v14, %v4208_v39  ;;  %v4397_v45 = vmax.f32 %v4209_v14, %v4211_v48  ;;  %v3902_v57 = vadd.f32 %v5621_v21, %v8209_v37 }
 0x1fe   : > { %v4144_v29 = vmul.f32 %v7946_v31, %v4055_v59  ;;  %v4456_v9 = vmax.f32 %v4426_v30, %v4442_v61  ;;  %v4180_v26 = vadd.f32 %v7959_v63, %v4141_v62  ;;  %v4047_v6 = vadd.f32 %v4046_v2, %v3886_v58  ;;  %v8210_v14 = vld [vmem:[#allocation5_spill] sm:$0xff]  ;;  %v8211_v30 = vld [vmem:[#allocation8_spill] sm:$0xff] }
 0x1ff   : > { %5201 = vst [vmem:[%s7997_s10 + $0x20] sm:$0xff] %v5121_v11   ;;  %4413 = vst [vmem:[#allocation2 + $0x28] sm:$0xff] %v4397_v45  ;;  %v4214_v19 = vmax.f32 %v4182_v3, 0.0  ;;  %v5640_v34 = vpop.f32.mrf.mxu1  ;;  %v3923_v3 = vadd.f32 %v5636_v10, %v8210_v14  ;;  %v5639_v59 = vadd.f32 %v5638_v52, %v8057_v18  ;;  %v3915_v61 = vadd.f32 %v5630_v1, %v8211_v30 }
 0x200   : > { %v4183_v32 = vadd.f32 %v7959_v63, %v4144_v29  ;;  %v5181_v20 = vpack.c.bf16 %v4456_v9, %v4455_v53  ;;  %v4212_v51 = vmax.f32 %v4180_v26, 0.0  ;;  %v4142_v7 = vmul.f32 %v7946_v31, %v4047_v6 }
 0x201   : > { %v5722_v33 = vpop.f32.mrf.mxu0  ;;  %v5641_v46 = vpop.f32.mrf.mxu1  ;;  %v5633_v11 = vadd.f32 %v8034_v24, %v8029_v40 }
 0x202   : > { %v4068_v44 = vadd.f32 %v5722_v33, %v3907_v22  ;;  %v4215_v16 = vmax.f32 %v4183_v32, 0.0  ;;  %5182 = vst [vmem:[%s8074_s13] sm:$0xff] %v5181_v20   ;;  %v4398_v39 = vmax.f32 %v4212_v51, %v4214_v19  ;;  %v4181_v8 = vadd.f32 %v7959_v63, %v4142_v7 }
 0x203   : > { %v4059_v4 = vpop.f32.mrf.mxu0  ;;  %v5643_v41 = vpop.f32.mrf.mxu1  ;;  %v5642_v45 = vadd.f32 %v5641_v46, %v5640_v34 }
 0x204   : > { %v4147_v36 = vmul.f32 %v7946_v31, %v4068_v44  ;;  %v4060_v47 = vadd.f32 %v4059_v4, %v3899_v50  ;;  %v5136_v48 = vpack.c.bf16 %v4215_v16, %v4214_v19  ;;  %4414 = vst [vmem:[#allocation2 + $0x30] sm:$0xff] %v4398_v39  ;;  %v4213_v13 = vmax.f32 %v4181_v8, 0.0  ;;  %v8212_v50 = vld [vmem:[#allocation6_spill] sm:$0xff] }
 0x205   : > { %v5723_v5 = vpop.f32.mrf.mxu0  ;;  %v5644_v17 = vpop.f32.mrf.mxu1  ;;  %v3926_v20 = vadd.f32 %v5639_v59, %v8212_v50 }
 0x206   : > { %v4186_v27 = vadd.f32 %v7959_v63, %v4147_v36  ;;  %v4145_v15 = vmul.f32 %v7946_v31, %v4060_v47  ;;  %v4071_v43 = vadd.f32 %v5723_v5, %v3910_v60  ;;  %5204 = vst [vmem:[%s7997_s10 + $0x38] sm:$0xff] %v5136_v48   ;;  %v5131_v28 = vpack.c.bf16 %v4213_v13, %v4212_v51  ;;  %v4428_v19 = vld [vmem:[#allocation2 + $0x20] ss:$2 sm:$0xff]  ;;  %v4444_v32 = vld [vmem:[#allocation2 + $0x21] ss:$2 sm:$0xff]  ;;  %v8214_v60 = vld [vmem:[#allocation9_spill] sm:$0xff] }
 0x207   : > { %v4062_v56 = vpop.f32.mrf.mxu0  ;;  %v4399_v55 = vmax.f32 %v4213_v13, %v4215_v16  ;;  %v8213_v16 = vld [vmem:[#allocation4_spill] sm:$0xff]  ;;  %v3931_v39 = vadd.f32 %v5642_v45, %v8214_v60  ;;  %v4457_v8 = vmax.f32 %v4428_v19, %v4444_v32  ;;  %v5645_v37 = vadd.f32 %v5644_v17, %v5643_v41 }
 0x208   : > { %v4184_v42 = vadd.f32 %v7959_v63, %v4145_v15  ;;  %v4148_v23 = vmul.f32 %v7946_v31, %v4071_v43  ;;  %v4063_v49 = vadd.f32 %v4062_v56, %v3902_v57  ;;  %5203 = vst [vmem:[%s7997_s10 + $0x30] sm:$0xff] %v5131_v28   ;;  %v4218_v62 = vmax.f32 %v4186_v27, 0.0  ;;  %v8215_v43 = vld [vmem:[#allocation11_spill] sm:$0xff] }
 0x209   : > { %4415 = vst [vmem:[#allocation2 + $0x38] sm:$0xff] %v4399_v55  ;;  %v5726_v35 = vpop.f32.mrf.mxu0  ;;  %v5646_v22 = vpop.f32.mrf.mxu1  ;;  %v3918_v4 = vadd.f32 %v5633_v11, %v8213_v16  ;;  %v8217_v11 = vld [vmem:[#allocation10_spill] sm:$0xff]  ;;  %v8218_v16 = vld [vmem:[#allocation13_spill] sm:$0xff] }
 0x20a   : > { %v4216_v12 = vmax.f32 %v4184_v42, 0.0  ;;  %v4187_v58 = vadd.f32 %v7959_v63, %v4148_v23  ;;  %v4146_v2 = vmul.f32 %v7946_v31, %v4063_v49  ;;  %v4084_v38 = vadd.f32 %v5726_v35, %v3923_v3 }
 0x20b   : > { %v4075_v53 = vpop.f32.mrf.mxu0  ;;  %v5647_v26 = vpop.f32.mrf.mxu1  ;;  %v3934_v45 = vadd.f32 %v5645_v37, %v8217_v11 }
 0x20c   : > { %v4400_v29 = vmax.f32 %v4216_v12, %v4218_v62  ;;  %v4219_v18 = vmax.f32 %v4187_v58, 0.0  ;;  %v4185_v52 = vadd.f32 %v7959_v63, %v4146_v2  ;;  %v4151_v9 = vmul.f32 %v7946_v31, %v4084_v38  ;;  %v8216_v2 = vld [vmem:[#allocation12_spill] sm:$0xff] }
 0x20d   : > { %v4076_v6 = vadd.f32 %v4075_v53, %v3915_v61  ;;  %v5648_v33 = vadd.f32 %v5647_v26, %v5646_v22  ;;  %v5727_v51 = vpop.f32.mrf.mxu0  ;;  %v5649_v44 = vpop.f32.mrf.mxu1 }
 0x20e   : > { %4416 = vst [vmem:[#allocation2 + $0x40] sm:$0xff] %v4400_v29  ;;  %v5146_v7 = vpack.c.bf16 %v4219_v18, %v4218_v62  ;;  %v4217_v40 = vmax.f32 %v4185_v52, 0.0  ;;  %v4190_v24 = vadd.f32 %v7959_v63, %v4151_v9  ;;  %v4087_v21 = vadd.f32 %v5727_v51, %v3926_v20 }
 0x20f   : > { %v4149_v34 = vmul.f32 %v7946_v31, %v4076_v6  ;;  %v4078_v25 = vpop.f32.mrf.mxu0  ;;  %v5650_v5 = vpop.f32.mrf.mxu1  ;;  %v3939_v1 = vadd.f32 %v5648_v33, %v8215_v43 }
 0x210   : > { %v4430_v36 = vld [vmem:[#allocation2 + $0x30] ss:$2 sm:$0xff]  ;;  %v4446_v46 = vld [vmem:[#allocation2 + $0x31] ss:$2 sm:$0xff]  ;;  %5206 = vst [vmem:[%s7997_s10 + $0x48] sm:$0xff] %v5146_v7   ;;  %v5141_v47 = vpack.c.bf16 %v4217_v40, %v4216_v12  ;;  %v4401_v10 = vmax.f32 %v4217_v40, %v4219_v18  ;;  %v4152_v27 = vmul.f32 %v7946_v31, %v4087_v21  ;;  %v4079_v15 = vadd.f32 %v4078_v25, %v3918_v4 }
 0x211   : > { %v4188_v48 = vadd.f32 %v7959_v63, %v4149_v34  ;;  %v4458_v13 = vmax.f32 %v4430_v36, %v4446_v46  ;;  %v4222_v57 = vmax.f32 %v4190_v24, 0.0  ;;  %v5651_v28 = vadd.f32 %v5650_v5, %v5649_v44 }
 0x212   : > { %5205 = vst [vmem:[%s7997_s10 + $0x40] sm:$0xff] %v5141_v47   ;;  %4417 = vst [vmem:[#allocation2 + $0x48] sm:$0xff] %v4401_v10  ;;  %v4191_v23 = vadd.f32 %v7959_v63, %v4152_v27  ;;  %v4150_v49 = vmul.f32 %v7946_v31, %v4079_v15 }
 0x213   : > { %v4220_v56 = vmax.f32 %v4188_v48, 0.0  ;;  %v5730_v55 = vpop.f32.mrf.mxu0  ;;  %v5186_v42 = vpack.c.bf16 %v4458_v13, %v4457_v8  ;;  %v5652_v59 = vpop.f32.mrf.mxu1  ;;  %v3942_v22 = vadd.f32 %v5651_v28, %v8216_v2 }
 0x214   : > { %v4100_v14 = vadd.f32 %v5730_v55, %v3939_v1  ;;  %v4223_v12 = vmax.f32 %v4191_v23, 0.0  ;;  %v4189_v41 = vadd.f32 %v7959_v63, %v4150_v49 }
 0x215   : > { %v4402_v3 = vmax.f32 %v4220_v56, %v4222_v57  ;;  %v4091_v62 = vpop.f32.mrf.mxu0  ;;  %5213 = vst [vmem:[%s8074_s13 + $0x8] sm:$0xff] %v5186_v42   ;;  %v5653_v58 = vpop.f32.mrf.mxu1  ;;  %v8219_v42 = vld [vmem:[#allocation14_spill] sm:$0xff] }
 0x216   : > { %v4155_v17 = vmul.f32 %v7946_v31, %v4100_v14  ;;  %v4092_v35 = vadd.f32 %v4091_v62, %v3931_v39  ;;  %v5156_v30 = vpack.c.bf16 %v4223_v12, %v4222_v57  ;;  %v4221_v61 = vmax.f32 %v4189_v41, 0.0 }
 0x217   : > { %4418 = vst [vmem:[#allocation2 + $0x50] sm:$0xff] %v4402_v3  ;;  %v5731_v38 = vpop.f32.mrf.mxu0  ;;  %v5655_v18 = vpop.f32.mrf.mxu1  ;;  %v5654_v19 = vadd.f32 %v5653_v58, %v5652_v59 }
 0x218   : > { %v4194_v29 = vadd.f32 %v7959_v63, %v4155_v17  ;;  %v4153_v53 = vmul.f32 %v7946_v31, %v4092_v35  ;;  %v4103_v52 = vadd.f32 %v5731_v38, %v3942_v22  ;;  %5208 = vst [vmem:[%s7997_s10 + $0x58] sm:$0xff] %v5156_v30   ;;  %v5151_v26 = vpack.c.bf16 %v4221_v61, %v4220_v56 }
 0x219   : > { %v4094_v9 = vpop.f32.mrf.mxu0  ;;  %v4403_v6 = vmax.f32 %v4221_v61, %v4223_v12  ;;  %v5656_v20 = vpop.f32.mrf.mxu1  ;;  %v3947_v4 = vadd.f32 %v5654_v19, %v8218_v16  ;;  %v4432_v48 = vld [vmem:[#allocation2 + $0x40] ss:$2 sm:$0xff]  ;;  %v4448_v5 = vld [vmem:[#allocation2 + $0x41] ss:$2 sm:$0xff] }
 0x21a   : > { %v4095_v32 = vadd.f32 %v4094_v9, %v3934_v45  ;;  %v4192_v33 = vadd.f32 %v7959_v63, %v4153_v53  ;;  %v4156_v50 = vmul.f32 %v7946_v31, %v4103_v52  ;;  %5207 = vst [vmem:[%s7997_s10 + $0x50] sm:$0xff] %v5151_v26   ;;  %v4226_v7 = vmax.f32 %v4194_v29, 0.0 }
 0x21b   : > { %4419 = vst [vmem:[#allocation2 + $0x58] sm:$0xff] %v4403_v6  ;;  %v5658_v34 = vpop.f32.mrf.mxu1  ;;  %v5734_v44 = vpop.f32.mrf.mxu0  ;;  %v5657_v39 = vadd.f32 %v5656_v20, %v5655_v18  ;;  %v4459_v14 = vmax.f32 %v4432_v48, %v4448_v5 }
 0x21c   : > { %v4154_v51 = vmul.f32 %v7946_v31, %v4095_v32  ;;  %v4224_v40 = vmax.f32 %v4192_v33, 0.0  ;;  %v4195_v24 = vadd.f32 %v7959_v63, %v4156_v50 }
 0x21d   : > { %v5659_v8 = vpop.f32.mrf.mxu1  ;;  %v4107_v36 = vpop.f32.mrf.mxu0  ;;  %v3950_v23 = vadd.f32 %v5657_v39, %v8219_v42 }
 0x21e   : > { %v4193_v21 = vadd.f32 %v7959_v63, %v4154_v51  ;;  %v4404_v25 = vmax.f32 %v4224_v40, %v4226_v7  ;;  %v4227_v60 = vmax.f32 %v4195_v24, 0.0  ;;  %v5660_v47 = vadd.f32 %v5659_v8, %v5658_v34 }
 0x21f   : > { %v4108_v10 = vadd.f32 %v4107_v36, %v3947_v4  ;;  %v5661_v27 = vpop.f32.mrf.mxu1  ;;  %v5735_v15 = vpop.f32.mrf.mxu0 }
 0x220   : > { %v4225_v46 = vmax.f32 %v4193_v21, 0.0  ;;  %4420 = vst [vmem:[#allocation2 + $0x60] sm:$0xff] %v4404_v25  ;;  %v5166_v13 = vpack.c.bf16 %v4227_v60, %v4226_v7  ;;  %v3955_v37 = vadd.f32 %v5660_v47, %v7936_v54 }
 0x221   : > { %v4157_v57 = vmul.f32 %v7946_v31, %v4108_v10  ;;  %v5662_v55 = vpop.f32.mrf.mxu1  ;;  %v4110_v49 = vpop.f32.mrf.mxu0 }
 0x222   : > { %v5161_v43 = vpack.c.bf16 %v4225_v46, %v4224_v40  ;;  %v4405_v1 = vmax.f32 %v4225_v46, %v4227_v60  ;;  %v4434_v56 = vld [vmem:[#allocation2 + $0x50] ss:$2 sm:$0xff]  ;;  %v4450_v28 = vld [vmem:[#allocation2 + $0x51] ss:$2 sm:$0xff]  ;;  %5210 = vst [vmem:[%s7997_s10 + $0x68] sm:$0xff] %v5166_v13   ;;  %v4116_v59 = vadd.f32 %v5734_v44, %v3955_v37  ;;  %v5663_v62 = vadd.f32 %v5662_v55, %v5661_v27 }
 0x223   : > { %v4460_v3 = vmax.f32 %v4434_v56, %v4450_v28  ;;  %v4111_v12 = vadd.f32 %v4110_v49, %v3950_v23  ;;  %v4196_v17 = vadd.f32 %v7959_v63, %v4157_v57 }
 0x224   : > { %5209 = vst [vmem:[%s7997_s10 + $0x60] sm:$0xff] %v5161_v43   ;;  %4421 = vst [vmem:[#allocation2 + $0x68] sm:$0xff] %v4405_v1  ;;  %v4159_v54 = vmul.f32 %v7946_v31, %v4116_v59  ;;  %v3958_v35 = vadd.f32 %v5663_v62, %v7951_v0 }
 0x225   : > { %v5191_v41 = vpack.c.bf16 %v4460_v3, %v4459_v14  ;;  %v4158_v58 = vmul.f32 %v7946_v31, %v4111_v12  ;;  %v4228_v30 = vmax.f32 %v4196_v17, 0.0 }
 0x226   : > { %v4198_v2 = vadd.f32 %v7959_v63, %v4159_v54  ;;  %v4119_v22 = vadd.f32 %v5735_v15, %v3958_v35 }
 0x227   : > { %5214 = vst [vmem:[%s8074_s13 + $0x10] sm:$0xff] %v5191_v41   ;;  %v4197_v38 = vadd.f32 %v7959_v63, %v4158_v58 }
 0x228   : > { %v4230_v61 = vmax.f32 %v4198_v2, 0.0  ;;  %v4160_v11 = vmul.f32 %v7946_v31, %v4119_v22 }
 0x229   : > { %v4229_v45 = vmax.f32 %v4197_v38, 0.0 }
 0x22a   : > { %v4406_v29 = vmax.f32 %v4228_v30, %v4230_v61  ;;  %v4199_v53 = vadd.f32 %v7959_v63, %v4160_v11 }
 0x22b   : > { %v5171_v18 = vpack.c.bf16 %v4229_v45, %v4228_v30  ;;  %v4436_v26 = vld [vmem:[#allocation2 + $0x60] ss:$2 sm:$0xff]  ;;  %v4452_v6 = vld [vmem:[#allocation2 + $0x61] ss:$2 sm:$0xff] }
 0x22c   : > { %4422 = vst [vmem:[#allocation2 + $0x70] sm:$0xff] %v4406_v29  ;;  %v4231_v0 = vmax.f32 %v4199_v53, 0.0  ;;  %v4461_v33 = vmax.f32 %v4436_v26, %v4452_v6 }
 0x22d   : > { %5211 = vst [vmem:[%s7997_s10 + $0x70] sm:$0xff] %v5171_v18  }
 0x22e   : > { %v5176_v52 = vpack.c.bf16 %v4231_v0, %v4230_v61  ;;  %v4407_v9 = vmax.f32 %v4229_v45, %v4231_v0 }
 0x230   : > { %5212 = vst [vmem:[%s7997_s10 + $0x78] sm:$0xff] %v5176_v52   ;;  %4423 = vst [vmem:[#allocation2 + $0x78] sm:$0xff] %v4407_v9 }
 0x237   : > { %v4438_v19 = vld [vmem:[#allocation2 + $0x70] ss:$2 sm:$0xff]  ;;  %v4454_v32 = vld [vmem:[#allocation2 + $0x71] ss:$2 sm:$0xff] }
 0x238   : > { %v4462_v50 = vmax.f32 %v4438_v19, %v4454_v32 }
 0x23a   : > { %v5196_v31 = vpack.c.bf16 %v4462_v50, %v4461_v33 }
 0x23c   : > { %5215 = vst [vmem:[%s8074_s13 + $0x18] sm:$0xff] %v5196_v31  }
 0x23d PF: > { %s16_s20 = sadd.s32 1, %s5926_s20   ;;  %s8220_s18 = smov %s5922_s19 }
 0x23e   : > { %p13_p5 = scmp.ge.s32.totalorder %s16_s20, 4   ;;  %s8221_s19 = smov %s8223_s21 }
 0x240   :  { %15 = sbr.rel (!%p13_p5) target bundleno = 2 (0x2), region = 96 }

</bundles_post_ra>
